<compile_context>
chip_gen: v7x
topology: tpu7x:2x2x1
jax: 0.10.0
libtpu: 0.0.40
codegen_flags: <defaults>
</compile_context>

<pallas_src>
import math

import jax
import jax.numpy as jnp
from jax import lax
from jax.experimental import pallas as pl
from jax.experimental.pallas import tpu as pltpu

MAX_ITEM = 300
EPS = 1e-05          # GINEConv eps

# ---- module config (matches GINEEmb defaults, small n_ff for the demo) ----
HIDDEN = 64          # hidden_channels
GROW = 1.5
N_LAYERS = 5
N_FF = 128
N_YDIM = 1
POS_DIM = 32         # pos_emb output width (EMB_OFFSET)

LANE = 128


def n_width(n):
    return math.floor(pow(GROW, n) + 0.01)


def _round_up(x, m):
    return ((x + m - 1) // m) * m


# true / lane-padded channel widths at each layer boundary
C_TRUE = [n_width(l) * HIDDEN for l in range(N_LAYERS + 1)]   # 64, 64, 128, 192, 320, 448
C_PAD = [_round_up(c, LANE) for c in C_TRUE]                  # 128,128,128,256,384,512

V_PAD = _round_up(MAX_ITEM + 1, LANE)   # 384: padded one-hot width of the vertex table
Y_PAD = LANE                            # head output padded 1 -> 128 (sliced outside)
EATTR_PAD = 8                           # edge_attr 4 -> 8
POS_PAD = 8                             # pos coords 3 -> 8


def gine_emb_kernel(nid_ref, posx_ref, eattr_ref, src_ref, tgt_ref, batch_ref,
                    emb_w_ref, posw_ref, eemb_w_ref, *rest):
    layer_refs = rest[:4 * N_LAYERS]
    hw1_ref, hb1_ref, hw2_ref, hb2_ref, out_ref = rest[4 * N_LAYERS:]

    N = nid_ref.shape[0]
    E = src_ref.shape[0]
    B = out_ref.shape[0]
    f32 = jnp.float32
    bf16 = jnp.bfloat16

    # ---- vertex embedding: 384-lane bf16 one-hot @ [384, 128] bf16 table ----
    v_iota = lax.broadcasted_iota(jnp.int32, (N, V_PAD), 1)
    onehot = (nid_ref[...] == v_iota).astype(bf16)                       # exact in bf16
    x = jnp.dot(onehot, emb_w_ref[...], preferred_element_type=f32)      # [N, 128]

    # ---- positional projection kept in f32 on the VPU (3 broadcasted FMAs);
    #      posw rows are host-placed so the result lands directly in cols 32..63.
    x = x + (posx_ref[:, 0:1] * posw_ref[0:1, :]
             + posx_ref[:, 1:2] * posw_ref[1:2, :]
             + posx_ref[:, 2:3] * posw_ref[2:3, :])

    # ---- edge embedding (lane-padded to 128) ----
    e_h = jnp.dot(eattr_ref[...].astype(bf16), eemb_w_ref[...],
                  preferred_element_type=f32)                            # [E, 128]
    e_hb = e_h.astype(bf16)                                              # loop-invariant

    # ---- one-hot gather / scatter matrices (exact in bf16, transpose-free) ----
    # gather:  x_j  = S_en @ x    with S_en[e, n] = (src[e] == n)
    # scatter: aggr = T_ne @ msg  with T_ne[n, e] = (tgt[e] == n)
    iota_en = lax.broadcasted_iota(jnp.int32, (E, N), 1)
    S_en = (src_ref[...] == iota_en).astype(bf16)                        # [E, N]
    iota_ne = lax.broadcasted_iota(jnp.int32, (N, E), 0)
    T_ne = (tgt_ref[...] == iota_ne).astype(bf16)                        # [N, E]

    # ---- ResGraphModule (GINEConv + ReLU + residual) x N_LAYERS ----
    for l in range(N_LAYERS):
        elw_ref, cw_ref, cb_ref, rw_ref = layer_refs[4 * l: 4 * l + 4]
        x_b = x.astype(bf16)
        ea = jnp.dot(e_hb, elw_ref[...], preferred_element_type=f32)     # edge_lin  [E, ci]
        x_j = jnp.dot(S_en, x_b, preferred_element_type=f32)             # gather    [E, ci]
        msg = jnp.maximum(x_j + ea, 0.0).astype(bf16)                    # GINE message ReLU
        aggr = jnp.dot(T_ne, msg, preferred_element_type=f32)            # scatter   [N, ci]
        h = (aggr + (1.0 + EPS) * x).astype(bf16)                        # (1+eps)*x_i + sum
        h = jnp.dot(h, cw_ref[...], preferred_element_type=f32) + cb_ref[...]
        h = jnp.maximum(h, 0.0)                                          # module ReLU
        # conv/res sum-fusion skipped on purpose: ReLU is conv-branch-only.
        x = h + jnp.dot(x_b, rw_ref[...], preferred_element_type=f32)    # residual branch

    # ---- global mean pool over `batch` ([B, N] one-hot, transpose-free) ----
    b_iota = lax.broadcasted_iota(jnp.int32, (B, N), 0)
    mask = (batch_ref[...] == b_iota)                                    # [B, N]
    counts = jnp.sum(mask.astype(f32), axis=-1, keepdims=True)           # [B, 1]
    sums = jnp.dot(mask.astype(bf16), x.astype(bf16),
                   preferred_element_type=f32)                           # [B, 512]
    pooled = sums * pl.reciprocal(jnp.maximum(counts, 1.0), approx=True)  # empty graph -> 0

    # ---- head: Linear -> GELU(tanh approx, EUP) -> Dropout(eval id) -> Linear ----
    h = jnp.dot(pooled.astype(bf16), hw1_ref[...],
                preferred_element_type=f32) + hb1_ref[...]
    h = 0.5 * h * (1.0 + jnp.tanh(0.7978845608028654 * (h + 0.044715 * h * h * h)))
    y = jnp.dot(h.astype(bf16), hw2_ref[...],
                preferred_element_type=f32) + hb2_ref[...]
    out_ref[...] = y                                                     # [B, 128]; col 0 real


# ---------------------------------------------------------------------------
# host-side parameter packing (padding / fusing / bf16 casting, done once)
# ---------------------------------------------------------------------------
def _place(a, rows, cols, dtype):
    """Zero-pad 2-D array `a` into the top-left of a [rows, cols] block."""
    out = jnp.zeros((rows, cols), jnp.float32)
    out = out.at[:a.shape[0], :a.shape[1]].set(a)
    return out.astype(dtype)


def init_params(key):
    """Unpadded parameters matching the PyTorch module layout ([in, out])."""
    H = HIDDEN
    keys = iter(jax.random.split(key, 32))
    nxt = lambda: next(keys)
    p = {}
    vt = jax.random.normal(nxt(), (MAX_ITEM + 1, H - POS_DIM), jnp.float32) * 0.1
    vt = vt.at[MAX_ITEM].set(0.0)                       # nn.Embedding padding_idx row
    p["vert_emb"] = vt
    p["pos_w"] = jax.random.normal(nxt(), (3, POS_DIM), jnp.float32) * 0.1
    p["edge_emb_w"] = jax.random.normal(nxt(), (4, H), jnp.float32) * 0.1
    for l in range(N_LAYERS):
        ci, co = C_TRUE[l], C_TRUE[l + 1]
        p[f"edge_lin_{l}"] = jax.random.normal(nxt(), (H, ci), jnp.float32) / math.sqrt(H)
        p[f"conv_w_{l}"] = jax.random.normal(nxt(), (ci, co), jnp.float32) / math.sqrt(ci)
        p[f"conv_b_{l}"] = jax.random.normal(nxt(), (1, co), jnp.float32) * 0.01
        p[f"res_w_{l}"] = jax.random.normal(nxt(), (ci, co), jnp.float32) / math.sqrt(ci)
    cf = C_TRUE[N_LAYERS]
    p["head_w1"] = jax.random.normal(nxt(), (cf, N_FF), jnp.float32) / math.sqrt(cf)
    p["head_b1"] = jax.random.normal(nxt(), (1, N_FF), jnp.float32) * 0.01
    p["head_w2"] = jax.random.normal(nxt(), (N_FF, N_YDIM), jnp.float32) / math.sqrt(N_FF)
    p["head_b2"] = jax.random.normal(nxt(), (1, N_YDIM), jnp.float32) * 0.01
    return p


def pack_params(p):
    bf16 = jnp.bfloat16
    H = HIDDEN
    packed = {}

    # vertex table: [384, 128] bf16 (rows 0..300, cols 0..31 real)
    packed["emb_w"] = _place(p["vert_emb"], V_PAD, C_PAD[0], bf16)

    # positional projection weight stays f32 (VPU path), placed into cols 32..63
    posw = jnp.zeros((POS_PAD, C_PAD[0]), jnp.float32)
    posw = posw.at[:3, H - POS_DIM:H].set(p["pos_w"])
    packed["pos_w"] = posw

    packed["edge_emb_w"] = _place(p["edge_emb_w"], EATTR_PAD, C_PAD[0], bf16)

    for l in range(N_LAYERS):
        packed[f"edge_lin_{l}"] = _place(p[f"edge_lin_{l}"], C_PAD[0], C_PAD[l], bf16)
        packed[f"conv_w_{l}"] = _place(p[f"conv_w_{l}"], C_PAD[l], C_PAD[l + 1], bf16)
        packed[f"conv_b_{l}"] = _place(p[f"conv_b_{l}"], 1, C_PAD[l + 1], jnp.float32)
        packed[f"res_w_{l}"] = _place(p[f"res_w_{l}"], C_PAD[l], C_PAD[l + 1], bf16)

    packed["head_w1"] = _place(p["head_w1"], C_PAD[N_LAYERS], N_FF, bf16)
    packed["head_b1"] = _place(p["head_b1"], 1, N_FF, jnp.float32)
    packed["head_w2"] = _place(p["head_w2"], N_FF, Y_PAD, bf16)
    packed["head_b2"] = _place(p["head_b2"], 1, Y_PAD, jnp.float32)
    return packed


def _cost_estimate(args, N, E, B):
    """Advisory FLOP / byte counts so XLA can schedule around the custom call."""
    fl = 2 * N * V_PAD * C_PAD[0] + 2 * N * 3 * C_PAD[0]      # vertex emb + pos proj
    fl += 2 * E * EATTR_PAD * C_PAD[0]                        # edge embedding
    for l in range(N_LAYERS):
        ci, co = C_PAD[l], C_PAD[l + 1]
        fl += 2 * E * C_PAD[0] * ci                           # edge_lin
        fl += 2 * E * N * ci                                  # gather
        fl += 2 * N * E * ci                                  # scatter-add
        fl += 4 * N * ci * co                                 # conv + residual
    fl += 2 * B * N * C_PAD[N_LAYERS]                         # mean pool
    fl += 2 * B * C_PAD[N_LAYERS] * N_FF + 2 * B * N_FF * Y_PAD
    in_bytes = sum(int(a.size) * a.dtype.itemsize for a in args)
    return pl.CostEstimate(flops=int(fl),
                           transcendentals=int(B * (N_FF + 1)),
                           bytes_accessed=int(in_bytes + B * Y_PAD * 4))


def gine_emb_forward(node_idx, pos, edge_attr, edge_index, batch, packed, num_graphs):
    N = int(node_idx.shape[0])
    E = int(edge_attr.shape[0])

    # host-side layout prep (O(N+E) zero-padding / row-vector transposes)
    nid = node_idx.reshape(N, 1).astype(jnp.int32)
    posx = jnp.zeros((N, POS_PAD), jnp.float32).at[:, :3].set(pos)
    ea_pad = jnp.zeros((E, EATTR_PAD), jnp.float32).at[:, :4].set(edge_attr)
    src = edge_index[0].reshape(E, 1).astype(jnp.int32)
    tgt_row = edge_index[1].reshape(1, E).astype(jnp.int32)
    batch_row = batch.reshape(1, N).astype(jnp.int32)

    args = [nid, posx, ea_pad, src, tgt_row, batch_row,
            packed["emb_w"], packed["pos_w"], packed["edge_emb_w"]]
    for l in range(N_LAYERS):
        args += [packed[f"edge_lin_{l}"], packed[f"conv_w_{l}"],
                 packed[f"conv_b_{l}"], packed[f"res_w_{l}"]]
    args += [packed["head_w1"], packed["head_b1"], packed["head_w2"], packed["head_b2"]]

    vmem = pl.BlockSpec(memory_space=pltpu.MemorySpace.VMEM)
    out = pl.pallas_call(
        gine_emb_kernel,
        out_shape=jax.ShapeDtypeStruct((num_graphs, Y_PAD), jnp.float32),
        in_specs=[vmem] * len(args),
        out_specs=vmem,
        cost_estimate=_cost_estimate(args, N, E, num_graphs),
    )(*args)
    return out[:, :N_YDIM]        # drop the lane padding of the head output


if __name__ == "__main__":
    key = jax.random.PRNGKey(0)
    kp, kd = jax.random.split(key)
    params = init_params(kp)
    packed = pack_params(params)

    N, E, B = 16, 32, 2                                # nodes, edges, graphs
    k1, k2, k3, k4, k5 = jax.random.split(kd, 5)
    node_idx = jax.random.randint(k1, (N,), 0, MAX_ITEM + 1, dtype=jnp.int32)
    pos = jax.random.normal(k2, (N, 3), jnp.float32)
    edge_attr = jax.random.normal(k3, (E, 4), jnp.float32)
    src = jax.random.randint(k4, (E,), 0, N, dtype=jnp.int32)
    tgt = (src + 1 + jax.random.randint(k5, (E,), 0, N - 1, dtype=jnp.int32)) % N
    edge_index = jnp.stack([src, tgt], axis=0).astype(jnp.int32)   # [2, E] as in PyTorch
    batch = jnp.concatenate([jnp.zeros((N // 2,), jnp.int32),
                             jnp.ones((N - N // 2,), jnp.int32)], axis=0)

    out = gine_emb_forward(node_idx, pos, edge_attr, edge_index, batch, packed, B)
    out = jax.block_until_ready(out)
    assert out.shape == (B, N_YDIM), out.shape
    assert bool(jnp.all(jnp.isfinite(out)))
    print("KERNEL_OK")
</pallas_src>

<mosaic_0001>
module attributes {stable_mosaic.version = 11 : i64} {
  func.func @gine_emb_kernel(%arg0: memref<16x1xi32, #tpu.memory_space<vmem>>, %arg1: memref<16x8xf32, #tpu.memory_space<vmem>>, %arg2: memref<32x8xf32, #tpu.memory_space<vmem>>, %arg3: memref<32x1xi32, #tpu.memory_space<vmem>>, %arg4: memref<1x32xi32, #tpu.memory_space<vmem>>, %arg5: memref<1x16xi32, #tpu.memory_space<vmem>>, %arg6: memref<384x128xbf16, #tpu.memory_space<vmem>>, %arg7: memref<8x128xf32, #tpu.memory_space<vmem>>, %arg8: memref<8x128xbf16, #tpu.memory_space<vmem>>, %arg9: memref<128x128xbf16, #tpu.memory_space<vmem>>, %arg10: memref<128x128xbf16, #tpu.memory_space<vmem>>, %arg11: memref<1x128xf32, #tpu.memory_space<vmem>>, %arg12: memref<128x128xbf16, #tpu.memory_space<vmem>>, %arg13: memref<128x128xbf16, #tpu.memory_space<vmem>>, %arg14: memref<128x128xbf16, #tpu.memory_space<vmem>>, %arg15: memref<1x128xf32, #tpu.memory_space<vmem>>, %arg16: memref<128x128xbf16, #tpu.memory_space<vmem>>, %arg17: memref<128x128xbf16, #tpu.memory_space<vmem>>, %arg18: memref<128x256xbf16, #tpu.memory_space<vmem>>, %arg19: memref<1x256xf32, #tpu.memory_space<vmem>>, %arg20: memref<128x256xbf16, #tpu.memory_space<vmem>>, %arg21: memref<128x256xbf16, #tpu.memory_space<vmem>>, %arg22: memref<256x384xbf16, #tpu.memory_space<vmem>>, %arg23: memref<1x384xf32, #tpu.memory_space<vmem>>, %arg24: memref<256x384xbf16, #tpu.memory_space<vmem>>, %arg25: memref<128x384xbf16, #tpu.memory_space<vmem>>, %arg26: memref<384x512xbf16, #tpu.memory_space<vmem>>, %arg27: memref<1x512xf32, #tpu.memory_space<vmem>>, %arg28: memref<384x512xbf16, #tpu.memory_space<vmem>>, %arg29: memref<512x128xbf16, #tpu.memory_space<vmem>>, %arg30: memref<1x128xf32, #tpu.memory_space<vmem>>, %arg31: memref<128x128xbf16, #tpu.memory_space<vmem>>, %arg32: memref<1x128xf32, #tpu.memory_space<vmem>>, %arg33: memref<2x128xf32, #tpu.memory_space<vmem>>) attributes {dimension_semantics = [], scalar_prefetch = 0 : i64, scratch_operands = 0 : i64, tpu.core_type = #tpu.core_type<tc>} {
    %0 = tpu.iota {dimensions = array<i32: 1>} : vector<16x384xi32>
    %c0 = arith.constant 0 : index
    %c0_0 = arith.constant 0 : index
    %1 = vector.load %arg0[%c0, %c0_0] : memref<16x1xi32, #tpu.memory_space<vmem>>, vector<16x1xi32>
    %2 = vector.broadcast %1 : vector<16x1xi32> to vector<16x384xi32>
    %3 = arith.cmpi eq, %2, %0 : vector<16x384xi32>
    %4 = arith.extui %3 : vector<16x384xi1> to vector<16x384xi32>
    %5 = arith.sitofp %4 : vector<16x384xi32> to vector<16x384xf32>
    %6 = arith.truncf %5 : vector<16x384xf32> to vector<16x384xbf16>
    %c0_1 = arith.constant 0 : index
    %c0_2 = arith.constant 0 : index
    %7 = vector.load %arg6[%c0_1, %c0_2] : memref<384x128xbf16, #tpu.memory_space<vmem>>, vector<384x128xbf16>
    %cst = arith.constant dense<0.000000e+00> : vector<16x128xf32>
    %8 = tpu.matmul %6, %7, %cst {dimension_numbers = #tpu.dot_dimension_numbers<[1], [0], [0], [1], [0, 0, 1, 1], [], []>} : vector<16x384xbf16>, vector<384x128xbf16>, vector<16x128xf32> -> vector<16x128xf32>
    %c0_3 = arith.constant 0 : index
    %c0_4 = arith.constant 0 : index
    %9 = vector.load %arg1[%c0_3, %c0_4] : memref<16x8xf32, #tpu.memory_space<vmem>>, vector<16x1xf32>
    %c0_5 = arith.constant 0 : index
    %c0_6 = arith.constant 0 : index
    %10 = vector.load %arg7[%c0_5, %c0_6] : memref<8x128xf32, #tpu.memory_space<vmem>>, vector<1x128xf32>
    %11 = vector.broadcast %9 : vector<16x1xf32> to vector<16x128xf32>
    %12 = vector.broadcast %10 : vector<1x128xf32> to vector<16x128xf32>
    %13 = arith.mulf %11, %12 : vector<16x128xf32>
    %c0_7 = arith.constant 0 : index
    %c1 = arith.constant 1 : index
    %14 = vector.load %arg1[%c0_7, %c1] : memref<16x8xf32, #tpu.memory_space<vmem>>, vector<16x1xf32>
    %c1_8 = arith.constant 1 : index
    %c0_9 = arith.constant 0 : index
    %15 = vector.load %arg7[%c1_8, %c0_9] : memref<8x128xf32, #tpu.memory_space<vmem>>, vector<1x128xf32>
    %16 = vector.broadcast %14 : vector<16x1xf32> to vector<16x128xf32>
    %17 = vector.broadcast %15 : vector<1x128xf32> to vector<16x128xf32>
    %18 = arith.mulf %16, %17 : vector<16x128xf32>
    %19 = arith.addf %13, %18 : vector<16x128xf32>
    %c0_10 = arith.constant 0 : index
    %c2 = arith.constant 2 : index
    %20 = vector.load %arg1[%c0_10, %c2] : memref<16x8xf32, #tpu.memory_space<vmem>>, vector<16x1xf32>
    %c2_11 = arith.constant 2 : index
    %c0_12 = arith.constant 0 : index
    %21 = vector.load %arg7[%c2_11, %c0_12] : memref<8x128xf32, #tpu.memory_space<vmem>>, vector<1x128xf32>
    %22 = vector.broadcast %20 : vector<16x1xf32> to vector<16x128xf32>
    %23 = vector.broadcast %21 : vector<1x128xf32> to vector<16x128xf32>
    %24 = arith.mulf %22, %23 : vector<16x128xf32>
    %25 = arith.addf %19, %24 : vector<16x128xf32>
    %26 = arith.addf %8, %25 : vector<16x128xf32>
    %c0_13 = arith.constant 0 : index
    %c0_14 = arith.constant 0 : index
    %27 = vector.load %arg2[%c0_13, %c0_14] : memref<32x8xf32, #tpu.memory_space<vmem>>, vector<32x8xf32>
    %28 = arith.truncf %27 : vector<32x8xf32> to vector<32x8xbf16>
    %c0_15 = arith.constant 0 : index
    %c0_16 = arith.constant 0 : index
    %29 = vector.load %arg8[%c0_15, %c0_16] : memref<8x128xbf16, #tpu.memory_space<vmem>>, vector<8x128xbf16>
    %cst_17 = arith.constant dense<0.000000e+00> : vector<32x128xf32>
    %30 = tpu.matmul %28, %29, %cst_17 {dimension_numbers = #tpu.dot_dimension_numbers<[1], [0], [0], [1], [0, 0, 1, 1], [], []>} : vector<32x8xbf16>, vector<8x128xbf16>, vector<32x128xf32> -> vector<32x128xf32>
    %31 = arith.truncf %30 : vector<32x128xf32> to vector<32x128xbf16>
    %32 = tpu.iota {dimensions = array<i32: 1>} : vector<32x16xi32>
    %c0_18 = arith.constant 0 : index
    %c0_19 = arith.constant 0 : index
    %33 = vector.load %arg3[%c0_18, %c0_19] : memref<32x1xi32, #tpu.memory_space<vmem>>, vector<32x1xi32>
    %34 = vector.broadcast %33 : vector<32x1xi32> to vector<32x16xi32>
    %35 = arith.cmpi eq, %34, %32 : vector<32x16xi32>
    %36 = arith.extui %35 : vector<32x16xi1> to vector<32x16xi32>
    %37 = arith.sitofp %36 : vector<32x16xi32> to vector<32x16xf32>
    %38 = arith.truncf %37 : vector<32x16xf32> to vector<32x16xbf16>
    %39 = tpu.iota {dimensions = array<i32: 0>} : vector<16x32xi32>
    %c0_20 = arith.constant 0 : index
    %c0_21 = arith.constant 0 : index
    %40 = vector.load %arg4[%c0_20, %c0_21] : memref<1x32xi32, #tpu.memory_space<vmem>>, vector<1x32xi32>
    %41 = vector.broadcast %40 : vector<1x32xi32> to vector<16x32xi32>
    %42 = arith.cmpi eq, %41, %39 : vector<16x32xi32>
    %43 = arith.extui %42 : vector<16x32xi1> to vector<16x32xi32>
    %44 = arith.sitofp %43 : vector<16x32xi32> to vector<16x32xf32>
    %45 = arith.truncf %44 : vector<16x32xf32> to vector<16x32xbf16>
    %46 = arith.truncf %26 : vector<16x128xf32> to vector<16x128xbf16>
    %c0_22 = arith.constant 0 : index
    %c0_23 = arith.constant 0 : index
    %47 = vector.load %arg9[%c0_22, %c0_23] : memref<128x128xbf16, #tpu.memory_space<vmem>>, vector<128x128xbf16>
    %cst_24 = arith.constant dense<0.000000e+00> : vector<32x128xf32>
    %48 = tpu.matmul %31, %47, %cst_24 {dimension_numbers = #tpu.dot_dimension_numbers<[1], [0], [0], [1], [0, 0, 1, 1], [], []>} : vector<32x128xbf16>, vector<128x128xbf16>, vector<32x128xf32> -> vector<32x128xf32>
    %cst_25 = arith.constant dense<0.000000e+00> : vector<32x128xf32>
    %49 = tpu.matmul %38, %46, %cst_25 {dimension_numbers = #tpu.dot_dimension_numbers<[1], [0], [0], [1], [0, 0, 1, 1], [], []>} : vector<32x16xbf16>, vector<16x128xbf16>, vector<32x128xf32> -> vector<32x128xf32>
    %50 = arith.addf %49, %48 : vector<32x128xf32>
    %cst_26 = arith.constant 0.000000e+00 : f32
    %51 = vector.broadcast %cst_26 : f32 to vector<32x128xf32>
    %52 = arith.maximumf %50, %51 : vector<32x128xf32>
    %53 = arith.truncf %52 : vector<32x128xf32> to vector<32x128xbf16>
    %cst_27 = arith.constant dense<0.000000e+00> : vector<16x128xf32>
    %54 = tpu.matmul %45, %53, %cst_27 {dimension_numbers = #tpu.dot_dimension_numbers<[1], [0], [0], [1], [0, 0, 1, 1], [], []>} : vector<16x32xbf16>, vector<32x128xbf16>, vector<16x128xf32> -> vector<16x128xf32>
    %cst_28 = arith.constant 1.000010e+00 : f32
    %55 = vector.broadcast %cst_28 : f32 to vector<16x128xf32>
    %56 = arith.mulf %55, %26 : vector<16x128xf32>
    %57 = arith.addf %54, %56 : vector<16x128xf32>
    %58 = arith.truncf %57 : vector<16x128xf32> to vector<16x128xbf16>
    %c0_29 = arith.constant 0 : index
    %c0_30 = arith.constant 0 : index
    %59 = vector.load %arg10[%c0_29, %c0_30] : memref<128x128xbf16, #tpu.memory_space<vmem>>, vector<128x128xbf16>
    %cst_31 = arith.constant dense<0.000000e+00> : vector<16x128xf32>
    %60 = tpu.matmul %58, %59, %cst_31 {dimension_numbers = #tpu.dot_dimension_numbers<[1], [0], [0], [1], [0, 0, 1, 1], [], []>} : vector<16x128xbf16>, vector<128x128xbf16>, vector<16x128xf32> -> vector<16x128xf32>
    %c0_32 = arith.constant 0 : index
    %c0_33 = arith.constant 0 : index
    %61 = vector.load %arg11[%c0_32, %c0_33] : memref<1x128xf32, #tpu.memory_space<vmem>>, vector<1x128xf32>
    %62 = vector.broadcast %61 : vector<1x128xf32> to vector<16x128xf32>
    %63 = arith.addf %60, %62 : vector<16x128xf32>
    %cst_34 = arith.constant 0.000000e+00 : f32
    %64 = vector.broadcast %cst_34 : f32 to vector<16x128xf32>
    %65 = arith.maximumf %63, %64 : vector<16x128xf32>
    %c0_35 = arith.constant 0 : index
    %c0_36 = arith.constant 0 : index
    %66 = vector.load %arg12[%c0_35, %c0_36] : memref<128x128xbf16, #tpu.memory_space<vmem>>, vector<128x128xbf16>
    %cst_37 = arith.constant dense<0.000000e+00> : vector<16x128xf32>
    %67 = tpu.matmul %46, %66, %cst_37 {dimension_numbers = #tpu.dot_dimension_numbers<[1], [0], [0], [1], [0, 0, 1, 1], [], []>} : vector<16x128xbf16>, vector<128x128xbf16>, vector<16x128xf32> -> vector<16x128xf32>
    %68 = arith.addf %65, %67 : vector<16x128xf32>
    %69 = arith.truncf %68 : vector<16x128xf32> to vector<16x128xbf16>
    %c0_38 = arith.constant 0 : index
    %c0_39 = arith.constant 0 : index
    %70 = vector.load %arg13[%c0_38, %c0_39] : memref<128x128xbf16, #tpu.memory_space<vmem>>, vector<128x128xbf16>
    %cst_40 = arith.constant dense<0.000000e+00> : vector<32x128xf32>
    %71 = tpu.matmul %31, %70, %cst_40 {dimension_numbers = #tpu.dot_dimension_numbers<[1], [0], [0], [1], [0, 0, 1, 1], [], []>} : vector<32x128xbf16>, vector<128x128xbf16>, vector<32x128xf32> -> vector<32x128xf32>
    %cst_41 = arith.constant dense<0.000000e+00> : vector<32x128xf32>
    %72 = tpu.matmul %38, %69, %cst_41 {dimension_numbers = #tpu.dot_dimension_numbers<[1], [0], [0], [1], [0, 0, 1, 1], [], []>} : vector<32x16xbf16>, vector<16x128xbf16>, vector<32x128xf32> -> vector<32x128xf32>
    %73 = arith.addf %72, %71 : vector<32x128xf32>
    %cst_42 = arith.constant 0.000000e+00 : f32
    %74 = vector.broadcast %cst_42 : f32 to vector<32x128xf32>
    %75 = arith.maximumf %73, %74 : vector<32x128xf32>
    %76 = arith.truncf %75 : vector<32x128xf32> to vector<32x128xbf16>
    %cst_43 = arith.constant dense<0.000000e+00> : vector<16x128xf32>
    %77 = tpu.matmul %45, %76, %cst_43 {dimension_numbers = #tpu.dot_dimension_numbers<[1], [0], [0], [1], [0, 0, 1, 1], [], []>} : vector<16x32xbf16>, vector<32x128xbf16>, vector<16x128xf32> -> vector<16x128xf32>
    %cst_44 = arith.constant 1.000010e+00 : f32
    %78 = vector.broadcast %cst_44 : f32 to vector<16x128xf32>
    %79 = arith.mulf %78, %68 : vector<16x128xf32>
    %80 = arith.addf %77, %79 : vector<16x128xf32>
    %81 = arith.truncf %80 : vector<16x128xf32> to vector<16x128xbf16>
    %c0_45 = arith.constant 0 : index
    %c0_46 = arith.constant 0 : index
    %82 = vector.load %arg14[%c0_45, %c0_46] : memref<128x128xbf16, #tpu.memory_space<vmem>>, vector<128x128xbf16>
    %cst_47 = arith.constant dense<0.000000e+00> : vector<16x128xf32>
    %83 = tpu.matmul %81, %82, %cst_47 {dimension_numbers = #tpu.dot_dimension_numbers<[1], [0], [0], [1], [0, 0, 1, 1], [], []>} : vector<16x128xbf16>, vector<128x128xbf16>, vector<16x128xf32> -> vector<16x128xf32>
    %c0_48 = arith.constant 0 : index
    %c0_49 = arith.constant 0 : index
    %84 = vector.load %arg15[%c0_48, %c0_49] : memref<1x128xf32, #tpu.memory_space<vmem>>, vector<1x128xf32>
    %85 = vector.broadcast %84 : vector<1x128xf32> to vector<16x128xf32>
    %86 = arith.addf %83, %85 : vector<16x128xf32>
    %cst_50 = arith.constant 0.000000e+00 : f32
    %87 = vector.broadcast %cst_50 : f32 to vector<16x128xf32>
    %88 = arith.maximumf %86, %87 : vector<16x128xf32>
    %c0_51 = arith.constant 0 : index
    %c0_52 = arith.constant 0 : index
    %89 = vector.load %arg16[%c0_51, %c0_52] : memref<128x128xbf16, #tpu.memory_space<vmem>>, vector<128x128xbf16>
    %cst_53 = arith.constant dense<0.000000e+00> : vector<16x128xf32>
    %90 = tpu.matmul %69, %89, %cst_53 {dimension_numbers = #tpu.dot_dimension_numbers<[1], [0], [0], [1], [0, 0, 1, 1], [], []>} : vector<16x128xbf16>, vector<128x128xbf16>, vector<16x128xf32> -> vector<16x128xf32>
    %91 = arith.addf %88, %90 : vector<16x128xf32>
    %92 = arith.truncf %91 : vector<16x128xf32> to vector<16x128xbf16>
    %c0_54 = arith.constant 0 : index
    %c0_55 = arith.constant 0 : index
    %93 = vector.load %arg17[%c0_54, %c0_55] : memref<128x128xbf16, #tpu.memory_space<vmem>>, vector<128x128xbf16>
    %cst_56 = arith.constant dense<0.000000e+00> : vector<32x128xf32>
    %94 = tpu.matmul %31, %93, %cst_56 {dimension_numbers = #tpu.dot_dimension_numbers<[1], [0], [0], [1], [0, 0, 1, 1], [], []>} : vector<32x128xbf16>, vector<128x128xbf16>, vector<32x128xf32> -> vector<32x128xf32>
    %cst_57 = arith.constant dense<0.000000e+00> : vector<32x128xf32>
    %95 = tpu.matmul %38, %92, %cst_57 {dimension_numbers = #tpu.dot_dimension_numbers<[1], [0], [0], [1], [0, 0, 1, 1], [], []>} : vector<32x16xbf16>, vector<16x128xbf16>, vector<32x128xf32> -> vector<32x128xf32>
    %96 = arith.addf %95, %94 : vector<32x128xf32>
    %cst_58 = arith.constant 0.000000e+00 : f32
    %97 = vector.broadcast %cst_58 : f32 to vector<32x128xf32>
    %98 = arith.maximumf %96, %97 : vector<32x128xf32>
    %99 = arith.truncf %98 : vector<32x128xf32> to vector<32x128xbf16>
    %cst_59 = arith.constant dense<0.000000e+00> : vector<16x128xf32>
    %100 = tpu.matmul %45, %99, %cst_59 {dimension_numbers = #tpu.dot_dimension_numbers<[1], [0], [0], [1], [0, 0, 1, 1], [], []>} : vector<16x32xbf16>, vector<32x128xbf16>, vector<16x128xf32> -> vector<16x128xf32>
    %cst_60 = arith.constant 1.000010e+00 : f32
    %101 = vector.broadcast %cst_60 : f32 to vector<16x128xf32>
    %102 = arith.mulf %101, %91 : vector<16x128xf32>
    %103 = arith.addf %100, %102 : vector<16x128xf32>
    %104 = arith.truncf %103 : vector<16x128xf32> to vector<16x128xbf16>
    %c0_61 = arith.constant 0 : index
    %c0_62 = arith.constant 0 : index
    %105 = vector.load %arg18[%c0_61, %c0_62] : memref<128x256xbf16, #tpu.memory_space<vmem>>, vector<128x256xbf16>
    %cst_63 = arith.constant dense<0.000000e+00> : vector<16x256xf32>
    %106 = tpu.matmul %104, %105, %cst_63 {dimension_numbers = #tpu.dot_dimension_numbers<[1], [0], [0], [1], [0, 0, 1, 1], [], []>} : vector<16x128xbf16>, vector<128x256xbf16>, vector<16x256xf32> -> vector<16x256xf32>
    %c0_64 = arith.constant 0 : index
    %c0_65 = arith.constant 0 : index
    %107 = vector.load %arg19[%c0_64, %c0_65] : memref<1x256xf32, #tpu.memory_space<vmem>>, vector<1x256xf32>
    %108 = vector.broadcast %107 : vector<1x256xf32> to vector<16x256xf32>
    %109 = arith.addf %106, %108 : vector<16x256xf32>
    %cst_66 = arith.constant 0.000000e+00 : f32
    %110 = vector.broadcast %cst_66 : f32 to vector<16x256xf32>
    %111 = arith.maximumf %109, %110 : vector<16x256xf32>
    %c0_67 = arith.constant 0 : index
    %c0_68 = arith.constant 0 : index
    %112 = vector.load %arg20[%c0_67, %c0_68] : memref<128x256xbf16, #tpu.memory_space<vmem>>, vector<128x256xbf16>
    %cst_69 = arith.constant dense<0.000000e+00> : vector<16x256xf32>
    %113 = tpu.matmul %92, %112, %cst_69 {dimension_numbers = #tpu.dot_dimension_numbers<[1], [0], [0], [1], [0, 0, 1, 1], [], []>} : vector<16x128xbf16>, vector<128x256xbf16>, vector<16x256xf32> -> vector<16x256xf32>
    %114 = arith.addf %111, %113 : vector<16x256xf32>
    %115 = arith.truncf %114 : vector<16x256xf32> to vector<16x256xbf16>
    %c0_70 = arith.constant 0 : index
    %c0_71 = arith.constant 0 : index
    %116 = vector.load %arg21[%c0_70, %c0_71] : memref<128x256xbf16, #tpu.memory_space<vmem>>, vector<128x256xbf16>
    %cst_72 = arith.constant dense<0.000000e+00> : vector<32x256xf32>
    %117 = tpu.matmul %31, %116, %cst_72 {dimension_numbers = #tpu.dot_dimension_numbers<[1], [0], [0], [1], [0, 0, 1, 1], [], []>} : vector<32x128xbf16>, vector<128x256xbf16>, vector<32x256xf32> -> vector<32x256xf32>
    %cst_73 = arith.constant dense<0.000000e+00> : vector<32x256xf32>
    %118 = tpu.matmul %38, %115, %cst_73 {dimension_numbers = #tpu.dot_dimension_numbers<[1], [0], [0], [1], [0, 0, 1, 1], [], []>} : vector<32x16xbf16>, vector<16x256xbf16>, vector<32x256xf32> -> vector<32x256xf32>
    %119 = arith.addf %118, %117 : vector<32x256xf32>
    %cst_74 = arith.constant 0.000000e+00 : f32
    %120 = vector.broadcast %cst_74 : f32 to vector<32x256xf32>
    %121 = arith.maximumf %119, %120 : vector<32x256xf32>
    %122 = arith.truncf %121 : vector<32x256xf32> to vector<32x256xbf16>
    %cst_75 = arith.constant dense<0.000000e+00> : vector<16x256xf32>
    %123 = tpu.matmul %45, %122, %cst_75 {dimension_numbers = #tpu.dot_dimension_numbers<[1], [0], [0], [1], [0, 0, 1, 1], [], []>} : vector<16x32xbf16>, vector<32x256xbf16>, vector<16x256xf32> -> vector<16x256xf32>
    %cst_76 = arith.constant 1.000010e+00 : f32
    %124 = vector.broadcast %cst_76 : f32 to vector<16x256xf32>
    %125 = arith.mulf %124, %114 : vector<16x256xf32>
    %126 = arith.addf %123, %125 : vector<16x256xf32>
    %127 = arith.truncf %126 : vector<16x256xf32> to vector<16x256xbf16>
    %c0_77 = arith.constant 0 : index
    %c0_78 = arith.constant 0 : index
    %128 = vector.load %arg22[%c0_77, %c0_78] : memref<256x384xbf16, #tpu.memory_space<vmem>>, vector<256x384xbf16>
    %cst_79 = arith.constant dense<0.000000e+00> : vector<16x384xf32>
    %129 = tpu.matmul %127, %128, %cst_79 {dimension_numbers = #tpu.dot_dimension_numbers<[1], [0], [0], [1], [0, 0, 1, 1], [], []>} : vector<16x256xbf16>, vector<256x384xbf16>, vector<16x384xf32> -> vector<16x384xf32>
    %c0_80 = arith.constant 0 : index
    %c0_81 = arith.constant 0 : index
    %130 = vector.load %arg23[%c0_80, %c0_81] : memref<1x384xf32, #tpu.memory_space<vmem>>, vector<1x384xf32>
    %131 = vector.broadcast %130 : vector<1x384xf32> to vector<16x384xf32>
    %132 = arith.addf %129, %131 : vector<16x384xf32>
    %cst_82 = arith.constant 0.000000e+00 : f32
    %133 = vector.broadcast %cst_82 : f32 to vector<16x384xf32>
    %134 = arith.maximumf %132, %133 : vector<16x384xf32>
    %c0_83 = arith.constant 0 : index
    %c0_84 = arith.constant 0 : index
    %135 = vector.load %arg24[%c0_83, %c0_84] : memref<256x384xbf16, #tpu.memory_space<vmem>>, vector<256x384xbf16>
    %cst_85 = arith.constant dense<0.000000e+00> : vector<16x384xf32>
    %136 = tpu.matmul %115, %135, %cst_85 {dimension_numbers = #tpu.dot_dimension_numbers<[1], [0], [0], [1], [0, 0, 1, 1], [], []>} : vector<16x256xbf16>, vector<256x384xbf16>, vector<16x384xf32> -> vector<16x384xf32>
    %137 = arith.addf %134, %136 : vector<16x384xf32>
    %138 = arith.truncf %137 : vector<16x384xf32> to vector<16x384xbf16>
    %c0_86 = arith.constant 0 : index
    %c0_87 = arith.constant 0 : index
    %139 = vector.load %arg25[%c0_86, %c0_87] : memref<128x384xbf16, #tpu.memory_space<vmem>>, vector<128x384xbf16>
    %cst_88 = arith.constant dense<0.000000e+00> : vector<32x384xf32>
    %140 = tpu.matmul %31, %139, %cst_88 {dimension_numbers = #tpu.dot_dimension_numbers<[1], [0], [0], [1], [0, 0, 1, 1], [], []>} : vector<32x128xbf16>, vector<128x384xbf16>, vector<32x384xf32> -> vector<32x384xf32>
    %cst_89 = arith.constant dense<0.000000e+00> : vector<32x384xf32>
    %141 = tpu.matmul %38, %138, %cst_89 {dimension_numbers = #tpu.dot_dimension_numbers<[1], [0], [0], [1], [0, 0, 1, 1], [], []>} : vector<32x16xbf16>, vector<16x384xbf16>, vector<32x384xf32> -> vector<32x384xf32>
    %142 = arith.addf %141, %140 : vector<32x384xf32>
    %cst_90 = arith.constant 0.000000e+00 : f32
    %143 = vector.broadcast %cst_90 : f32 to vector<32x384xf32>
    %144 = arith.maximumf %142, %143 : vector<32x384xf32>
    %145 = arith.truncf %144 : vector<32x384xf32> to vector<32x384xbf16>
    %cst_91 = arith.constant dense<0.000000e+00> : vector<16x384xf32>
    %146 = tpu.matmul %45, %145, %cst_91 {dimension_numbers = #tpu.dot_dimension_numbers<[1], [0], [0], [1], [0, 0, 1, 1], [], []>} : vector<16x32xbf16>, vector<32x384xbf16>, vector<16x384xf32> -> vector<16x384xf32>
    %cst_92 = arith.constant 1.000010e+00 : f32
    %147 = vector.broadcast %cst_92 : f32 to vector<16x384xf32>
    %148 = arith.mulf %147, %137 : vector<16x384xf32>
    %149 = arith.addf %146, %148 : vector<16x384xf32>
    %150 = arith.truncf %149 : vector<16x384xf32> to vector<16x384xbf16>
    %c0_93 = arith.constant 0 : index
    %c0_94 = arith.constant 0 : index
    %151 = vector.load %arg26[%c0_93, %c0_94] : memref<384x512xbf16, #tpu.memory_space<vmem>>, vector<384x512xbf16>
    %cst_95 = arith.constant dense<0.000000e+00> : vector<16x512xf32>
    %152 = tpu.matmul %150, %151, %cst_95 {dimension_numbers = #tpu.dot_dimension_numbers<[1], [0], [0], [1], [0, 0, 1, 1], [], []>} : vector<16x384xbf16>, vector<384x512xbf16>, vector<16x512xf32> -> vector<16x512xf32>
    %c0_96 = arith.constant 0 : index
    %c0_97 = arith.constant 0 : index
    %153 = vector.load %arg27[%c0_96, %c0_97] : memref<1x512xf32, #tpu.memory_space<vmem>>, vector<1x512xf32>
    %154 = vector.broadcast %153 : vector<1x512xf32> to vector<16x512xf32>
    %155 = arith.addf %152, %154 : vector<16x512xf32>
    %cst_98 = arith.constant 0.000000e+00 : f32
    %156 = vector.broadcast %cst_98 : f32 to vector<16x512xf32>
    %157 = arith.maximumf %155, %156 : vector<16x512xf32>
    %c0_99 = arith.constant 0 : index
    %c0_100 = arith.constant 0 : index
    %158 = vector.load %arg28[%c0_99, %c0_100] : memref<384x512xbf16, #tpu.memory_space<vmem>>, vector<384x512xbf16>
    %cst_101 = arith.constant dense<0.000000e+00> : vector<16x512xf32>
    %159 = tpu.matmul %138, %158, %cst_101 {dimension_numbers = #tpu.dot_dimension_numbers<[1], [0], [0], [1], [0, 0, 1, 1], [], []>} : vector<16x384xbf16>, vector<384x512xbf16>, vector<16x512xf32> -> vector<16x512xf32>
    %160 = arith.addf %157, %159 : vector<16x512xf32>
    %161 = tpu.iota {dimensions = array<i32: 0>} : vector<2x16xi32>
    %c0_102 = arith.constant 0 : index
    %c0_103 = arith.constant 0 : index
    %162 = vector.load %arg5[%c0_102, %c0_103] : memref<1x16xi32, #tpu.memory_space<vmem>>, vector<1x16xi32>
    %163 = vector.broadcast %162 : vector<1x16xi32> to vector<2x16xi32>
    %164 = arith.cmpi eq, %163, %161 : vector<2x16xi32>
    %165 = arith.extui %164 : vector<2x16xi1> to vector<2x16xi32>
    %166 = arith.sitofp %165 : vector<2x16xi32> to vector<2x16xf32>
    %cst_104 = arith.constant dense<0.000000e+00> : vector<2xf32>
    %167 = vector.multi_reduction <add>, %166, %cst_104 [1] : vector<2x16xf32> to vector<2xf32>
    %168 = vector.shape_cast %167 : vector<2xf32> to vector<2x1xf32>
    %169 = arith.extui %164 : vector<2x16xi1> to vector<2x16xi32>
    %170 = arith.sitofp %169 : vector<2x16xi32> to vector<2x16xf32>
    %171 = arith.truncf %170 : vector<2x16xf32> to vector<2x16xbf16>
    %172 = arith.truncf %160 : vector<16x512xf32> to vector<16x512xbf16>
    %cst_105 = arith.constant dense<0.000000e+00> : vector<2x512xf32>
    %173 = tpu.matmul %171, %172, %cst_105 {dimension_numbers = #tpu.dot_dimension_numbers<[1], [0], [0], [1], [0, 0, 1, 1], [], []>} : vector<2x16xbf16>, vector<16x512xbf16>, vector<2x512xf32> -> vector<2x512xf32>
    %cst_106 = arith.constant 1.000000e+00 : f32
    %174 = vector.broadcast %cst_106 : f32 to vector<2x1xf32>
    %175 = arith.maximumf %168, %174 : vector<2x1xf32>
    %176 = tpu.reciprocal %175 {approx = true} : vector<2x1xf32> -> vector<2x1xf32>
    %177 = vector.broadcast %176 : vector<2x1xf32> to vector<2x512xf32>
    %178 = arith.mulf %173, %177 : vector<2x512xf32>
    %179 = arith.truncf %178 : vector<2x512xf32> to vector<2x512xbf16>
    %c0_107 = arith.constant 0 : index
    %c0_108 = arith.constant 0 : index
    %180 = vector.load %arg29[%c0_107, %c0_108] : memref<512x128xbf16, #tpu.memory_space<vmem>>, vector<512x128xbf16>
    %cst_109 = arith.constant dense<0.000000e+00> : vector<2x128xf32>
    %181 = tpu.matmul %179, %180, %cst_109 {dimension_numbers = #tpu.dot_dimension_numbers<[1], [0], [0], [1], [0, 0, 1, 1], [], []>} : vector<2x512xbf16>, vector<512x128xbf16>, vector<2x128xf32> -> vector<2x128xf32>
    %c0_110 = arith.constant 0 : index
    %c0_111 = arith.constant 0 : index
    %182 = vector.load %arg30[%c0_110, %c0_111] : memref<1x128xf32, #tpu.memory_space<vmem>>, vector<1x128xf32>
    %183 = vector.broadcast %182 : vector<1x128xf32> to vector<2x128xf32>
    %184 = arith.addf %181, %183 : vector<2x128xf32>
    %cst_112 = arith.constant 5.000000e-01 : f32
    %185 = vector.broadcast %cst_112 : f32 to vector<2x128xf32>
    %186 = arith.mulf %185, %184 : vector<2x128xf32>
    %cst_113 = arith.constant 4.471500e-02 : f32
    %187 = vector.broadcast %cst_113 : f32 to vector<2x128xf32>
    %188 = arith.mulf %187, %184 : vector<2x128xf32>
    %189 = arith.mulf %188, %184 : vector<2x128xf32>
    %190 = arith.mulf %189, %184 : vector<2x128xf32>
    %191 = arith.addf %184, %190 : vector<2x128xf32>
    %cst_114 = arith.constant 0.797884583 : f32
    %192 = vector.broadcast %cst_114 : f32 to vector<2x128xf32>
    %193 = arith.mulf %192, %191 : vector<2x128xf32>
    %194 = math.tanh %193 : vector<2x128xf32>
    %cst_115 = arith.constant 1.000000e+00 : f32
    %195 = vector.broadcast %cst_115 : f32 to vector<2x128xf32>
    %196 = arith.addf %195, %194 : vector<2x128xf32>
    %197 = arith.mulf %186, %196 : vector<2x128xf32>
    %198 = arith.truncf %197 : vector<2x128xf32> to vector<2x128xbf16>
    %c0_116 = arith.constant 0 : index
    %c0_117 = arith.constant 0 : index
    %199 = vector.load %arg31[%c0_116, %c0_117] : memref<128x128xbf16, #tpu.memory_space<vmem>>, vector<128x128xbf16>
    %cst_118 = arith.constant dense<0.000000e+00> : vector<2x128xf32>
    %200 = tpu.matmul %198, %199, %cst_118 {dimension_numbers = #tpu.dot_dimension_numbers<[1], [0], [0], [1], [0, 0, 1, 1], [], []>} : vector<2x128xbf16>, vector<128x128xbf16>, vector<2x128xf32> -> vector<2x128xf32>
    %c0_119 = arith.constant 0 : index
    %c0_120 = arith.constant 0 : index
    %201 = vector.load %arg32[%c0_119, %c0_120] : memref<1x128xf32, #tpu.memory_space<vmem>>, vector<1x128xf32>
    %202 = vector.broadcast %201 : vector<1x128xf32> to vector<2x128xf32>
    %203 = arith.addf %200, %202 : vector<2x128xf32>
    %c0_121 = arith.constant 0 : index
    %c0_122 = arith.constant 0 : index
    %204 = vector.load %arg33[%c0_121, %c0_122] : memref<2x128xf32, #tpu.memory_space<vmem>>, vector<2x128xf32>
    tpu.vector_store %arg33[%c0_121, %c0_122], %203 {strides = array<i32>} : memref<2x128xf32, #tpu.memory_space<vmem>>, vector<2x128xf32>,
    return
  }
}

</mosaic_0001>

<bundles_post_ra>
// kernel: tpu_custom_call.1
= control target key start
LH: loop header
LB: loop body
LE: loop exit
PB: predicated region body
PF: predicated region fallthrough
CT: control target
= control target key end

     0   :  { %s8410_s6 = smov 1   ;;  %s8411_s10 = smov 2   ;;  %s9185_s0 = inlined_call_operand.smem [shape: u32[34], index: -1, kind: input, shape index: {}] }
   0x1   :  { %s8489_s5 = sld [smem:[%s9185_s0]]   ;;  %s8412_s14 = smov 3  }
   0x2   :  { %s8494_s9 = sld [smem:[%s9185_s0 + %s8410_s6]]   ;;  %s8413_s18 = smov 4  }
   0x3   :  { %s8499_s13 = sld [smem:[%s9185_s0 + %s8411_s10]]   ;;  %s8414_s22 = smov 5  }
   0x4   :  { %s8504_s17 = sld [smem:[%s9185_s0 + %s8412_s14]]   ;;  %s8415_s26 = smov 6  }
   0x5   :  { %s8509_s21 = sld [smem:[%s9185_s0 + %s8413_s18]]   ;;  %s8416_s30 = smov 7  }
   0x6   :  { %s8514_s25 = sld [smem:[%s9185_s0 + %s8414_s22]]   ;;  %s8417_s4 = smov 8  }
   0x7   :  { %9200 = sst [smem:[#allocation52_spill]] %s8489_s5  ;;  %s8418_s10 = smov 9  }
   0x8   :  { %9201 = sst [smem:[#allocation53_spill]] %s8494_s9  ;;  %s8419_s15 = smov 10  }
   0x9   :  { %9202 = sst [smem:[#allocation54_spill]] %s8499_s13  ;;  %s8420_s20 = smov 11  }
   0xa   :  { %9203 = sst [smem:[#allocation55_spill]] %s8504_s17  ;;  %s8422_s1 = smov 13  }
   0xb   :  { %s8519_s29 = sld [smem:[%s9185_s0 + %s8415_s26]]   ;;  %s8421_s26 = smov 12  }
   0xc   :  { %s8524_s3 = sld [smem:[%s9185_s0 + %s8416_s30]]   ;;  %s8423_s7 = smov 14  }
   0xd   :  { %s8529_s8 = sld [smem:[%s9185_s0 + %s8417_s4]]   ;;  %s8425_s22 = smov 16  }
   0xe   :  { %s8534_s14 = sld [smem:[%s9185_s0 + %s8418_s10]]   ;;  %s8426_s28 = smov 17  }
   0xf   :  { %s8539_s19 = sld [smem:[%s9185_s0 + %s8419_s15]]   ;;  %s8424_s15 = smov 15  }
  0x10   :  { %s8544_s24 = sld [smem:[%s9185_s0 + %s8420_s20]]  }
  0x11   :  { %s8549_s30 = sld [smem:[%s9185_s0 + %s8421_s26]]  }
  0x12   :  { %9204 = sst [smem:[#allocation56_spill]] %s8524_s3 }
  0x13   :  { %9205 = sst [smem:[#allocation57_spill]] %s8529_s8 }
  0x14   :  { %s8554_s6 = sld [smem:[%s9185_s0 + %s8422_s1]]  }
  0x15   :  { %s8559_s12 = sld [smem:[%s9185_s0 + %s8423_s7]]   ;;  %s8427_s7 = smov 18  }
  0x16   :  { %s8564_s20 = sld [smem:[%s9185_s0 + %s8424_s15]]   ;;  %s8428_s15 = smov 19  }
  0x17   :  { %9206 = sst [smem:[#allocation58_spill]] %s8549_s30 }
  0x18   :  { %s8569_s27 = sld [smem:[%s9185_s0 + %s8425_s22]]   ;;  %s8429_s22 = smov 20  }
  0x19   :  { %s8574_s4 = sld [smem:[%s9185_s0 + %s8426_s28]]   ;;  %s8430_s28 = smov 21  }
  0x1a   :  { %s8579_s3 = sld [smem:[%s9185_s0 + %s8427_s7]]   ;;  %s8431_s7 = smov 22  }
  0x1b   :  { %9207 = sst [smem:[#allocation59_spill]] %s8559_s12 }
  0x1c   :  { %s8584_s13 = sld [smem:[%s9185_s0 + %s8428_s15]]   ;;  %s8432_s15 = smov 23  }
  0x1d   :  { %s8589_s17 = sld [smem:[%s9185_s0 + %s8429_s22]]   ;;  %s8433_s22 = smov 24  }
  0x1e   :  { %9208 = sst [smem:[#allocation60_spill]] %s8569_s27 }
  0x1f   :  { %s8594_s9 = sld [smem:[%s9185_s0 + %s8430_s28]]   ;;  %s8434_s28 = smov 25  }
  0x20   :  { %9209 = sst [smem:[#allocation61_spill]] %s8579_s3 }
  0x21   :  { %s8599_s8 = sld [smem:[%s9185_s0 + %s8431_s7]]   ;;  %s8435_s7 = smov 26  }
  0x22   :  { %s8604_s5 = sld [smem:[%s9185_s0 + %s8432_s15]]   ;;  %s8436_s15 = smov 27  }
  0x23   :  { %9210 = sst [smem:[#allocation62_spill]] %s8589_s17 }
  0x24   :  { %s8609_s17 = sld [smem:[%s9185_s0 + %s8433_s22]]   ;;  %s8437_s22 = smov 28  }
  0x25   :  { %s8614_s3 = sld [smem:[%s9185_s0 + %s8434_s28]]   ;;  %s8438_s28 = smov 29  }
  0x26   :  { %s8624_s27 = sld [smem:[%s9185_s0 + %s8436_s15]]   ;;  %s8440_s15 = smov 31  }
  0x27   :  { %9211 = sst [smem:[#allocation63_spill]] %s8599_s8 }
  0x28   :  { %s8619_s8 = sld [smem:[%s9185_s0 + %s8435_s7]]   ;;  %s8439_s7 = smov 30  }
  0x29   :  { %s8639_s12 = sld [smem:[%s9185_s0 + %s8439_s7]]  }
  0x2a   :  { %9212 = sst [smem:[#allocation64_spill]] %s8609_s17 }
  0x2b   :  { %9213 = sst [smem:[#allocation65_spill]] %s8614_s3 }
  0x2c   :  { %9214 = sst [smem:[#allocation66_spill]] %s8624_s27 }
  0x2d   :  { %s8629_s17 = sld [smem:[%s9185_s0 + %s8437_s22]]   ;;  %s8441_s22 = smov 32  }
  0x2e   :  { %s8634_s3 = sld [smem:[%s9185_s0 + %s8438_s28]]   ;;  %s8442_s28 = smov 33  }
  0x2f   :  { %s8644_s27 = sld [smem:[%s9185_s0 + %s8440_s15]]  }
  0x30   :  { %s8654_s30 = sld [smem:[%s9185_s0 + %s8442_s28]]  }
  0x33   :  { %9215 = sst [smem:[#allocation67_spill]] %s8629_s17 }
  0x34   :  { %s8649_s17 = sld [smem:[%s9185_s0 + %s8441_s22]]  }
  0x35   :  { %72 = vsyncpa [#allocation3], 0 }
  0x36   :  { %73 = vsyncpa [#allocation6], 0 }
  0x37   :  { %74 = vsyncpa [#allocation9], 0 }
  0x38   :  { %75 = vsyncpa [#allocation12], 0 }
  0x39   :  { %76 = vsyncpa [#allocation15], 0 }
  0x3a   :  { %77 = vsyncpa [#allocation18], 0 }
  0x3b   :  { %78 = vsyncpa [#allocation21], 0 }
  0x3c   :  { %79 = vsyncpa [#allocation24], 0 }
  0x3d   :  { %80 = vsyncpa [#allocation27], 0 }
  0x3e   :  { %81 = vsyncpa [#allocation30], 0 }
  0x3f   :  { %82 = vsyncpa [#allocation33], 0 }
  0x40   :  { %83 = vsyncpa [#allocation36], 0 }
  0x41   :  { %84 = vsyncpa [#allocation4], 0  ;;  %s8443_s7 = smov [#allocation5]   ;;  %s7856_s0 = scalar_lea.hbm %s8514_s25, 16 }
  0x42   :  { %s109_s10 = sshll.u32 %s8443_s7, 4  ;;  %p7857_p0 = scmp.ne.s32.totalorder %s8514_s25, %s7856_s0  ;;  %s110_s10 = int_to_ptr.vmem [resolvable:$true] %s109_s10 }
  0x43   :  { %p7860_p1 = scmp.lt.u32.totalorder %s7856_s0, %s8514_s25 }
  0x45   :  { %p7862_p2 = pnand %p7860_p1, %p7857_p0 }
  0x47   :  { %7865 = shalt.err (!%p7862_p2)
}
  0x48   :  { %s7866_s11 = scalar_lea.vmem %s110_s10, 16  ;;  %s7870_s15 = scalar_lea.vmem %s110_s10, 32 }
  0x49   :  { %p7867_p3 = scmp.ne.s32.totalorder %s110_s10, %s7866_s11  ;;  %p7871_p4 = scmp.lt.s32.totalorder %s110_s10, %s110_s10 }
  0x4a   :  { %p7872_p5 = scmp.lt.s32.totalorder %s7870_s15, %s7866_s11 }
  0x4c   :  { %p7873_p6 = por %p7872_p5, %p7871_p4 }
  0x4e   :  { %p7874_p7 = pnand %p7873_p6, %p7867_p3 }
  0x50   :  { %7877 = shalt.err (!%p7874_p7)
}
  0x51   :  { %112 = dma.hbm_to_vmem [thread:$0]  %s8514_s25, 16, %s110_s10, [#allocation6]  }
  0x52   :  { %s8444_s16 = smov [#allocation8]   ;;  %s8445_s22 = smov [#allocation11]  }
  0x53   :  { %s134_s18 = sshll.u32 %s8444_s16, 4  ;;  %s159_s23 = sshll.u32 %s8445_s22, 4  ;;  %s135_s18 = int_to_ptr.vmem [resolvable:$true] %s134_s18  ;;  %s160_s23 = int_to_ptr.vmem [resolvable:$true] %s159_s23 }
  0x54   :  { %s7878_s26 = scalar_lea.hbm %s8534_s14, 1024 }
  0x55   :  { %p7879_p8 = scmp.ne.s32.totalorder %s8534_s14, %s7878_s26  ;;  %p7882_p9 = scmp.lt.u32.totalorder %s7878_s26, %s8534_s14 }
  0x57   :  { %p7884_p10 = pnand %p7882_p9, %p7879_p8 }
  0x59   :  { %7887 = shalt.err (!%p7884_p10)
}
  0x5a   :  { %s7888_s28 = scalar_lea.vmem %s135_s18, 1024  ;;  %p7893_p12 = scmp.lt.s32.totalorder %s135_s18, %s135_s18 }
  0x5b   :  { %p7889_p11 = scmp.ne.s32.totalorder %s135_s18, %s7888_s28  ;;  %p7894_p13 = scmp.lt.s32.totalorder %s7888_s28, %s7888_s28 }
  0x5d   :  { %p7895_p0 = por %p7894_p13, %p7893_p12 }
  0x5f   :  { %p7896_p1 = pnand %p7895_p0, %p7889_p11 }
  0x61   :  { %7899 = shalt.err (!%p7896_p1)
}
  0x62   :  { %s8446_s1 = smov 64   ;;  %s8447_s25 = smov 4  }
  0x63   :  { %140 = dma.hbm_to_vmem [thread:$0]  %s8534_s14, 1024, %s135_s18, [#allocation9], %s8446_s1, %s8446_s1, %s8447_s25  }
  0x64   :  { %s7900_s2 = scalar_lea.hbm %s8544_s24, 16 }
  0x65   :  { %p7901_p2 = scmp.ne.s32.totalorder %s8544_s24, %s7900_s2  ;;  %p7904_p3 = scmp.lt.u32.totalorder %s7900_s2, %s8544_s24 }
  0x67   :  { %p7906_p4 = pnand %p7904_p3, %p7901_p2 }
  0x69   :  { %7909 = shalt.err (!%p7906_p4)
}
  0x6a   :  { %s7910_s7 = scalar_lea.vmem %s160_s23, 16  ;;  %s7914_s10 = scalar_lea.vmem %s160_s23, 32 }
  0x6b   :  { %p7911_p5 = scmp.ne.s32.totalorder %s160_s23, %s7910_s7  ;;  %p7915_p6 = scmp.lt.s32.totalorder %s160_s23, %s160_s23 }
  0x6c   :  { %p7916_p7 = scmp.lt.s32.totalorder %s7914_s10, %s7910_s7 }
  0x6e   :  { %p7917_p8 = por %p7916_p7, %p7915_p6 }
  0x70   :  { %p7918_p9 = pnand %p7917_p8, %p7911_p5 }
  0x72   :  { %7921 = shalt.err (!%p7918_p9)
}
  0x73   :  { %162 = dma.hbm_to_vmem [thread:$0]  %s8544_s24, 16, %s160_s23, [#allocation12]  }
  0x74   :  { %s8448_s14 = smov [#allocation14]   ;;  %s8449_s11 = smov [#allocation17]  }
  0x75   :  { %s180_s0 = sshll.u32 %s8448_s14, 4  ;;  %s205_s15 = sshll.u32 %s8449_s11, 4  ;;  %s181_s0 = int_to_ptr.vmem [resolvable:$true] %s180_s0  ;;  %s206_s15 = int_to_ptr.vmem [resolvable:$true] %s205_s15 }
  0x76   :  { %s7922_s16 = scalar_lea.hbm %s8554_s6, 1024 }
  0x77   :  { %p7923_p10 = scmp.ne.s32.totalorder %s8554_s6, %s7922_s16  ;;  %p7926_p11 = scmp.lt.u32.totalorder %s7922_s16, %s8554_s6 }
  0x79   :  { %p7928_p12 = pnand %p7926_p11, %p7923_p10 }
  0x7b   :  { %7931 = shalt.err (!%p7928_p12)
}
  0x7c   :  { %s7932_s18 = scalar_lea.vmem %s181_s0, 1024  ;;  %p7937_p0 = scmp.lt.s32.totalorder %s181_s0, %s181_s0 }
  0x7d   :  { %p7933_p13 = scmp.ne.s32.totalorder %s181_s0, %s7932_s18  ;;  %p7938_p1 = scmp.lt.s32.totalorder %s7932_s18, %s7932_s18 }
  0x7f   :  { %p7939_p2 = por %p7938_p1, %p7937_p0 }
  0x81   :  { %p7940_p3 = pnand %p7939_p2, %p7933_p13 }
  0x83   :  { %7943 = shalt.err (!%p7940_p3)
}
  0x84   :  { %186 = dma.hbm_to_vmem [thread:$0]  %s8554_s6, 1024, %s181_s0, [#allocation15], %s8446_s1, %s8446_s1, %s8447_s25  }
  0x85   :  { %s7944_s24 = scalar_lea.hbm %s8564_s20, 16 }
  0x86   :  { %p7945_p4 = scmp.ne.s32.totalorder %s8564_s20, %s7944_s24  ;;  %p7948_p5 = scmp.lt.u32.totalorder %s7944_s24, %s8564_s20 }
  0x88   :  { %p7950_p6 = pnand %p7948_p5, %p7945_p4 }
  0x8a   :  { %7953 = shalt.err (!%p7950_p6)
}
  0x8b   :  { %s7954_s22 = scalar_lea.vmem %s206_s15, 16  ;;  %s7958_s23 = scalar_lea.vmem %s206_s15, 32 }
  0x8c   :  { %p7955_p7 = scmp.ne.s32.totalorder %s206_s15, %s7954_s22  ;;  %p7959_p8 = scmp.lt.s32.totalorder %s206_s15, %s206_s15 }
  0x8d   :  { %p7960_p9 = scmp.lt.s32.totalorder %s7958_s23, %s7954_s22 }
  0x8f   :  { %p7961_p10 = por %p7960_p9, %p7959_p8 }
  0x91   :  { %p7962_p11 = pnand %p7961_p10, %p7955_p7 }
  0x93   :  { %7965 = shalt.err (!%p7962_p11)
}
  0x94   :  { %208 = dma.hbm_to_vmem [thread:$0]  %s8564_s20, 16, %s206_s15, [#allocation18]  }
  0x95   :  { %s8450_s6 = smov [#allocation20]   ;;  %s8451_s28 = smov [#allocation23]  }
  0x96   :  { %s226_s26 = sshll.u32 %s8450_s6, 4  ;;  %s251_s2 = sshll.u32 %s8451_s28, 4  ;;  %s227_s26 = int_to_ptr.vmem [resolvable:$true] %s226_s26  ;;  %s252_s2 = int_to_ptr.vmem [resolvable:$true] %s251_s2 }
  0x97   :  { %s7966_s7 = scalar_lea.hbm %s8574_s4, 1024 }
  0x98   :  { %p7967_p12 = scmp.ne.s32.totalorder %s8574_s4, %s7966_s7  ;;  %p7970_p13 = scmp.lt.u32.totalorder %s7966_s7, %s8574_s4 }
  0x9a   :  { %p7972_p0 = pnand %p7970_p13, %p7967_p12 }
  0x9c   :  { %7975 = shalt.err (!%p7972_p0)
}
  0x9d   :  { %s7976_s10 = scalar_lea.vmem %s227_s26, 1024  ;;  %p7981_p2 = scmp.lt.s32.totalorder %s227_s26, %s227_s26 }
  0x9e   :  { %p7977_p1 = scmp.ne.s32.totalorder %s227_s26, %s7976_s10  ;;  %p7982_p3 = scmp.lt.s32.totalorder %s7976_s10, %s7976_s10 }
  0xa0   :  { %p7983_p4 = por %p7982_p3, %p7981_p2 }
  0xa2   :  { %p7984_p5 = pnand %p7983_p4, %p7977_p1 }
  0xa4   :  { %7987 = shalt.err (!%p7984_p5)
}
  0xa5   :  { %232 = dma.hbm_to_vmem [thread:$0]  %s8574_s4, 1024, %s227_s26, [#allocation21], %s8446_s1, %s8446_s1, %s8447_s25  }
  0xa6   :  { %s7988_s20 = scalar_lea.hbm %s8584_s13, 32 }
  0xa7   :  { %p7989_p6 = scmp.ne.s32.totalorder %s8584_s13, %s7988_s20  ;;  %p7992_p7 = scmp.lt.u32.totalorder %s7988_s20, %s8584_s13 }
  0xa9   :  { %p7994_p8 = pnand %p7992_p7, %p7989_p6 }
  0xab   :  { %7997 = shalt.err (!%p7994_p8)
}
  0xac   :  { %s7998_s14 = scalar_lea.vmem %s252_s2, 32  ;;  %p8003_p10 = scmp.lt.s32.totalorder %s252_s2, %s252_s2 }
  0xad   :  { %p7999_p9 = scmp.ne.s32.totalorder %s252_s2, %s7998_s14  ;;  %p8004_p11 = scmp.lt.s32.totalorder %s7998_s14, %s7998_s14 }
  0xaf   :  { %p8005_p12 = por %p8004_p11, %p8003_p10 }
  0xb1   :  { %p8006_p13 = pnand %p8005_p12, %p7999_p9 }
  0xb3   :  { %8009 = shalt.err (!%p8006_p13)
}
  0xb4   :  { %254 = dma.hbm_to_vmem [thread:$0]  %s8584_s13, 32, %s252_s2, [#allocation24]  }
  0xb5   :  { %s8452_s0 = smov [#allocation26]   ;;  %s8453_s11 = smov [#allocation29]  }
  0xb6   :  { %s272_s4 = sshll.u32 %s8452_s0, 4  ;;  %s297_s15 = sshll.u32 %s8453_s11, 4  ;;  %s273_s4 = int_to_ptr.vmem [resolvable:$true] %s272_s4  ;;  %s298_s15 = int_to_ptr.vmem [resolvable:$true] %s297_s15 }
  0xb7   :  { %s8010_s16 = scalar_lea.hbm %s8594_s9, 2048 }
  0xb8   :  { %p8011_p0 = scmp.ne.s32.totalorder %s8594_s9, %s8010_s16  ;;  %p8014_p1 = scmp.lt.u32.totalorder %s8010_s16, %s8594_s9 }
  0xba   :  { %p8016_p2 = pnand %p8014_p1, %p8011_p0 }
  0xbc   :  { %8019 = shalt.err (!%p8016_p2)
}
  0xbd   :  { %s8020_s18 = scalar_lea.vmem %s273_s4, 2048  ;;  %p8025_p4 = scmp.lt.s32.totalorder %s273_s4, %s273_s4 }
  0xbe   :  { %p8021_p3 = scmp.ne.s32.totalorder %s273_s4, %s8020_s18  ;;  %p8026_p5 = scmp.lt.s32.totalorder %s8020_s18, %s8020_s18 }
  0xc0   :  { %p8027_p6 = por %p8026_p5, %p8025_p4 }
  0xc2   :  { %p8028_p7 = pnand %p8027_p6, %p8021_p3 }
  0xc4   :  { %8031 = shalt.err (!%p8028_p7)
}
  0xc5   :  { %s8454_s24 = smov 128   ;;  %s8455_s13 = smov 8  }
  0xc6   :  { %278 = dma.hbm_to_vmem [thread:$0]  %s8594_s9, 2048, %s273_s4, [#allocation27], %s8454_s24, %s8454_s24, %s8455_s13  }
  0xc7   :  { %s8032_s22 = scalar_lea.hbm %s8604_s5, 48 }
  0xc8   :  { %p8033_p8 = scmp.ne.s32.totalorder %s8604_s5, %s8032_s22  ;;  %p8036_p9 = scmp.lt.u32.totalorder %s8032_s22, %s8604_s5 }
  0xca   :  { %p8038_p10 = pnand %p8036_p9, %p8033_p8 }
  0xcc   :  { %8041 = shalt.err (!%p8038_p10)
}
  0xcd   :  { %s8042_s23 = scalar_lea.vmem %s298_s15, 48  ;;  %s8046_s6 = scalar_lea.vmem %s298_s15, 64 }
  0xce   :  { %p8043_p11 = scmp.ne.s32.totalorder %s298_s15, %s8042_s23  ;;  %p8047_p12 = scmp.lt.s32.totalorder %s298_s15, %s298_s15 }
  0xcf   :  { %p8048_p13 = scmp.lt.s32.totalorder %s8046_s6, %s8042_s23 }
  0xd1   :  { %p8049_p0 = por %p8048_p13, %p8047_p12 }
  0xd3   :  { %p8050_p1 = pnand %p8049_p0, %p8043_p11 }
  0xd5   :  { %8053 = shalt.err (!%p8050_p1)
}
  0xd6   :  { %300 = dma.hbm_to_vmem [thread:$0]  %s8604_s5, 48, %s298_s15, [#allocation30]  }
  0xd7   :  { %s8456_s9 = smov [#allocation32]   ;;  %s8054_s28 = scalar_lea.hbm %s8619_s8, 12288 }
  0xd8   :  { %s320_s26 = sshll.u32 %s8456_s9, 4  ;;  %p8055_p2 = scmp.ne.s32.totalorder %s8619_s8, %s8054_s28  ;;  %s321_s26 = int_to_ptr.vmem [resolvable:$true] %s320_s26 }
  0xd9   :  { %p8058_p3 = scmp.lt.u32.totalorder %s8054_s28, %s8619_s8 }
  0xdb   :  { %p8060_p4 = pnand %p8058_p3, %p8055_p2 }
  0xdd   :  { %8063 = shalt.err (!%p8060_p4)
}
  0xde   :  { %s8064_s2 = scalar_lea.vmem %s321_s26, 12288  ;;  %p8069_p6 = scmp.lt.s32.totalorder %s321_s26, %s321_s26 }
  0xdf   :  { %p8065_p5 = scmp.ne.s32.totalorder %s321_s26, %s8064_s2  ;;  %p8070_p7 = scmp.lt.s32.totalorder %s8064_s2, %s8064_s2 }
  0xe1   :  { %p8071_p8 = por %p8070_p7, %p8069_p6 }
  0xe3   :  { %p8072_p9 = pnand %p8071_p8, %p8065_p5 }
  0xe5   :  { %8075 = shalt.err (!%p8072_p9)
}
  0xe6   :  { %s8457_s7 = smov 256   ;;  %s8458_s5 = smov 16  }
  0xe7   :  { %326 = dma.hbm_to_vmem [thread:$0]  %s8619_s8, 12288, %s321_s26, [#allocation33], %s8457_s7, %s8457_s7, %s8458_s5  }
  0xe8   :  { %s8459_s10 = smov [#allocation35]   ;;  %s8460_s14 = smov [#allocation2]  }
  0xe9   :  { %s346_s20 = sshll.u32 %s8459_s10, 4  ;;  %s99_s0 = sshll.u32 %s8460_s14, 4  ;;  %s347_s20 = int_to_ptr.vmem [resolvable:$true] %s346_s20  ;;  %s100_s0 = int_to_ptr.vmem [resolvable:$true] %s99_s0 }
  0xea   :  { %s8076_s4 = scalar_lea.hbm %s8634_s3, 4096 }
  0xeb   :  { %p8077_p10 = scmp.ne.s32.totalorder %s8634_s3, %s8076_s4  ;;  %p8080_p11 = scmp.lt.u32.totalorder %s8076_s4, %s8634_s3 }
  0xed   :  { %p8082_p12 = pnand %p8080_p11, %p8077_p10 }
  0xef   :  { %8085 = shalt.err (!%p8082_p12)
}
  0xf0   :  { %s8086_s11 = scalar_lea.vmem %s347_s20, 4096  ;;  %p8091_p0 = scmp.lt.s32.totalorder %s347_s20, %s347_s20 }
  0xf1   :  { %p8087_p13 = scmp.ne.s32.totalorder %s347_s20, %s8086_s11  ;;  %p8092_p1 = scmp.lt.s32.totalorder %s8086_s11, %s8086_s11 }
  0xf3   :  { %p8093_p2 = por %p8092_p1, %p8091_p0 }
  0xf5   :  { %p8094_p3 = pnand %p8093_p2, %p8087_p13 }
  0xf7   :  { %8097 = shalt.err (!%p8094_p3)
}
  0xf8   :  { %352 = dma.hbm_to_vmem [thread:$0]  %s8634_s3, 4096, %s347_s20, [#allocation36], %s8446_s1, %s8446_s1, %s8447_s25  }
  0xf9   :  { %s8098_s8 = scalar_lea.hbm %s8509_s21, 16 }
  0xfa   :  { %p8099_p4 = scmp.ne.s32.totalorder %s8509_s21, %s8098_s8  ;;  %p8102_p5 = scmp.lt.u32.totalorder %s8098_s8, %s8509_s21 }
  0xfc   :  { %p8104_p6 = pnand %p8102_p5, %p8099_p4 }
  0xfe   :  { %8107 = shalt.err (!%p8104_p6)
}
  0xff   :  { %s8108_s15 = scalar_lea.vmem %s100_s0, 16  ;;  %s8112_s16 = scalar_lea.vmem %s100_s0, 32 }
 0x100   :  { %p8109_p7 = scmp.ne.s32.totalorder %s100_s0, %s8108_s15  ;;  %p8113_p8 = scmp.lt.s32.totalorder %s100_s0, %s100_s0 }
 0x101   :  { %p8114_p9 = scmp.lt.s32.totalorder %s8112_s16, %s8108_s15 }
 0x103   :  { %p8115_p10 = por %p8114_p9, %p8113_p8 }
 0x105   :  { %p8116_p11 = pnand %p8115_p10, %p8109_p7 }
 0x107   :  { %8119 = shalt.err (!%p8116_p11)
}
 0x108   :  { %102 = dma.hbm_to_vmem [thread:$0]  %s8509_s21, 16, %s100_s0, [#allocation3]  }
 0x109   :  { %s8461_s18 = smov [#allocation7]   ;;  %s8462_s22 = smov [#allocation10]  }
 0x10a   :  { %s118_s3 = sshll.u32 %s8461_s18, 4  ;;  %s146_s23 = sshll.u32 %s8462_s22, 4  ;;  %s119_s3 = int_to_ptr.vmem [resolvable:$true] %s118_s3  ;;  %s8722_s23 = int_to_ptr.vmem [resolvable:$true] %s146_s23 }
 0x10b   :  { %s8120_s6 = scalar_lea.hbm %s8519_s29, 3072 }
 0x10c   :  { %p8121_p12 = scmp.ne.s32.totalorder %s8519_s29, %s8120_s6  ;;  %p8124_p13 = scmp.lt.u32.totalorder %s8120_s6, %s8519_s29 }
 0x10e   :  { %p8126_p0 = pnand %p8124_p13, %p8121_p12 }
 0x110   :  { %8129 = shalt.err (!%p8126_p0)
}
 0x111   :  { %s8130_s9 = scalar_lea.vmem %s119_s3, 3072  ;;  %p8135_p2 = scmp.lt.s32.totalorder %s119_s3, %s119_s3 }
 0x112   :  { %p8131_p1 = scmp.ne.s32.totalorder %s119_s3, %s8130_s9  ;;  %p8136_p3 = scmp.lt.s32.totalorder %s8130_s9, %s8130_s9 }
 0x114   :  { %p8137_p4 = por %p8136_p3, %p8135_p2 }
 0x116   :  { %p8138_p5 = pnand %p8137_p4, %p8131_p1 }
 0x118   :  { %8141 = shalt.err (!%p8138_p5)
}
 0x119   :  { %124 = dma.hbm_to_vmem [thread:$0]  %s8519_s29, 3072, %s119_s3, [#allocation6], %s8446_s1, %s8446_s1, %s8447_s25  }
 0x11a   :  { %s8142_s21 = scalar_lea.hbm %s8539_s19, 1024 }
 0x11b   :  { %p8143_p6 = scmp.ne.s32.totalorder %s8539_s19, %s8142_s21  ;;  %p8146_p7 = scmp.lt.u32.totalorder %s8142_s21, %s8539_s19 }
 0x11d   :  { %p8148_p8 = pnand %p8146_p7, %p8143_p6 }
 0x11f   :  { %8151 = shalt.err (!%p8148_p8)
}
 0x120   :  { %s8152_s26 = scalar_lea.vmem %s8722_s23, 1024  ;;  %p8157_p10 = scmp.lt.s32.totalorder %s8722_s23, %s8722_s23 }
 0x121   :  { %p8153_p9 = scmp.ne.s32.totalorder %s8722_s23, %s8152_s26  ;;  %p8158_p11 = scmp.lt.s32.totalorder %s8152_s26, %s8152_s26 }
 0x123   :  { %p8159_p12 = por %p8158_p11, %p8157_p10 }
 0x125   :  { %p8160_p13 = pnand %p8159_p12, %p8153_p9 }
 0x127   :  { %8163 = shalt.err (!%p8160_p13)
}
 0x128   :  { %s9216_s29 = sld [smem:[#allocation58_spill]]  ;;  %s8463_s28 = smov [#allocation13]  }
 0x129   :  { %152 = dma.hbm_to_vmem [thread:$0]  %s8539_s19, 1024, %s8722_s23, [#allocation9], %s8446_s1, %s8446_s1, %s8447_s25  }
 0x12a   :  { %s168_s2 = sshll.u32 %s8463_s28, 4  ;;  %s8464_s10 = smov [#allocation16]   ;;  %s169_s2 = int_to_ptr.vmem [resolvable:$true] %s168_s2 }
 0x12b   :  { %s192_s20 = sshll.u32 %s8464_s10, 4  ;;  %s8743_s20 = int_to_ptr.vmem [resolvable:$true] %s192_s20 }
 0x12e   :  { %s8164_s14 = scalar_lea.hbm %s9216_s29, 1024 }
 0x12f   :  { %p8165_p0 = scmp.ne.s32.totalorder %s9216_s29, %s8164_s14  ;;  %p8168_p1 = scmp.lt.u32.totalorder %s8164_s14, %s9216_s29 }
 0x131   :  { %p8170_p2 = pnand %p8168_p1, %p8165_p0 }
 0x133   :  { %8173 = shalt.err (!%p8170_p2)
}
 0x134   :  { %s8174_s0 = scalar_lea.vmem %s169_s2, 1024  ;;  %p8179_p4 = scmp.lt.s32.totalorder %s169_s2, %s169_s2 }
 0x135   :  { %p8175_p3 = scmp.ne.s32.totalorder %s169_s2, %s8174_s0  ;;  %p8180_p5 = scmp.lt.s32.totalorder %s8174_s0, %s8174_s0 }
 0x137   :  { %p8181_p6 = por %p8180_p5, %p8179_p4 }
 0x139   :  { %p8182_p7 = pnand %p8181_p6, %p8175_p3 }
 0x13b   :  { %8185 = shalt.err (!%p8182_p7)
}
 0x13c   :  { %s9217_s19 = sld [smem:[#allocation59_spill]] }
 0x13d   :  { %174 = dma.hbm_to_vmem [thread:$0]  %s9216_s29, 1024, %s169_s2, [#allocation12], %s8446_s1, %s8446_s1, %s8447_s25  }
 0x142   :  { %s8186_s4 = scalar_lea.hbm %s9217_s19, 1024 }
 0x143   :  { %p8187_p8 = scmp.ne.s32.totalorder %s9217_s19, %s8186_s4  ;;  %p8190_p9 = scmp.lt.u32.totalorder %s8186_s4, %s9217_s19 }
 0x145   :  { %p8192_p10 = pnand %p8190_p9, %p8187_p8 }
 0x147   :  { %8195 = shalt.err (!%p8192_p10)
}
 0x148   :  { %s8196_s11 = scalar_lea.vmem %s8743_s20, 1024  ;;  %p8201_p12 = scmp.lt.s32.totalorder %s8743_s20, %s8743_s20 }
 0x149   :  { %p8197_p11 = scmp.ne.s32.totalorder %s8743_s20, %s8196_s11  ;;  %p8202_p13 = scmp.lt.s32.totalorder %s8196_s11, %s8196_s11 }
 0x14b   :  { %p8203_p0 = por %p8202_p13, %p8201_p12 }
 0x14d   :  { %p8204_p1 = pnand %p8203_p0, %p8197_p11 }
 0x14f   :  { %8207 = shalt.err (!%p8204_p1)
}
 0x150   :  { %s9218_s8 = sld [smem:[#allocation60_spill]]  ;;  %s8465_s15 = smov [#allocation19]  }
 0x151   :  { %198 = dma.hbm_to_vmem [thread:$0]  %s9217_s19, 1024, %s8743_s20, [#allocation15], %s8446_s1, %s8446_s1, %s8447_s25  }
 0x152   :  { %s214_s16 = sshll.u32 %s8465_s15, 4  ;;  %s8466_s18 = smov [#allocation22]   ;;  %s215_s16 = int_to_ptr.vmem [resolvable:$true] %s214_s16 }
 0x153   :  { %s238_s3 = sshll.u32 %s8466_s18, 4  ;;  %s8764_s3 = int_to_ptr.vmem [resolvable:$true] %s238_s3 }
 0x156   :  { %s8208_s22 = scalar_lea.hbm %s9218_s8, 1024 }
 0x157   :  { %p8209_p2 = scmp.ne.s32.totalorder %s9218_s8, %s8208_s22  ;;  %p8212_p3 = scmp.lt.u32.totalorder %s8208_s22, %s9218_s8 }
 0x159   :  { %p8214_p4 = pnand %p8212_p3, %p8209_p2 }
 0x15b   :  { %8217 = shalt.err (!%p8214_p4)
}
 0x15c   :  { %s8218_s23 = scalar_lea.vmem %s215_s16, 1024  ;;  %p8223_p6 = scmp.lt.s32.totalorder %s215_s16, %s215_s16 }
 0x15d   :  { %p8219_p5 = scmp.ne.s32.totalorder %s215_s16, %s8218_s23  ;;  %p8224_p7 = scmp.lt.s32.totalorder %s8218_s23, %s8218_s23 }
 0x15f   :  { %p8225_p8 = por %p8224_p7, %p8223_p6 }
 0x161   :  { %p8226_p9 = pnand %p8225_p8, %p8219_p5 }
 0x163   :  { %8229 = shalt.err (!%p8226_p9)
}
 0x164   :  { %s9219_s6 = sld [smem:[#allocation61_spill]] }
 0x165   :  { %220 = dma.hbm_to_vmem [thread:$0]  %s9218_s8, 1024, %s215_s16, [#allocation18], %s8446_s1, %s8446_s1, %s8447_s25  }
 0x16a   :  { %s8230_s9 = scalar_lea.hbm %s9219_s6, 2048 }
 0x16b   :  { %p8231_p10 = scmp.ne.s32.totalorder %s9219_s6, %s8230_s9  ;;  %p8234_p11 = scmp.lt.u32.totalorder %s8230_s9, %s9219_s6 }
 0x16d   :  { %p8236_p12 = pnand %p8234_p11, %p8231_p10 }
 0x16f   :  { %8239 = shalt.err (!%p8236_p12)
}
 0x170   :  { %s8240_s21 = scalar_lea.vmem %s8764_s3, 2048  ;;  %p8245_p0 = scmp.lt.s32.totalorder %s8764_s3, %s8764_s3 }
 0x171   :  { %p8241_p13 = scmp.ne.s32.totalorder %s8764_s3, %s8240_s21  ;;  %p8246_p1 = scmp.lt.s32.totalorder %s8240_s21, %s8240_s21 }
 0x173   :  { %p8247_p2 = por %p8246_p1, %p8245_p0 }
 0x175   :  { %p8248_p3 = pnand %p8247_p2, %p8241_p13 }
 0x177   :  { %8251 = shalt.err (!%p8248_p3)
}
 0x178   :  { %s9220_s26 = sld [smem:[#allocation62_spill]]  ;;  %s8467_s29 = smov [#allocation25]  }
 0x179   :  { %244 = dma.hbm_to_vmem [thread:$0]  %s9219_s6, 2048, %s8764_s3, [#allocation21], %s8454_s24, %s8454_s24, %s8455_s13  }
 0x17a   :  { %s260_s28 = sshll.u32 %s8467_s29, 4  ;;  %s8468_s2 = smov [#allocation28]   ;;  %s261_s28 = int_to_ptr.vmem [resolvable:$true] %s260_s28 }
 0x17b   :  { %s284_s10 = sshll.u32 %s8468_s2, 4  ;;  %s8785_s10 = int_to_ptr.vmem [resolvable:$true] %s284_s10 }
 0x17e   :  { %s8252_s20 = scalar_lea.hbm %s9220_s26, 2048 }
 0x17f   :  { %p8253_p4 = scmp.ne.s32.totalorder %s9220_s26, %s8252_s20  ;;  %p8256_p5 = scmp.lt.u32.totalorder %s8252_s20, %s9220_s26 }
 0x181   :  { %p8258_p6 = pnand %p8256_p5, %p8253_p4 }
 0x183   :  { %8261 = shalt.err (!%p8258_p6)
}
 0x184   :  { %s8262_s14 = scalar_lea.vmem %s261_s28, 2048  ;;  %p8267_p8 = scmp.lt.s32.totalorder %s261_s28, %s261_s28 }
 0x185   :  { %p8263_p7 = scmp.ne.s32.totalorder %s261_s28, %s8262_s14  ;;  %p8268_p9 = scmp.lt.s32.totalorder %s8262_s14, %s8262_s14 }
 0x187   :  { %p8269_p10 = por %p8268_p9, %p8267_p8 }
 0x189   :  { %p8270_p11 = pnand %p8269_p10, %p8263_p7 }
 0x18b   :  { %8273 = shalt.err (!%p8270_p11)
}
 0x18c   :  { %s9221_s0 = sld [smem:[#allocation63_spill]] }
 0x18d   :  { %266 = dma.hbm_to_vmem [thread:$0]  %s9220_s26, 2048, %s261_s28, [#allocation24], %s8454_s24, %s8454_s24, %s8455_s13  }
 0x192   :  { %s8274_s19 = scalar_lea.hbm %s9221_s0, 6144 }
 0x193   :  { %p8275_p12 = scmp.ne.s32.totalorder %s9221_s0, %s8274_s19  ;;  %p8278_p13 = scmp.lt.u32.totalorder %s8274_s19, %s9221_s0 }
 0x195   :  { %p8280_p0 = pnand %p8278_p13, %p8275_p12 }
 0x197   :  { %8283 = shalt.err (!%p8280_p0)
}
 0x198   :  { %s8284_s4 = scalar_lea.vmem %s8785_s10, 6144  ;;  %p8289_p2 = scmp.lt.s32.totalorder %s8785_s10, %s8785_s10 }
 0x199   :  { %p8285_p1 = scmp.ne.s32.totalorder %s8785_s10, %s8284_s4  ;;  %p8290_p3 = scmp.lt.s32.totalorder %s8284_s4, %s8284_s4 }
 0x19b   :  { %p8291_p4 = por %p8290_p3, %p8289_p2 }
 0x19d   :  { %p8292_p5 = pnand %p8291_p4, %p8285_p1 }
 0x19f   :  { %8295 = shalt.err (!%p8292_p5)
}
 0x1a0   :  { %s8469_s11 = smov 192   ;;  %s9222_s24 = sld [smem:[#allocation64_spill]] }
 0x1a1   :  { %s8470_s13 = smov 12   ;;  %s8471_s8 = smov [#allocation31]  }
 0x1a2   :  { %290 = dma.hbm_to_vmem [thread:$0]  %s9221_s0, 6144, %s8785_s10, [#allocation27], %s8469_s11, %s8469_s11, %s8470_s13  }
 0x1a3   :  { %s306_s15 = sshll.u32 %s8471_s8, 4  ;;  %s8472_s16 = smov [#allocation34]   ;;  %s307_s15 = int_to_ptr.vmem [resolvable:$true] %s306_s15 }
 0x1a4   :  { %s334_s18 = sshll.u32 %s8472_s16, 4  ;;  %s8803_s18 = int_to_ptr.vmem [resolvable:$true] %s334_s18 }
 0x1a6   :  { %s8296_s3 = scalar_lea.hbm %s9222_s24, 6144 }
 0x1a7   :  { %p8297_p6 = scmp.ne.s32.totalorder %s9222_s24, %s8296_s3  ;;  %p8300_p7 = scmp.lt.u32.totalorder %s8296_s3, %s9222_s24 }
 0x1a9   :  { %p8302_p8 = pnand %p8300_p7, %p8297_p6 }
 0x1ab   :  { %8305 = shalt.err (!%p8302_p8)
}
 0x1ac   :  { %s8306_s22 = scalar_lea.vmem %s307_s15, 6144  ;;  %p8311_p10 = scmp.lt.s32.totalorder %s307_s15, %s307_s15 }
 0x1ad   :  { %p8307_p9 = scmp.ne.s32.totalorder %s307_s15, %s8306_s22  ;;  %p8312_p11 = scmp.lt.s32.totalorder %s8306_s22, %s8306_s22 }
 0x1af   :  { %p8313_p12 = por %p8312_p11, %p8311_p10 }
 0x1b1   :  { %p8314_p13 = pnand %p8313_p12, %p8307_p9 }
 0x1b3   :  { %8317 = shalt.err (!%p8314_p13)
}
 0x1b4   :  { %s9223_s23 = sld [smem:[#allocation67_spill]] }
 0x1b5   :  { %312 = dma.hbm_to_vmem [thread:$0]  %s9222_s24, 6144, %s307_s15, [#allocation30], %s8469_s11, %s8469_s11, %s8470_s13  }
 0x1ba   :  { %s8318_s6 = scalar_lea.hbm %s9223_s23, 12288 }
 0x1bb   :  { %p8319_p0 = scmp.ne.s32.totalorder %s9223_s23, %s8318_s6  ;;  %p8322_p1 = scmp.lt.u32.totalorder %s8318_s6, %s9223_s23 }
 0x1bd   :  { %p8324_p2 = pnand %p8322_p1, %p8319_p0 }
 0x1bf   :  { %8327 = shalt.err (!%p8324_p2)
}
 0x1c0   :  { %s8328_s9 = scalar_lea.vmem %s8803_s18, 12288  ;;  %p8333_p4 = scmp.lt.s32.totalorder %s8803_s18, %s8803_s18 }
 0x1c1   :  { %p8329_p3 = scmp.ne.s32.totalorder %s8803_s18, %s8328_s9  ;;  %p8334_p5 = scmp.lt.s32.totalorder %s8328_s9, %s8328_s9 }
 0x1c3   :  { %p8335_p6 = por %p8334_p5, %p8333_p4 }
 0x1c5   :  { %p8336_p7 = pnand %p8335_p6, %p8329_p3 }
 0x1c7   :  { %8339 = shalt.err (!%p8336_p7)
}
 0x1c8   :  { %340 = dma.hbm_to_vmem [thread:$0]  %s9223_s23, 12288, %s8803_s18, [#allocation33], %s8457_s7, %s8457_s7, %s8458_s5  }
 0x1c9   :  { %s8473_s21 = smov [#allocation37]   ;;  %s8340_s29 = scalar_lea.hbm %s8644_s27, 1024 }
 0x1ca   :  { %s360_s26 = sshll.u32 %s8473_s21, 4  ;;  %p8341_p8 = scmp.ne.s32.totalorder %s8644_s27, %s8340_s29  ;;  %s361_s26 = int_to_ptr.vmem [resolvable:$true] %s360_s26 }
 0x1cb   :  { %p8344_p9 = scmp.lt.u32.totalorder %s8340_s29, %s8644_s27 }
 0x1cd   :  { %p8346_p10 = pnand %p8344_p9, %p8341_p8 }
 0x1cf   :  { %8349 = shalt.err (!%p8346_p10)
}
 0x1d0   :  { %s8350_s28 = scalar_lea.vmem %s361_s26, 1024  ;;  %p8355_p12 = scmp.lt.s32.totalorder %s361_s26, %s361_s26 }
 0x1d1   :  { %p8351_p11 = scmp.ne.s32.totalorder %s361_s26, %s8350_s28  ;;  %p8356_p13 = scmp.lt.s32.totalorder %s8350_s28, %s8350_s28 }
 0x1d3   :  { %p8357_p0 = por %p8356_p13, %p8355_p12 }
 0x1d5   :  { %p8358_p1 = pnand %p8357_p0, %p8351_p11 }
 0x1d7   :  { %8361 = shalt.err (!%p8358_p1)
}
 0x1d8   :  { %366 = dma.hbm_to_vmem [thread:$0]  %s8644_s27, 1024, %s361_s26, [#allocation36], %s8446_s1, %s8446_s1, %s8447_s25  }
 0x1d9   :  { %8384 = dma.done.wait [#allocation3], 16  }
 0x1da   :  { %8385 = vsyncadd [#allocation3], 4294967280 }
 0x1db   :  { %8386 = dma.done.wait [#allocation6], 3088  }
 0x1dc   :  { %8387 = vsyncadd [#allocation6], 4294964208 }
 0x1dd   :  { %8388 = dma.done.wait [#allocation9], 2048  }
 0x1de   :  { %8389 = vsyncadd [#allocation9], 4294965248 }
 0x1df   :  { %8390 = dma.done.wait [#allocation12], 1040  }
 0x1e0   :  { %8391 = vsyncadd [#allocation12], 4294966256 }
 0x1e1   :  { %8392 = dma.done.wait [#allocation15], 2048  }
 0x1e2   :  { %8393 = vsyncadd [#allocation15], 4294965248 }
 0x1e3   :  { %8394 = dma.done.wait [#allocation18], 1040  }
 0x1e4   :  { %8395 = vsyncadd [#allocation18], 4294966256 }
 0x1e5   :  { %8396 = dma.done.wait [#allocation21], 3072  }
 0x1e6   :  { %8397 = vsyncadd [#allocation21], 4294964224 }
 0x1e7   :  { %8398 = dma.done.wait [#allocation24], 2080  }
 0x1e8   :  { %8399 = vsyncadd [#allocation24], 4294965216 }
 0x1e9   :  { %8400 = dma.done.wait [#allocation27], 8192  }
 0x1ea   :  { %8401 = vsyncadd [#allocation27], 4294959104 }
 0x1eb   :  { %8402 = dma.done.wait [#allocation30], 6192  }
 0x1ec   :  { %8403 = vsyncadd [#allocation30], 4294961104 }
 0x1ed   :  { %8404 = dma.done.wait [#allocation33], 24576  }
 0x1ee   :  { %8405 = vsyncadd [#allocation33], 4294942720 }
 0x1ef   :  { %8406 = dma.done.wait [#allocation36], 5120  }
 0x1f0   :  { %8407 = vsyncadd [#allocation36], 4294962176  ;;  %s9224_s27 = sld [smem:[#allocation52_spill]]  ;;  %v8474_v0 = vmov 0   ;;  %v8475_v1 = vmov 0.0   ;;  %v7212_v4 = vld [vmem:[#allocation7 + $0x40] sm:$0xff]   ;;  %v439_v39 = vlaneseq }
 0x1f1   :  { %7204 = vset.pattern.permute.xlu0 %v8474_v0  ;;  %6814 = vmatprep.subr.bf16.mxu1 %v8475_v1  ;;  %v7213_v5 = vld [vmem:[#allocation7 + $0x80] sm:$0xff]   ;;  %v7215_v7 = vld [vmem:[#allocation7 + $0x48] sm:$0xff]   ;;  %v7218_v10 = vld [vmem:[#allocation7 + $0x50] sm:$0xff]   ;;  %vm8476_vm0 = vmmov 0   ;;  %s9225_s1 = sld [smem:[#allocation57_spill]]  ;;  %v8477_v20 = vmov 1  }
 0x1f2   :  { %7205 = vset.pattern.permute.xlu1 %v8474_v0  ;;  %6583 = vmatprep.subr.bf16.mxu0 %v7212_v4  ;;  %v7214_v6 = vld [vmem:[#allocation7] sm:$0xff]   ;;  %v7216_v8 = vld [vmem:[#allocation7 + $0x88] sm:$0xff]   ;;  %v7219_v11 = vld [vmem:[#allocation7 + $0x90] sm:$0xff]   ;;  %s9226_s25 = sld [smem:[#allocation53_spill]]  ;;  %vm813_vm1 = vcmask 1043456   ;;  %s9227_s7 = sld [smem:[#allocation55_spill]] }
 0x1f3   :  { %6815 = vmatpush3.bf16.msra.mxu1 %v7213_v5  ;;  %6584 = vmatpush3.bf16.msra.mxu0 %v7214_v6  ;;  %v7217_v9 = vld [vmem:[#allocation7 + $0x8] sm:$0xff]   ;;  %v7220_v12 = vld [vmem:[#allocation7 + $0x10] sm:$0xff]   ;;  %v7221_v13 = vld [vmem:[#allocation7 + $0x58] sm:$0xff]   ;;  %v8478_v34 = vmov 2   ;;  %s9228_s5 = sld [smem:[#allocation54_spill]]  ;;  %v8854_v40 = vand.u32 127, %v439_v39 }
 0x1f4   :  { %6816 = vmatprep.subr.bf16.mxu1 %v8475_v1  ;;  %6585 = vmatprep.subr.bf16.mxu0 %v7215_v7  ;;  %v7222_v14 = vld [vmem:[#allocation7 + $0x98] sm:$0xff]   ;;  %v7224_v16 = vld [vmem:[#allocation7 + $0x60] sm:$0xff]   ;;  %v7227_v19 = vld [vmem:[#allocation7 + $0x68] sm:$0xff]   ;;  %v8479_v49 = vmov 1.0|1.0   ;;  %vm806_vm10 = vcmask 64512  }
 0x1f5   :  { %6830 = vmatprep.mubr.msk.bf16.mxu1 %vm8476_vm0, %v8475_v1  ;;  %v7223_v15 = vld [vmem:[#allocation7 + $0x18] sm:$0xff]   ;;  %v7225_v17 = vld [vmem:[#allocation7 + $0xa0] sm:$0xff]   ;;  %v7228_v21 = vld [vmem:[#allocation7 + $0xa8] sm:$0xff]   ;;  %v441_v42 = vadd.s32 128, %v8854_v40  ;;  %v442_v45 = vadd.s32 256, %v8854_v40  ;;  %s9229_s2 = sld [smem:[#allocation56_spill]] }
 0x1f6   :  { %v443_v2 = vld [vmem:[%s9224_s27] sm:$0xff]  ;;  %v444_v3 = vld [vmem:[%s9224_s27 + $0x8] sm:$0xff]  ;;  %v7226_v18 = vld [vmem:[#allocation7 + $0x20] sm:$0xff]   ;;  %vm1027_vm14 = vcmask 130048   ;;  %s9230_s10 = sld [smem:[#allocation65_spill]]  ;;  %s9231_s20 = sld [smem:[#allocation66_spill]] }
 0x1f7   :  { %446 = vperm.xlu0 %7204, %v443_v2   ;;  %6817 = vmatpush3.bf16.msra.mxu1 %v7216_v8  ;;  %v7229_v22 = vld [vmem:[#allocation7 + $0x28] sm:$0xff]   ;;  %v7230_v23 = vld [vmem:[#allocation7 + $0x70] sm:$0xff]   ;;  %v7233_v27 = vld [vmem:[#allocation7 + $0x78] sm:$0xff]  }
 0x1f8   :  { %6586 = vmatpush3.bf16.msra.mxu0 %v7217_v9  ;;  %6818 = vmatprep.subr.bf16.mxu1 %v8475_v1  ;;  %v7231_v24 = vld [vmem:[#allocation7 + $0xb0] sm:$0xff]   ;;  %v805_v26 = vld [vmem:[%s9225_s1] sm:$0xf]  ;;  %v7234_v30 = vld [vmem:[#allocation7 + $0xb8] sm:$0xff]  }
 0x1f9   :  { %6587 = vmatprep.subr.bf16.mxu0 %v7218_v10  ;;  %v7232_v25 = vld [vmem:[#allocation7 + $0x30] sm:$0xff]   ;;  %v815_v28 = vsel %vm813_vm1, %v805_v26, 0  ;;  %v7235_v32 = vld [vmem:[#allocation7 + $0x38] sm:$0xff]   ;;  %v7236_v33 = vld [vmem:[#allocation8] sm:$0xff]  }
 0x1fa   :  { %v520_v29 = vld [vmem:[%s9226_s25] sm:$0xff]  ;;  %v521_v31 = vld [vmem:[%s9226_s25 + $0x8] sm:$0xff]  ;;  %v870_v35 = vld [vmem:[%s9227_s7 + $0x10] sm:$0xff] }
 0x1fb   :  { %449 = vperm.xlu0 %7204, %v444_v3   ;;  %6819 = vmatpush3.bf16.msra.mxu1 %v7219_v11  ;;  %v868_v36 = vld [vmem:[%s9227_s7] sm:$0xff]  ;;  %v869_v37 = vld [vmem:[%s9227_s7 + $0x8] sm:$0xff]  ;;  %v871_v38 = vld [vmem:[%s9227_s7 + $0x18] sm:$0xff] }
 0x1fc   :  { %6588 = vmatpush3.bf16.msra.mxu0 %v7220_v12  ;;  %6820 = vmatprep.subr.bf16.mxu1 %v8475_v1  ;;  %v799_v43 = vld [vmem:[%s9228_s5] sm:$0xff]  ;;  %v800_v44 = vld [vmem:[%s9228_s5 + $0x8] sm:$0xff]  ;;  %v801_v50 = vld [vmem:[%s9228_s5 + $0x10] sm:$0xff] }
 0x1fd   :  { %6589 = vmatprep.subr.bf16.mxu0 %v7221_v13  ;;  %525 = vperm.xlu1 %7205, %v520_v29   ;;  %v7237_v47 = vld [vmem:[#allocation8 + $0x8] sm:$0xff]   ;;  %v803_v48 = vpack.c.bf16 %v800_v44, %v799_v43  ;;  %v7238_v52 = vld [vmem:[#allocation8 + $0x10] sm:$0xff]   ;;  %v7239_v53 = vld [vmem:[#allocation8 + $0x18] sm:$0xff]  }
 0x1fe   :  { %v802_v51 = vld [vmem:[%s9228_s5 + $0x18] sm:$0xff]  ;;  %v7242_v57 = vld [vmem:[#allocation8 + $0x30] sm:$0xff]   ;;  %v7243_v58 = vld [vmem:[#allocation8 + $0x38] sm:$0xff]  }
 0x1ff   :  { %6821 = vmatpush3.bf16.msra.mxu1 %v7222_v14  ;;  %7206 = vset.pattern.permute.xlu0 %v8477_v20  ;;  %v804_v54 = vpack.c.bf16 %v802_v51, %v801_v50  ;;  %v7240_v55 = vld [vmem:[#allocation8 + $0x20] sm:$0xff]   ;;  %v7241_v56 = vld [vmem:[#allocation8 + $0x28] sm:$0xff]   ;;  %v7246_v51 = vld [vmem:[#allocation13 + $0x10] sm:$0xff]  }
 0x200   :  { %6590 = vmatpush3.bf16.msra.mxu0 %v7223_v15  ;;  %6822 = vmatprep.subr.bf16.mxu1 %v8475_v1  ;;  %v6059_v62 = vld [vmem:[%s9229_s2] ss:$0 sm:$0xff]  ;;  %v6060_v63 = vld [vmem:[%s9229_s2 + $0x1] ss:$0 sm:$0xff]  ;;  %v6061_v5 = vld [vmem:[%s9229_s2 + $0x2] ss:$0 sm:$0xff] }
 0x201   :  { %6591 = vmatprep.subr.bf16.mxu0 %v7224_v16  ;;  %541 = vperm.xlu0 %7206, %v520_v29   ;;  %v7245_v50 = vld [vmem:[#allocation13 + $0x8] sm:$0xff]  }
 0x202   :  { %530 = vperm.xlu1 %7205, %v521_v31  }
 0x203   :  { %6823 = vmatpush3.bf16.msra.mxu1 %v7225_v17 }
 0x204   :  { %6592 = vmatpush3.bf16.msra.mxu0 %v7226_v18  ;;  %6824 = vmatprep.subr.bf16.mxu1 %v8475_v1 }
 0x205   :  { %6593 = vmatprep.subr.bf16.mxu0 %v7227_v19  ;;  %7209 = vset.pattern.permute.xlu0 %v8478_v34 }
 0x206   :  { %562 = vperm.xlu0 %7209, %v521_v31   ;;  %7207 = vset.pattern.permute.xlu1 %v8477_v20 }
 0x207   :  { %6825 = vmatpush3.bf16.msra.mxu1 %v7228_v21  ;;  %545 = vperm.xlu1 %7207, %v521_v31  }
 0x208   :  { %6594 = vmatpush3.bf16.msra.mxu0 %v7229_v22  ;;  %6826 = vmatprep.subr.bf16.mxu1 %v8475_v1 }
 0x209   :  { %6595 = vmatprep.subr.bf16.mxu0 %v7230_v23 }
 0x20a   :  { %7211 = vset.pattern.permute.xlu0 %v8474_v0 }
 0x20b   :  { %6827 = vmatpush3.bf16.msra.mxu1 %v7231_v24  ;;  %879 = vperm.xlu0 %7211, %v870_v35  }
 0x20c   :  { %6596 = vmatpush3.bf16.msra.mxu0 %v7232_v25  ;;  %6828 = vmatprep.subr.bf16.mxu1 %v8475_v1 }
 0x20d   :  { %6597 = vmatprep.subr.bf16.mxu0 %v7233_v27  ;;  %7208 = vset.pattern.permute.xlu1 %v8478_v34 }
 0x20e   :  { %558 = vperm.xlu1 %7208, %v520_v29  }
 0x20f   :  { %6829 = vmatpush3.bf16.msra.mxu1 %v7234_v30 }
 0x210   :  { %6598 = vmatpush3.bf16.msra.mxu0 %v7235_v32  ;;  %6840 = vmatprep.subr.bf16.mxu1 %v7236_v33 }
 0x211   :  { %7132 = vmatprep.subr.msk.bf16.mxu0 %vm813_vm1, %v805_v26 }
 0x212   :  { %7210 = vset.pattern.permute.xlu1 %v8474_v0 }
 0x213   :  { %873 = vperm.xlu1 %7210, %v868_v36  }
 0x217   :  { %876 = vperm.xlu1 %7210, %v869_v37  }
 0x21b   :  { %882 = vperm.xlu1 %7210, %v871_v38  }
 0x276   :  { %v447_v41 = vpop.permute.xlu0 %446 }
 0x277   :  { %vm452_vm4 = vcmp.eq.s32.totalorder %v447_v41, %v441_v42  ;;  %vm453_vm6 = vcmp.eq.s32.totalorder %v447_v41, %v442_v45  ;;  %vm451_vm8 = vcmp.eq.s32.totalorder %v447_v41, %v8854_v40 }
 0x27a   :  { %v450_v46 = vpop.permute.xlu0 %449 }
 0x27b   :  { %vm454_vm2 = vcmp.eq.s32.totalorder %v450_v46, %v8854_v40  ;;  %vm456_vm3 = vcmp.eq.s32.totalorder %v450_v46, %v442_v45  ;;  %vm455_vm5 = vcmp.eq.s32.totalorder %v450_v46, %v441_v42 }
 0x27c   :  { %vm6086_vm7 = vmpackc.low %vm455_vm5, %vm452_vm4  ;;  %v526_v59 = vpop.permute.xlu1 %525  ;;  %vm1091_vm4 = vcmask 261120  }
 0x27d   :  { %6087 = vmatprep.mubr.msk.bf16.mxu0 %vm6086_vm7, %v8479_v49  ;;  %vm6090_vm9 = vmpackc.low %vm456_vm3, %vm453_vm6  ;;  %v537_v3 = vmul.f32 %v6059_v62, %v526_v59  ;;  %vm5425_vm6 = vcmask 123904  }
 0x27e   :  { %6831 = vmatmul.mubr.msk.bf16.vlgmr.msra.gmra.mrb[0].mxu1 %vm6090_vm9, %v8479_v49  ;;  %vm6088_vm11 = vmpackc.low %vm454_vm2, %vm451_vm8 }
 0x27f   :  { %6089 = vmatmul.mubr.msk.bf16.vlgmr.msra.gmra.mrb[0].mxu0 %vm6088_vm11, %v8479_v49  ;;  %6841 = vmatpush3.bf16.msra.mxu1 %v7236_v33 }
 0x280   :  { %6835 = vmatpush3.bf16.msra.mxu0 %v815_v28  ;;  %6836 = vmatprep.mubr.msk.bf16.mxu0 %vm806_vm10, %v803_v48  ;;  %v542_v2 = vpop.permute.xlu0 %541  ;;  %v7244_v48 = vld [vmem:[#allocation13] sm:$0xff]  }
 0x281   :  { %6842 = vmatprep.subr.bf16.mxu1 %v7237_v47  ;;  %6866 = vmatprep.subr.bf16.mxu0 %v8475_v1  ;;  %v531_v60 = vpop.permute.xlu1 %530  ;;  %v552_v4 = vmul.f32 %v6060_v63, %v542_v2 }
 0x282   :  { %v538_v7 = vmul.f32 %v6059_v62, %v531_v60 }
 0x283   :  { %6843 = vmatpush3.bf16.msra.mxu1 %v7237_v47  ;;  %v554_v10 = vadd.f32 %v552_v4, %v537_v3 }
 0x284   :  { %6844 = vmatprep.subr.bf16.mxu1 %v7238_v52 }
 0x285   :  { %v563_v9 = vpop.permute.xlu0 %562 }
 0x286   :  { %v546_v61 = vpop.permute.xlu1 %545  ;;  %v570_v15 = vmul.f32 %v6061_v5, %v563_v9  ;;  %v7252_v9 = vld [vmem:[#allocation10] sm:$0xff]  }
 0x287   :  { %6837 = vmatmul.mubr.msk.bf16.vlgmr.msra.gmra.mrb[4].mxu0 %vm806_vm10, %v804_v54  ;;  %6845 = vmatpush3.bf16.msra.mxu1 %v7238_v52  ;;  %v553_v8 = vmul.f32 %v6060_v63, %v546_v61  ;;  %v7248_v52 = vld [vmem:[#allocation13 + $0x20] sm:$0xff]   ;;  %v7250_v54 = vld [vmem:[#allocation13 + $0x30] sm:$0xff]   ;;  %v6098_v61 = vld [vmem:[#allocation2] ss:$0 sm:$0xff] }
 0x288   :  { %6846 = vmatprep.subr.bf16.mxu1 %v7239_v53  ;;  %6870 = vmatprep.mubr.msk.bf16.mxu0 %vm8476_vm0, %v8475_v1 }
 0x289   :  { %v555_v14 = vadd.f32 %v553_v8, %v538_v7 }
 0x28a   :  { %v880_v45 = vpop.permute.xlu0 %879 }
 0x28b   :  { %6847 = vmatpush3.bf16.msra.mxu1 %v7239_v53  ;;  %v572_v25 = vadd.f32 %v570_v15, %v555_v14  ;;  %vm886_vm1 = vcmp.eq.s32.totalorder %v880_v45, %v8854_v40  ;;  %v7249_v53 = vld [vmem:[#allocation13 + $0x28] sm:$0xff]  }
 0x28c   :  { %6848 = vmatprep.subr.bf16.mxu1 %v7240_v55  ;;  %v6096_v47 = vsel %vm886_vm1, 1.0, %v8475_v1  ;;  %v7257_v15 = vld [vmem:[#allocation10 + $0x28] sm:$0xff]  }
 0x28d   :  { %v559_v6 = vpop.permute.xlu1 %558 }
 0x28e   :  { %v569_v11 = vmul.f32 %v6061_v5, %v559_v6 }
 0x28f   :  { %6849 = vmatpush3.bf16.msra.mxu1 %v7240_v55  ;;  %v7251_v55 = vld [vmem:[#allocation13 + $0x38] sm:$0xff]  }
 0x290   :  { %6850 = vmatprep.subr.bf16.mxu1 %v7241_v56  ;;  %v571_v20 = vadd.f32 %v569_v11, %v554_v10  ;;  %v7253_v10 = vld [vmem:[#allocation10 + $0x8] sm:$0xff]   ;;  %v7254_v11 = vld [vmem:[#allocation10 + $0x10] sm:$0xff]  }
 0x292   :  { %v874_v13 = vpop.permute.xlu1 %873 }
 0x293   :  { %6851 = vmatpush3.bf16.msra.mxu1 %v7241_v56  ;;  %vm884_vm12 = vcmp.eq.s32.totalorder %v874_v13, %v8854_v40  ;;  %v8914_v56 = vshrl.u32 %v439_v39, 7  ;;  %v7256_v13 = vld [vmem:[#allocation10 + $0x20] sm:$0xff]  }
 0x294   :  { %6852 = vmatprep.subr.bf16.mxu1 %v7242_v57  ;;  %v6094_v33 = vsel %vm884_vm12, 1.0, %v8475_v1 }
 0x295   :  { %v900_v59 = vadd.s32 8, %v8914_v56  ;;  %vm906_vm2 = vcmp.eq.s32.totalorder %v6098_v61, %v8914_v56 }
 0x296   :  { %v877_v28 = vpop.permute.xlu1 %876  ;;  %v6099_v39 = vsel %vm906_vm2, 1.0, %v8475_v1 }
 0x297   :  { %6853 = vmatpush3.bf16.msra.mxu1 %v7242_v57  ;;  %vm885_vm13 = vcmp.eq.s32.totalorder %v877_v28, %v8854_v40  ;;  %vm907_vm3 = vcmp.eq.s32.totalorder %v6098_v61, %v900_v59  ;;  %v7271_v59 = vld [vmem:[#allocation19 + $0x18] sm:$0xff]   ;;  %v7273_v61 = vld [vmem:[#allocation19 + $0x28] sm:$0xff]  }
 0x298   :  { %6854 = vmatprep.subr.bf16.mxu1 %v7243_v58  ;;  %v6095_v35 = vsel %vm885_vm13, 1.0, %v8475_v1  ;;  %v6100_v7 = vsel %vm907_vm3, 1.0, %v8475_v1 }
 0x299   :  { %v8884_v42 = vpack.c.bf16 %v6095_v35, %v6094_v33  ;;  %v8921_v8 = vpack.c.bf16 %v6100_v7, %v6099_v39  ;;  %v7261_v33 = vld [vmem:[#allocation14 + $0x8] sm:$0xff]   ;;  %v7263_v35 = vld [vmem:[#allocation14 + $0x18] sm:$0xff]  }
 0x29a   :  { %v883_v44 = vpop.permute.xlu1 %882 }
 0x29b   :  { %6855 = vmatpush3.bf16.msra.mxu1 %v7243_v58  ;;  %vm887_vm15 = vcmp.eq.s32.totalorder %v883_v44, %v8854_v40  ;;  %v7247_v40 = vld [vmem:[#allocation13 + $0x18] sm:$0xff]  }
 0x29c   :  { %v6097_v46 = vsel %vm887_vm15, 1.0, %v8475_v1 }
 0x29d   :  { %v8897_v49 = vpack.c.bf16 %v6097_v46, %v6096_v47 }
 0x351   :  { %v792_v12 = vpop.f32.mrb[0].mxu1 }
 0x352   :  { %v6599_v16 = vpop.f32.mrb[0].mxu0  ;;  %v6832_v17 = vpop.f32.mrb[1].mxu1 }
 0x353   :  { %v6600_v18 = vpop.f32.mrb[1].mxu0  ;;  %v795_v19 = vpop.f32.mrb[2].mxu1 }
 0x354   :  { %v6601_v21 = vadd.f32 %v6600_v18, %v6599_v16  ;;  %v6602_v22 = vpop.f32.mrb[2].mxu0  ;;  %v6833_v23 = vpop.f32.mrb[3].mxu1 }
 0x355   :  { %v6603_v24 = vpop.f32.mrb[3].mxu0 }
 0x356   :  { %v752_v26 = vadd.f32 %v6601_v21, %v571_v20  ;;  %v6604_v27 = vadd.f32 %v6603_v24, %v6602_v22  ;;  %v7259_v20 = vld [vmem:[#allocation10 + $0x38] sm:$0xff]   ;;  %v7260_v21 = vld [vmem:[#allocation14] sm:$0xff]  }
 0x358   :  { %v8872_v29 = vadd.f32 %v792_v12, %v752_v26  ;;  %v755_v30 = vadd.f32 %v6604_v27, %v572_v25  ;;  %v7255_v12 = vld [vmem:[#allocation10 + $0x18] sm:$0xff]  }
 0x35a   :  { %v8876_v31 = vadd.f32 %v795_v19, %v755_v30  ;;  %v6838_v32 = vpop.f32.mrb[4].mxu0  ;;  %v7258_v19 = vld [vmem:[#allocation10 + $0x30] sm:$0xff]   ;;  %v1089_v22 = vmul.f32 1.00001, %v8872_v29 }
 0x35b   :  { %v851_v34 = vpop.f32.mrb[5].mxu0 }
 0x35c   :  { %v6839_v36 = vpop.f32.mrb[6].mxu0  ;;  %v913_v37 = vpack.c.bf16 %v8876_v31, %v8872_v29  ;;  %v1090_v26 = vmul.f32 1.00001, %v8876_v31  ;;  %v7264_v29 = vld [vmem:[#allocation14 + $0x20] sm:$0xff]   ;;  %v7265_v31 = vld [vmem:[#allocation14 + $0x28] sm:$0xff]  }
 0x35d   :  { %v8882_v38 = vpack.c.bf16 %v6839_v36, %v6838_v32  ;;  %v854_v41 = vpop.f32.mrb[7].mxu0  ;;  %v7266_v36 = vld [vmem:[#allocation14 + $0x30] sm:$0xff]  }
 0x35e   :  { %v8886_v43 = vpack.c.bf16 %v854_v41, %v851_v34  ;;  %6860 = vmatprep.subr.bf16.mxu1 %v913_v37  ;;  %v7262_v34 = vld [vmem:[#allocation14 + $0x10] sm:$0xff]   ;;  %v6112_v41 = vld [vmem:[#allocation11] ss:$0 sm:$0xff] }
 0x360   :  { %6856 = vmatprep.mubr.bf16.mxu1 %v8886_v43 }
 0x361   :  { %6857 = vmatmul.mubr.bf16.vlgmr.msra.gmra.mrb[4].mxu1 %v8882_v38 }
 0x362   :  { %6861 = vmatpush3.bf16.msra.mxu1 %v913_v37  ;;  %6862 = vmatprep.mubr.msk.bf16.mxu1 %vm1027_vm14, %v8884_v42 }
 0x363   :  { %6894 = vmatprep.subr.bf16.mxu1 %v8475_v1 }
 0x36d   :  { %6863 = vmatmul.mubr.msk.bf16.vlgmr.msra.gmra.mrb[4].mxu1 %vm1027_vm14, %v8897_v49 }
 0x36e   :  { %6895 = vmatpush3.bf16.msra.mxu1 %v7244_v48  ;;  %6910 = vmatprep.mubr.msk.bf16.mxu1 %vm8476_vm0, %v8475_v1 }
 0x36f   :  { %6896 = vmatprep.subr.bf16.mxu1 %v8475_v1 }
 0x372   :  { %6897 = vmatpush3.bf16.msra.mxu1 %v7245_v50 }
 0x373   :  { %6898 = vmatprep.subr.bf16.mxu1 %v8475_v1 }
 0x376   :  { %6899 = vmatpush3.bf16.msra.mxu1 %v7246_v51 }
 0x377   :  { %6900 = vmatprep.subr.bf16.mxu1 %v8475_v1 }
 0x37a   :  { %6901 = vmatpush3.bf16.msra.mxu1 %v7247_v40 }
 0x37b   :  { %6902 = vmatprep.subr.bf16.mxu1 %v8475_v1 }
 0x37e   :  { %6903 = vmatpush3.bf16.msra.mxu1 %v7248_v52 }
 0x37f   :  { %6904 = vmatprep.subr.bf16.mxu1 %v8475_v1 }
 0x382   :  { %6905 = vmatpush3.bf16.msra.mxu1 %v7249_v53 }
 0x383   :  { %6906 = vmatprep.subr.bf16.mxu1 %v8475_v1 }
 0x386   :  { %6907 = vmatpush3.bf16.msra.mxu1 %v7250_v54 }
 0x387   :  { %6908 = vmatprep.subr.bf16.mxu1 %v8475_v1 }
 0x38a   :  { %6909 = vmatpush3.bf16.msra.mxu1 %v7251_v55  ;;  %v7268_v55 = vld [vmem:[#allocation19] sm:$0xff]  }
 0x38b   :  { %6940 = vmatprep.subr.bf16.mxu1 %v8475_v1 }
 0x38d   :  { %6911 = vmatmul.mubr.bf16.vlgmr.msra.gmra.mrb[8].mxu1 %v913_v37  ;;  %v7267_v37 = vld [vmem:[#allocation14 + $0x38] sm:$0xff]  }
 0x38e   :  { %6944 = vmatprep.mubr.msk.bf16.mxu1 %vm8476_vm0, %v8475_v1 }
 0x440   :  { %v6864_v57 = vpop.f32.mrb[4].mxu1 }
 0x441   :  { %v1068_v58 = vpop.f32.mrb[5].mxu1  ;;  %v1085_v62 = vmax.f32 %v6864_v57, 0.0  ;;  %v7269_v57 = vld [vmem:[#allocation19 + $0x8] sm:$0xff]  }
 0x442   :  { %v6865_v60 = vpop.f32.mrb[6].mxu1  ;;  %v1083_v3 = vmax.f32 %v1068_v58, 0.0  ;;  %v7270_v58 = vld [vmem:[#allocation19 + $0x10] sm:$0xff]  }
 0x443   :  { %v1086_v63 = vmax.f32 %v6865_v60, 0.0  ;;  %v1071_v2 = vpop.f32.mrb[7].mxu1  ;;  %v7272_v60 = vld [vmem:[#allocation19 + $0x20] sm:$0xff]  }
 0x444   :  { %v1084_v4 = vmax.f32 %v1071_v2, 0.0 }
 0x445   :  { %v1088_v5 = vpack.c.bf16 %v1086_v63, %v1085_v62  ;;  %v7274_v62 = vld [vmem:[#allocation19 + $0x30] sm:$0xff]   ;;  %v7275_v63 = vld [vmem:[#allocation19 + $0x38] sm:$0xff]  }
 0x446   :  { %v1087_v6 = vpack.c.bf16 %v1084_v4, %v1083_v3 }
 0x448   :  { %6867 = vmatpush3.bf16.msra.mxu0 %v1087_v6 }
 0x449   :  { %6868 = vmatprep.subr.bf16.mxu0 %v8475_v1 }
 0x44c   :  { %6869 = vmatpush3.bf16.msra.mxu0 %v1088_v5 }
 0x44d   :  { %6874 = vmatprep.subr.bf16.mxu0 %v8475_v1 }
 0x44f   :  { %6871 = vmatmul.mubr.msk.bf16.vlgmr.msra.gmra.mrb[8].mxu0 %vm1091_vm4, %v8921_v8 }
 0x450   :  { %6875 = vmatpush3.bf16.msra.mxu0 %v7252_v9  ;;  %6890 = vmatprep.mubr.msk.bf16.mxu0 %vm8476_vm0, %v8475_v1 }
 0x451   :  { %6876 = vmatprep.subr.bf16.mxu0 %v8475_v1 }
 0x454   :  { %6877 = vmatpush3.bf16.msra.mxu0 %v7253_v10 }
 0x455   :  { %6878 = vmatprep.subr.bf16.mxu0 %v8475_v1 }
 0x458   :  { %6879 = vmatpush3.bf16.msra.mxu0 %v7254_v11 }
 0x459   :  { %6880 = vmatprep.subr.bf16.mxu0 %v8475_v1 }
 0x45c   :  { %6881 = vmatpush3.bf16.msra.mxu0 %v7255_v12  ;;  %v7276_v12 = vld [vmem:[#allocation16] sm:$0xff]  }
 0x45d   :  { %6882 = vmatprep.subr.bf16.mxu0 %v8475_v1 }
 0x460   :  { %v1349_v14 = vpop.f32.mrb[8].mxu1  ;;  %6883 = vmatpush3.bf16.msra.mxu0 %v7256_v13  ;;  %v7277_v13 = vld [vmem:[#allocation16 + $0x8] sm:$0xff]  }
 0x461   :  { %v6912_v16 = vpop.f32.mrb[9].mxu1  ;;  %6884 = vmatprep.subr.bf16.mxu0 %v8475_v1 }
 0x462   :  { %v1352_v17 = vpop.f32.mrb[10].mxu1  ;;  %v7280_v16 = vld [vmem:[#allocation16 + $0x20] sm:$0xff]  }
 0x463   :  { %v6913_v18 = vpop.f32.mrb[11].mxu1 }
 0x464   :  { %6885 = vmatpush3.bf16.msra.mxu0 %v7257_v15  ;;  %v7279_v15 = vld [vmem:[#allocation16 + $0x18] sm:$0xff]   ;;  %v7281_v18 = vld [vmem:[#allocation16 + $0x28] sm:$0xff]  }
 0x465   :  { %6886 = vmatprep.subr.bf16.mxu0 %v8475_v1 }
 0x468   :  { %6887 = vmatpush3.bf16.msra.mxu0 %v7258_v19 }
 0x469   :  { %6888 = vmatprep.subr.bf16.mxu0 %v8475_v1 }
 0x46c   :  { %6889 = vmatpush3.bf16.msra.mxu0 %v7259_v20 }
 0x46d   :  { %6914 = vmatprep.subr.bf16.mxu0 %v7260_v21 }
 0x522   :  { %v1129_v23 = vpop.f32.mrb[8].mxu0 }
 0x523   :  { %v1130_v24 = vadd.f32 %v1129_v23, %v1089_v22  ;;  %v6872_v25 = vpop.f32.mrb[9].mxu0  ;;  %v7282_v22 = vld [vmem:[#allocation16 + $0x30] sm:$0xff]   ;;  %v7283_v23 = vld [vmem:[#allocation16 + $0x38] sm:$0xff]  }
 0x524   :  { %v1132_v27 = vpop.f32.mrb[10].mxu0 }
 0x525   :  { %v1133_v28 = vadd.f32 %v1132_v27, %v1090_v26  ;;  %v6873_v30 = vpop.f32.mrb[11].mxu0 }
 0x527   :  { %v1136_v32 = vpack.c.bf16 %v1133_v28, %v1130_v24  ;;  %v7284_v24 = vld [vmem:[#allocation20] sm:$0xff]  }
 0x529   :  { %6891 = vmatmul.mubr.bf16.vlgmr.msra.gmra.mrb[12].mxu0 %v1136_v32 }
 0x52a   :  { %6915 = vmatpush3.bf16.msra.mxu0 %v7260_v21  ;;  %6930 = vmatprep.mubr.bf16.mxu0 %v8886_v43 }
 0x52b   :  { %6916 = vmatprep.subr.bf16.mxu0 %v7261_v33 }
 0x52e   :  { %6917 = vmatpush3.bf16.msra.mxu0 %v7261_v33 }
 0x52f   :  { %6918 = vmatprep.subr.bf16.mxu0 %v7262_v34 }
 0x532   :  { %6919 = vmatpush3.bf16.msra.mxu0 %v7262_v34 }
 0x533   :  { %6920 = vmatprep.subr.bf16.mxu0 %v7263_v35 }
 0x536   :  { %6921 = vmatpush3.bf16.msra.mxu0 %v7263_v35 }
 0x537   :  { %6922 = vmatprep.subr.bf16.mxu0 %v7264_v29 }
 0x53a   :  { %6923 = vmatpush3.bf16.msra.mxu0 %v7264_v29  ;;  %v7285_v29 = vld [vmem:[#allocation20 + $0x8] sm:$0xff]  }
 0x53b   :  { %6924 = vmatprep.subr.bf16.mxu0 %v7265_v31 }
 0x53e   :  { %6925 = vmatpush3.bf16.msra.mxu0 %v7265_v31  ;;  %v7286_v31 = vld [vmem:[#allocation20 + $0x10] sm:$0xff]  }
 0x53f   :  { %6926 = vmatprep.subr.bf16.mxu0 %v7266_v36 }
 0x542   :  { %6927 = vmatpush3.bf16.msra.mxu0 %v7266_v36  ;;  %v7287_v36 = vld [vmem:[#allocation20 + $0x18] sm:$0xff]  }
 0x543   :  { %6928 = vmatprep.subr.bf16.mxu0 %v7267_v37 }
 0x546   :  { %6929 = vmatpush3.bf16.msra.mxu0 %v7267_v37  ;;  %v7288_v37 = vld [vmem:[#allocation20 + $0x20] sm:$0xff]  }
 0x549   :  { %6931 = vmatmul.mubr.bf16.vlgmr.msra.gmra.mrb[16].mxu0 %v8882_v38 }
 0x54a   :  { %6936 = vmatprep.mubr.msk.bf16.mxu0 %vm1027_vm14, %v8884_v42 }
 0x5fc   :  { %v1242_v44 = vpop.f32.mrb[12].mxu0 }
 0x5fd   :  { %v1243_v45 = vadd.f32 %v6112_v41, %v1242_v44  ;;  %v6892_v46 = vpop.f32.mrb[13].mxu0  ;;  %v7290_v44 = vld [vmem:[#allocation20 + $0x30] sm:$0xff]  }
 0x5fe   :  { %v1245_v47 = vpop.f32.mrb[14].mxu0  ;;  %v6140_v46 = vld [vmem:[#allocation17] ss:$0 sm:$0xff] }
 0x5ff   :  { %v1249_v48 = vmax.f32 %v1243_v45, 0.0  ;;  %v1246_v50 = vadd.f32 %v6112_v41, %v1245_v47  ;;  %v6893_v51 = vpop.f32.mrb[15].mxu0  ;;  %v7289_v41 = vld [vmem:[#allocation20 + $0x28] sm:$0xff]   ;;  %v7291_v45 = vld [vmem:[#allocation20 + $0x38] sm:$0xff]  }
 0x601   :  { %v8941_v40 = vadd.f32 %v1349_v14, %v1249_v48  ;;  %v1250_v52 = vmax.f32 %v1246_v50, 0.0  ;;  %v7278_v14 = vld [vmem:[#allocation16 + $0x10] sm:$0xff]  }
 0x603   :  { %v8943_v53 = vadd.f32 %v1352_v17, %v1250_v52  ;;  %v1527_v25 = vmul.f32 1.00001, %v8941_v40 }
 0x605   :  { %v1358_v54 = vpack.c.bf16 %v8943_v53, %v8941_v40  ;;  %v1528_v30 = vmul.f32 1.00001, %v8943_v53 }
 0x607   :  { %6934 = vmatprep.subr.bf16.mxu0 %v1358_v54 }
 0x608   :  { %6935 = vmatpush3.bf16.msra.mxu0 %v1358_v54 }
 0x609   :  { %6968 = vmatprep.subr.bf16.mxu0 %v8475_v1 }
 0x60b   :  { %6937 = vmatmul.mubr.msk.bf16.vlgmr.msra.gmra.mrb[16].mxu0 %vm1027_vm14, %v8897_v49 }
 0x60c   :  { %6969 = vmatpush3.bf16.msra.mxu0 %v7268_v55  ;;  %6984 = vmatprep.mubr.msk.bf16.mxu0 %vm8476_vm0, %v8475_v1 }
 0x60d   :  { %6970 = vmatprep.subr.bf16.mxu0 %v8475_v1 }
 0x610   :  { %6971 = vmatpush3.bf16.msra.mxu0 %v7269_v57 }
 0x611   :  { %6972 = vmatprep.subr.bf16.mxu0 %v8475_v1 }
 0x614   :  { %6973 = vmatpush3.bf16.msra.mxu0 %v7270_v58 }
 0x615   :  { %6974 = vmatprep.subr.bf16.mxu0 %v8475_v1 }
 0x618   :  { %6975 = vmatpush3.bf16.msra.mxu0 %v7271_v59  ;;  %v7294_v59 = vld [vmem:[#allocation25 + $0x4] ss:$8 sps:$4 sm:$0xff]  }
 0x619   :  { %6976 = vmatprep.subr.bf16.mxu0 %v8475_v1 }
 0x61c   :  { %6977 = vmatpush3.bf16.msra.mxu0 %v7272_v60  ;;  %v7292_v60 = vld [vmem:[#allocation25] ss:$8 sps:$4 sm:$0xff]  }
 0x61d   :  { %6978 = vmatprep.subr.bf16.mxu0 %v8475_v1 }
 0x620   :  { %6979 = vmatpush3.bf16.msra.mxu0 %v7273_v61  ;;  %v7297_v61 = vld [vmem:[#allocation25 + $0x14] ss:$8 sps:$4 sm:$0xff]  }
 0x621   :  { %6980 = vmatprep.subr.bf16.mxu0 %v8475_v1 }
 0x624   :  { %6981 = vmatpush3.bf16.msra.mxu0 %v7274_v62  ;;  %v7295_v62 = vld [vmem:[#allocation25 + $0x10] ss:$8 sps:$4 sm:$0xff]  }
 0x625   :  { %6982 = vmatprep.subr.bf16.mxu0 %v8475_v1 }
 0x628   :  { %6983 = vmatpush3.bf16.msra.mxu0 %v7275_v63  ;;  %v7300_v63 = vld [vmem:[#allocation25 + $0x24] ss:$8 sps:$4 sm:$0xff]  }
 0x629   :  { %7014 = vmatprep.subr.bf16.mxu0 %v8475_v1 }
 0x62b   :  { %6985 = vmatmul.mubr.bf16.vlgmr.msra.gmra.mrb[20].mxu0 %v1358_v54 }
 0x62c   :  { %7018 = vmatprep.mubr.msk.bf16.mxu0 %vm8476_vm0, %v8475_v1 }
 0x6de   :  { %v6938_v2 = vpop.f32.mrb[16].mxu0 }
 0x6df   :  { %v1506_v3 = vpop.f32.mrb[17].mxu0  ;;  %v1523_v5 = vmax.f32 %v6938_v2, 0.0  ;;  %v7298_v2 = vld [vmem:[#allocation25 + $0x20] ss:$8 sps:$4 sm:$0xff]  }
 0x6e0   :  { %v6939_v4 = vpop.f32.mrb[18].mxu0  ;;  %v1521_v7 = vmax.f32 %v1506_v3, 0.0  ;;  %v7303_v3 = vld [vmem:[#allocation25 + $0x34] ss:$8 sps:$4 sm:$0xff]  }
 0x6e1   :  { %v1524_v6 = vmax.f32 %v6939_v4, 0.0  ;;  %v1509_v39 = vpop.f32.mrb[19].mxu0  ;;  %v7301_v4 = vld [vmem:[#allocation25 + $0x30] ss:$8 sps:$4 sm:$0xff]  }
 0x6e2   :  { %v1522_v9 = vmax.f32 %v1509_v39, 0.0  ;;  %v7309_v39 = vld [vmem:[#allocation25 + $0x54] ss:$8 sps:$4 sm:$0xff]  }
 0x6e3   :  { %v1526_v10 = vpack.c.bf16 %v1524_v6, %v1523_v5  ;;  %v7306_v5 = vld [vmem:[#allocation25 + $0x44] ss:$8 sps:$4 sm:$0xff]   ;;  %v7304_v6 = vld [vmem:[#allocation25 + $0x40] ss:$8 sps:$4 sm:$0xff]  }
 0x6e4   :  { %v1525_v11 = vpack.c.bf16 %v1522_v9, %v1521_v7  ;;  %v7307_v7 = vld [vmem:[#allocation25 + $0x50] ss:$8 sps:$4 sm:$0xff]   ;;  %v7312_v9 = vld [vmem:[#allocation25 + $0x64] ss:$8 sps:$4 sm:$0xff]  }
 0x6e6   :  { %6941 = vmatpush3.bf16.msra.mxu1 %v1525_v11  ;;  %v7315_v11 = vld [vmem:[#allocation25 + $0x74] ss:$8 sps:$4 sm:$0xff]  }
 0x6e7   :  { %6942 = vmatprep.subr.bf16.mxu1 %v8475_v1 }
 0x6ea   :  { %6943 = vmatpush3.bf16.msra.mxu1 %v1526_v10  ;;  %v7310_v10 = vld [vmem:[#allocation25 + $0x60] ss:$8 sps:$4 sm:$0xff]  }
 0x6eb   :  { %6948 = vmatprep.subr.bf16.mxu1 %v8475_v1 }
 0x6ed   :  { %6945 = vmatmul.mubr.msk.bf16.vlgmr.msra.gmra.mrb[12].mxu1 %vm1091_vm4, %v8921_v8 }
 0x6ee   :  { %6949 = vmatpush3.bf16.msra.mxu1 %v7276_v12  ;;  %6964 = vmatprep.mubr.msk.bf16.mxu1 %vm8476_vm0, %v8475_v1  ;;  %v7313_v12 = vld [vmem:[#allocation25 + $0x70] ss:$8 sps:$4 sm:$0xff]  }
 0x6ef   :  { %6950 = vmatprep.subr.bf16.mxu1 %v8475_v1 }
 0x6f2   :  { %6951 = vmatpush3.bf16.msra.mxu1 %v7277_v13 }
 0x6f3   :  { %6952 = vmatprep.subr.bf16.mxu1 %v8475_v1 }
 0x6f6   :  { %6953 = vmatpush3.bf16.msra.mxu1 %v7278_v14 }
 0x6f7   :  { %6954 = vmatprep.subr.bf16.mxu1 %v8475_v1 }
 0x6fa   :  { %6955 = vmatpush3.bf16.msra.mxu1 %v7279_v15 }
 0x6fb   :  { %6956 = vmatprep.subr.bf16.mxu1 %v8475_v1 }
 0x6fe   :  { %v1783_v17 = vpop.f32.mrb[20].mxu0  ;;  %6957 = vmatpush3.bf16.msra.mxu1 %v7280_v16 }
 0x6ff   :  { %v6986_v19 = vpop.f32.mrb[21].mxu0  ;;  %6958 = vmatprep.subr.bf16.mxu1 %v8475_v1 }
 0x700   :  { %v1786_v20 = vpop.f32.mrb[22].mxu0 }
 0x701   :  { %v6987_v21 = vpop.f32.mrb[23].mxu0 }
 0x702   :  { %6959 = vmatpush3.bf16.msra.mxu1 %v7281_v18 }
 0x703   :  { %6960 = vmatprep.subr.bf16.mxu1 %v8475_v1 }
 0x706   :  { %6961 = vmatpush3.bf16.msra.mxu1 %v7282_v22 }
 0x707   :  { %6962 = vmatprep.subr.bf16.mxu1 %v8475_v1 }
 0x70a   :  { %6963 = vmatpush3.bf16.msra.mxu1 %v7283_v23  ;;  %v7318_v23 = vld [vmem:[#allocation22 + $0x4] ss:$8 sps:$4 sm:$0xff]  }
 0x70b   :  { %6988 = vmatprep.subr.bf16.mxu1 %v7284_v24 }
 0x7c0   :  { %v1563_v26 = vpop.f32.mrb[12].mxu1 }
 0x7c1   :  { %v1564_v27 = vadd.f32 %v1563_v26, %v1527_v25  ;;  %v6946_v28 = vpop.f32.mrb[13].mxu1  ;;  %v7321_v25 = vld [vmem:[#allocation22 + $0x14] ss:$8 sps:$4 sm:$0xff]   ;;  %v7319_v26 = vld [vmem:[#allocation22 + $0x10] ss:$8 sps:$4 sm:$0xff]  }
 0x7c2   :  { %v1566_v32 = vpop.f32.mrb[14].mxu1  ;;  %v7322_v28 = vld [vmem:[#allocation22 + $0x20] ss:$8 sps:$4 sm:$0xff]  }
 0x7c3   :  { %v1567_v33 = vadd.f32 %v1566_v32, %v1528_v30  ;;  %v6947_v34 = vpop.f32.mrb[15].mxu1  ;;  %v7327_v30 = vld [vmem:[#allocation22 + $0x34] ss:$8 sps:$4 sm:$0xff]   ;;  %v7325_v32 = vld [vmem:[#allocation22 + $0x30] ss:$8 sps:$4 sm:$0xff]  }
 0x7c4   :  { %v7328_v34 = vld [vmem:[#allocation22 + $0x40] ss:$8 sps:$4 sm:$0xff]  }
 0x7c5   :  { %v1570_v35 = vpack.c.bf16 %v1567_v33, %v1564_v27  ;;  %v7324_v27 = vld [vmem:[#allocation22 + $0x24] ss:$8 sps:$4 sm:$0xff]  }
 0x7c6   :  { %v7330_v33 = vld [vmem:[#allocation22 + $0x44] ss:$8 sps:$4 sm:$0xff]  }
 0x7c7   :  { %6965 = vmatmul.mubr.bf16.vlgmr.msra.gmra.mrb[16].mxu1 %v1570_v35  ;;  %v7333_v35 = vld [vmem:[#allocation22 + $0x54] ss:$8 sps:$4 sm:$0xff]  }
 0x7c8   :  { %6989 = vmatpush3.bf16.msra.mxu1 %v7284_v24  ;;  %7004 = vmatprep.mubr.bf16.mxu1 %v8886_v43  ;;  %v7316_v24 = vld [vmem:[#allocation22] ss:$8 sps:$4 sm:$0xff]  }
 0x7c9   :  { %6990 = vmatprep.subr.bf16.mxu1 %v7285_v29 }
 0x7cc   :  { %6991 = vmatpush3.bf16.msra.mxu1 %v7285_v29 }
 0x7cd   :  { %6992 = vmatprep.subr.bf16.mxu1 %v7286_v31 }
 0x7d0   :  { %6993 = vmatpush3.bf16.msra.mxu1 %v7286_v31  ;;  %v7331_v31 = vld [vmem:[#allocation22 + $0x50] ss:$8 sps:$4 sm:$0xff]  }
 0x7d1   :  { %6994 = vmatprep.subr.bf16.mxu1 %v7287_v36 }
 0x7d4   :  { %6995 = vmatpush3.bf16.msra.mxu1 %v7287_v36 }
 0x7d5   :  { %6996 = vmatprep.subr.bf16.mxu1 %v7288_v37 }
 0x7d8   :  { %6997 = vmatpush3.bf16.msra.mxu1 %v7288_v37  ;;  %v7336_v37 = vld [vmem:[#allocation22 + $0x64] ss:$8 sps:$4 sm:$0xff]  }
 0x7d9   :  { %6998 = vmatprep.subr.bf16.mxu1 %v7289_v41 }
 0x7dc   :  { %6999 = vmatpush3.bf16.msra.mxu1 %v7289_v41 }
 0x7dd   :  { %7000 = vmatprep.subr.bf16.mxu1 %v7290_v44 }
 0x7e0   :  { %7001 = vmatpush3.bf16.msra.mxu1 %v7290_v44 }
 0x7e1   :  { %7002 = vmatprep.subr.bf16.mxu1 %v7291_v45 }
 0x7e4   :  { %7003 = vmatpush3.bf16.msra.mxu1 %v7291_v45  ;;  %v7334_v45 = vld [vmem:[#allocation22 + $0x60] ss:$8 sps:$4 sm:$0xff]  }
 0x7e7   :  { %7005 = vmatmul.mubr.bf16.vlgmr.msra.gmra.mrb[20].mxu1 %v8882_v38 }
 0x7e8   :  { %7010 = vmatprep.mubr.msk.bf16.mxu1 %vm1027_vm14, %v8884_v42 }
 0x89a   :  { %v1676_v47 = vpop.f32.mrb[16].mxu1 }
 0x89b   :  { %v1677_v48 = vadd.f32 %v6140_v46, %v1676_v47  ;;  %v6966_v50 = vpop.f32.mrb[17].mxu1  ;;  %v7337_v47 = vld [vmem:[#allocation22 + $0x70] ss:$8 sps:$4 sm:$0xff]  }
 0x89c   :  { %v1679_v51 = vpop.f32.mrb[18].mxu1 }
 0x89d   :  { %v1683_v40 = vmax.f32 %v1677_v48, 0.0  ;;  %v1680_v52 = vadd.f32 %v6140_v46, %v1679_v51  ;;  %v6967_v53 = vpop.f32.mrb[19].mxu1  ;;  %v7339_v46 = vld [vmem:[#allocation22 + $0x74] ss:$8 sps:$4 sm:$0xff]   ;;  %v7342_v48 = vld [vmem:[#allocation26 + $0x4] ss:$8 sps:$4 sm:$0xff]  }
 0x89f   :  { %v8981_v54 = vadd.f32 %v1783_v17, %v1683_v40  ;;  %v1684_v55 = vmax.f32 %v1680_v52, 0.0 }
 0x8a1   :  { %v8983_v57 = vadd.f32 %v1786_v20, %v1684_v55  ;;  %v1961_v50 = vmul.f32 1.00001, %v8981_v54 }
 0x8a3   :  { %v1792_v58 = vpack.c.bf16 %v8983_v57, %v8981_v54  ;;  %v1962_v53 = vmul.f32 1.00001, %v8983_v57  ;;  %v7346_v54 = vld [vmem:[#allocation26 + $0x20] ss:$8 sps:$4 sm:$0xff]   ;;  %v7354_v57 = vld [vmem:[#allocation26 + $0x44] ss:$8 sps:$4 sm:$0xff]  }
 0x8a5   :  { %7008 = vmatprep.subr.bf16.mxu1 %v1792_v58 }
 0x8a6   :  { %7009 = vmatpush3.bf16.msra.mxu1 %v1792_v58 }
 0x8a7   :  { %2256 = vmatprep.subr.bf16.mxu1 %v7294_v59 }
 0x8a9   :  { %7011 = vmatmul.mubr.msk.bf16.vlgmr.msra.gmra.mrb[20].mxu1 %vm1027_vm14, %v8897_v49 }
 0x8aa   :  { %2257 = vmatpush1.bf16.msra.mxu1 %v7292_v60  ;;  %2288 = vmatprep.mubr.bf16.mxu1 %v8474_v0  ;;  %v7340_v60 = vld [vmem:[#allocation26] ss:$8 sps:$4 sm:$0xff]  }
 0x8ab   :  { %2258 = vmatprep.subr.bf16.mxu1 %v7297_v61 }
 0x8ae   :  { %2259 = vmatpush1.bf16.msra.mxu1 %v7295_v62  ;;  %v7345_v62 = vld [vmem:[#allocation26 + $0x14] ss:$8 sps:$4 sm:$0xff]  }
 0x8af   :  { %2260 = vmatprep.subr.bf16.mxu1 %v7300_v63  ;;  %v7343_v63 = vld [vmem:[#allocation26 + $0x10] ss:$8 sps:$4 sm:$0xff]  }
 0x8b2   :  { %2261 = vmatpush1.bf16.msra.mxu1 %v7298_v2  ;;  %v7348_v2 = vld [vmem:[#allocation26 + $0x24] ss:$8 sps:$4 sm:$0xff]  }
 0x8b3   :  { %2262 = vmatprep.subr.bf16.mxu1 %v7303_v3  ;;  %v7351_v3 = vld [vmem:[#allocation26 + $0x34] ss:$8 sps:$4 sm:$0xff]  }
 0x8b6   :  { %2263 = vmatpush1.bf16.msra.mxu1 %v7301_v4  ;;  %v7349_v4 = vld [vmem:[#allocation26 + $0x30] ss:$8 sps:$4 sm:$0xff]  }
 0x8b7   :  { %2264 = vmatprep.subr.bf16.mxu1 %v7306_v5  ;;  %v7352_v5 = vld [vmem:[#allocation26 + $0x40] ss:$8 sps:$4 sm:$0xff]  }
 0x8ba   :  { %2265 = vmatpush1.bf16.msra.mxu1 %v7304_v6  ;;  %v7357_v6 = vld [vmem:[#allocation26 + $0x54] ss:$8 sps:$4 sm:$0xff]  }
 0x8bb   :  { %2266 = vmatprep.subr.bf16.mxu1 %v7309_v39  ;;  %v7355_v39 = vld [vmem:[#allocation26 + $0x50] ss:$8 sps:$4 sm:$0xff]  }
 0x8be   :  { %2267 = vmatpush1.bf16.msra.mxu1 %v7307_v7  ;;  %v7360_v7 = vld [vmem:[#allocation26 + $0x64] ss:$8 sps:$4 sm:$0xff]  }
 0x8bf   :  { %2268 = vmatprep.subr.bf16.mxu1 %v7312_v9  ;;  %v7358_v9 = vld [vmem:[#allocation26 + $0x60] ss:$8 sps:$4 sm:$0xff]  }
 0x8c2   :  { %2269 = vmatpush1.bf16.msra.mxu1 %v7310_v10  ;;  %v7363_v10 = vld [vmem:[#allocation26 + $0x74] ss:$8 sps:$4 sm:$0xff]  }
 0x8c3   :  { %2270 = vmatprep.subr.bf16.mxu1 %v7315_v11  ;;  %v7361_v11 = vld [vmem:[#allocation26 + $0x70] ss:$8 sps:$4 sm:$0xff]  }
 0x8c6   :  { %2271 = vmatpush1.bf16.msra.mxu1 %v7313_v12  ;;  %v9010_v12 = vsub.s32 0, %v8914_v56 }
 0x8c9   :  { %2289 = vmatmul.mubr.bf16.vlgmr.msra.gmra.mrb[24].mxu1 %v1792_v58 }
 0x8ca   :  { %2486 = vmatprep.mubr.bf16.mxu1 %v8474_v0 }
 0x97c   :  { %v7012_v13 = vpop.f32.mrb[20].mxu1 }
 0x97d   :  { %v1940_v14 = vpop.f32.mrb[21].mxu1  ;;  %v1957_v16 = vmax.f32 %v7012_v13, 0.0  ;;  %v2021_v13 = vld [vmem:[#allocation23] sm:$0x3] }
 0x97e   :  { %v7013_v15 = vpop.f32.mrb[22].mxu1  ;;  %v1955_v19 = vmax.f32 %v1940_v14, 0.0  ;;  %v9013_v14 = vsub.s32 1, %v8914_v56 }
 0x97f   :  { %v1958_v17 = vmax.f32 %v7013_v15, 0.0  ;;  %v1943_v18 = vpop.f32.mrb[23].mxu1  ;;  %v2026_v15 = vrot.slane %v2021_v13, %v9010_v12 }
 0x980   :  { %v1956_v20 = vmax.f32 %v1943_v18, 0.0 }
 0x981   :  { %v1960_v21 = vpack.c.bf16 %v1958_v17, %v1957_v16  ;;  %v2030_v16 = vrot.slane %v2021_v13, %v9013_v14 }
 0x982   :  { %v1959_v22 = vpack.c.bf16 %v1956_v20, %v1955_v19 }
 0x984   :  { %7015 = vmatpush3.bf16.msra.mxu0 %v1959_v22 }
 0x985   :  { %7016 = vmatprep.subr.bf16.mxu0 %v8475_v1 }
 0x988   :  { %7017 = vmatpush3.bf16.msra.mxu0 %v1960_v21 }
 0x989   :  { %2113 = vmatprep.subr.bf16.mxu0 %v7318_v23 }
 0x98b   :  { %7019 = vmatmul.mubr.msk.bf16.vlgmr.msra.gmra.mrb[24].mxu0 %vm1091_vm4, %v8921_v8 }
 0x98c   :  { %2114 = vmatpush1.bf16.msra.mxu0 %v7316_v24  ;;  %2145 = vmatprep.mubr.bf16.mxu0 %v8474_v0 }
 0x98d   :  { %2115 = vmatprep.subr.bf16.mxu0 %v7321_v25 }
 0x990   :  { %2116 = vmatpush1.bf16.msra.mxu0 %v7319_v26 }
 0x991   :  { %2117 = vmatprep.subr.bf16.mxu0 %v7324_v27 }
 0x994   :  { %2118 = vmatpush1.bf16.msra.mxu0 %v7322_v28 }
 0x995   :  { %2119 = vmatprep.subr.bf16.mxu0 %v7327_v30 }
 0x998   :  { %2120 = vmatpush1.bf16.msra.mxu0 %v7325_v32 }
 0x999   :  { %2121 = vmatprep.subr.bf16.mxu0 %v7330_v33 }
 0x99c   :  { %v8995_v29 = vpop.f32.mrb[24].mxu1  ;;  %2122 = vmatpush1.bf16.msra.mxu0 %v7328_v34 }
 0x99d   :  { %v8997_v36 = vpop.f32.mrb[25].mxu1  ;;  %2123 = vmatprep.subr.bf16.mxu0 %v7333_v35 }
 0x99e   :  { %v8999_v41 = vpop.f32.mrb[26].mxu1 }
 0x99f   :  { %v9001_v44 = vpop.f32.mrb[27].mxu1 }
 0x9a0   :  { %2124 = vmatpush1.bf16.msra.mxu0 %v7331_v31 }
 0x9a1   :  { %2125 = vmatprep.subr.bf16.mxu0 %v7336_v37 }
 0x9a4   :  { %2126 = vmatpush1.bf16.msra.mxu0 %v7334_v45 }
 0x9a5   :  { %2127 = vmatprep.subr.bf16.mxu0 %v7339_v46 }
 0x9a8   :  { %2128 = vmatpush1.bf16.msra.mxu0 %v7337_v47 }
 0x9a9   :  { %2401 = vmatprep.subr.bf16.mxu0 %v7342_v48  ;;  %v7391_v48 = vld [vmem:[#allocation28 + $0xc8] ss:$12 sps:$4 sm:$0xff]  }
 0xa5e   :  { %v1997_v51 = vpop.f32.mrb[24].mxu0 }
 0xa5f   :  { %v1998_v40 = vadd.f32 %v1997_v51, %v1961_v50  ;;  %v7020_v52 = vpop.f32.mrb[25].mxu0  ;;  %v7392_v50 = vld [vmem:[#allocation28 + $0x8] ss:$12 sps:$4 sm:$0xff]   ;;  %v7396_v51 = vld [vmem:[#allocation28 + $0xe0] ss:$12 sps:$4 sm:$0xff]  }
 0xa60   :  { %v2000_v55 = vpop.f32.mrb[26].mxu0  ;;  %v7401_v52 = vld [vmem:[#allocation28 + $0xf8] ss:$12 sps:$4 sm:$0xff]  }
 0xa61   :  { %v2001_v58 = vadd.f32 %v2000_v55, %v1962_v53  ;;  %v7021_v59 = vpop.f32.mrb[27].mxu0  ;;  %v7402_v53 = vld [vmem:[#allocation28 + $0x38] ss:$12 sps:$4 sm:$0xff]   ;;  %v7406_v55 = vld [vmem:[#allocation28 + $0x110] ss:$12 sps:$4 sm:$0xff]  }
 0xa62   :  { %v7411_v59 = vld [vmem:[#allocation28 + $0x128] ss:$12 sps:$4 sm:$0xff]  }
 0xa63   :  { %v2004_v61 = vpack.c.bf16 %v2001_v58, %v1998_v40  ;;  %v7397_v40 = vld [vmem:[#allocation28 + $0x20] ss:$12 sps:$4 sm:$0xff]   ;;  %v7407_v58 = vld [vmem:[#allocation28 + $0x50] ss:$12 sps:$4 sm:$0xff]  }
 0xa65   :  { %2146 = vmatmul.mubr.bf16.vlgmr.msra.gmra.mrb[28].mxu0 %v2004_v61  ;;  %v7416_v61 = vld [vmem:[#allocation28 + $0x140] ss:$12 sps:$4 sm:$0xff]  }
 0xa66   :  { %2402 = vmatpush1.bf16.msra.mxu0 %v7340_v60  ;;  %2433 = vmatprep.mubr.bf16.mxu0 %v8474_v0  ;;  %v7412_v60 = vld [vmem:[#allocation28 + $0x68] ss:$12 sps:$4 sm:$0xff]  }
 0xa67   :  { %2403 = vmatprep.subr.bf16.mxu0 %v7345_v62  ;;  %v7417_v62 = vld [vmem:[#allocation28 + $0x80] ss:$12 sps:$4 sm:$0xff]  }
 0xa6a   :  { %2404 = vmatpush1.bf16.msra.mxu0 %v7343_v63 }
 0xa6b   :  { %2405 = vmatprep.subr.bf16.mxu0 %v7348_v2 }
 0xa6e   :  { %2406 = vmatpush1.bf16.msra.mxu0 %v7346_v54 }
 0xa6f   :  { %2407 = vmatprep.subr.bf16.mxu0 %v7351_v3 }
 0xa72   :  { %2408 = vmatpush1.bf16.msra.mxu0 %v7349_v4 }
 0xa73   :  { %2409 = vmatprep.subr.bf16.mxu0 %v7354_v57 }
 0xa76   :  { %2410 = vmatpush1.bf16.msra.mxu0 %v7352_v5 }
 0xa77   :  { %2411 = vmatprep.subr.bf16.mxu0 %v7357_v6 }
 0xa7a   :  { %2412 = vmatpush1.bf16.msra.mxu0 %v7355_v39 }
 0xa7b   :  { %2413 = vmatprep.subr.bf16.mxu0 %v7360_v7 }
 0xa7e   :  { %2414 = vmatpush1.bf16.msra.mxu0 %v7358_v9 }
 0xa7f   :  { %2415 = vmatprep.subr.bf16.mxu0 %v7363_v10 }
 0xa82   :  { %2416 = vmatpush1.bf16.msra.mxu0 %v7361_v11 }
 0xa83   :  { %6701 = vmatprep.subr.bf16.mxu0 %v7391_v48  ;;  %v7378_v48 = vld [vmem:[#allocation28 + $0x64] ss:$12 sps:$4 sm:$0xff]  }
 0xa85   :  { %2434 = vmatmul.mubr.bf16.vlgmr.msra.gmra.mrb[32].mxu0 %v8886_v43 }
 0xa86   :  { %2443 = vmatprep.mubr.bf16.mxu0 %v8474_v0  ;;  %6702 = vmatpush3.bf16.msra.mxu0 %v7392_v50  ;;  %v7376_v50 = vld [vmem:[#allocation28 + $0x60] ss:$12 sps:$4 sm:$0xff]  }
 0xa87   :  { %6703 = vmatprep.subr.bf16.mxu0 %v7396_v51  ;;  %v7381_v51 = vld [vmem:[#allocation28 + $0x7c] ss:$12 sps:$4 sm:$0xff]  }
 0xa8a   :  { %6704 = vmatpush3.bf16.msra.mxu0 %v7397_v40  ;;  %v7379_v40 = vld [vmem:[#allocation28 + $0x78] ss:$12 sps:$4 sm:$0xff]  }
 0xa8b   :  { %6705 = vmatprep.subr.bf16.mxu0 %v7401_v52  ;;  %v7384_v52 = vld [vmem:[#allocation28 + $0x94] ss:$12 sps:$4 sm:$0xff]  }
 0xa8d   :  { %2444 = vmatmul.mubr.bf16.gmra.mrb[36].mxu0 %v8882_v38 }
 0xa8e   :  { %6706 = vmatpush3.bf16.msra.mxu0 %v7402_v53  ;;  %v7382_v53 = vld [vmem:[#allocation28 + $0x90] ss:$12 sps:$4 sm:$0xff]  }
 0xa8f   :  { %6707 = vmatprep.subr.bf16.mxu0 %v7406_v55  ;;  %v7387_v55 = vld [vmem:[#allocation28 + $0xac] ss:$12 sps:$4 sm:$0xff]  }
 0xa92   :  { %6708 = vmatpush3.bf16.msra.mxu0 %v7407_v58  ;;  %v7385_v58 = vld [vmem:[#allocation28 + $0xa8] ss:$12 sps:$4 sm:$0xff]  }
 0xa93   :  { %6709 = vmatprep.subr.bf16.mxu0 %v7411_v59  ;;  %v7390_v59 = vld [vmem:[#allocation28 + $0xc4] ss:$12 sps:$4 sm:$0xff]  }
 0xa96   :  { %6710 = vmatpush3.bf16.msra.mxu0 %v7412_v60  ;;  %v7388_v60 = vld [vmem:[#allocation28 + $0xc0] ss:$12 sps:$4 sm:$0xff]  }
 0xa97   :  { %6711 = vmatprep.subr.bf16.mxu0 %v7416_v61  ;;  %v7395_v61 = vld [vmem:[#allocation28 + $0xdc] ss:$12 sps:$4 sm:$0xff]  }
 0xa9a   :  { %6712 = vmatpush3.bf16.msra.mxu0 %v7417_v62  ;;  %v7393_v62 = vld [vmem:[#allocation28 + $0xd8] ss:$12 sps:$4 sm:$0xff]  }
 0xb38   :  { %v2147_v17 = vpop.f32.mrb[28].mxu0 }
 0xb39   :  { %v2148_v18 = vadd.f32 %v2147_v17, %v2026_v15  ;;  %v2149_v19 = vpop.f32.mrb[29].mxu0 }
 0xb3a   :  { %v2150_v20 = vadd.f32 %v2149_v19, %v2030_v16  ;;  %v2151_v21 = vpop.f32.mrb[30].mxu0 }
 0xb3b   :  { %v2156_v22 = vmax.f32 %v2148_v18, 0.0  ;;  %v2152_v23 = vadd.f32 %v2151_v21, %v2026_v15  ;;  %v2153_v24 = vpop.f32.mrb[31].mxu0 }
 0xb3c   :  { %v2157_v25 = vmax.f32 %v2150_v20, 0.0  ;;  %v2154_v26 = vadd.f32 %v2153_v24, %v2030_v16 }
 0xb3d   :  { %v9018_v27 = vadd.f32 %v8995_v29, %v2156_v22  ;;  %v2158_v28 = vmax.f32 %v2152_v23, 0.0 }
 0xb3e   :  { %v9021_v30 = vadd.f32 %v8997_v36, %v2157_v25  ;;  %v2159_v32 = vmax.f32 %v2154_v26, 0.0 }
 0xb3f   :  { %v9024_v33 = vadd.f32 %v8999_v41, %v2158_v28 }
 0xb40   :  { %v9027_v34 = vadd.f32 %v9001_v44, %v2159_v32 }
 0xb41   :  { %v9031_v35 = vpack.c.bf16 %v9024_v33, %v9018_v27 }
 0xb42   :  { %v9035_v31 = vpack.c.bf16 %v9027_v34, %v9021_v30 }
 0xb44   :  { %2454 = vmatprep.subr.bf16.mxu1 %v9035_v31 }
 0xb45   :  { %2455 = vmatpush1.bf16.msra.mxu1 %v9031_v35 }
 0xb48   :  { %6216 = vmatmul.mubr.msk.bf16.vlgmr.msra.gmra.mrb[28].mxu1 %vm1027_vm14, %v8884_v42 }
 0xb49   :  { %2496 = vmatprep.mubr.bf16.mxu1 %v8474_v0 }
 0xb50   :  { %6217 = vmatmul.mubr.msk.bf16.gmra.mrb[32].mxu1 %vm1027_vm14, %v8897_v49 }
 0xb51   :  { %2555 = vmatprep.mubr.bf16.mxu1 %v8474_v0 }
 0xb58   :  { %v2435_v29 = vpop.f32.mrb[32].mxu0 }
 0xb59   :  { %v2437_v36 = vpop.f32.mrb[33].mxu0 }
 0xb5a   :  { %v2439_v37 = vpop.f32.mrb[34].mxu0 }
 0xb5b   :  { %v2441_v41 = vpop.f32.mrb[35].mxu0 }
 0xb60   :  { %v2445_v44 = vpop.f32.mrb[36].mxu0 }
 0xb61   :  { %v2447_v45 = vpop.f32.mrb[37].mxu0 }
 0xb62   :  { %v2449_v46 = vpop.f32.mrb[38].mxu0 }
 0xb63   :  { %v2451_v47 = vpop.f32.mrb[39].mxu0 }
 0xc1b   :  { %v2488_v63 = vpop.f32.mrb[28].mxu1 }
 0xc1c   :  { %v2489_v2 = vadd.f32 %v2488_v63, %v2435_v29  ;;  %v2490_v54 = vpop.f32.mrb[29].mxu1  ;;  %v7366_v29 = vld [vmem:[#allocation28 + $0x4] ss:$12 sps:$4 sm:$0xff]   ;;  %v7400_v63 = vld [vmem:[#allocation28 + $0xf4] ss:$12 sps:$4 sm:$0xff]  }
 0xc1d   :  { %v2491_v3 = vadd.f32 %v2490_v54, %v2437_v36  ;;  %v2492_v4 = vpop.f32.mrb[30].mxu1  ;;  %v7364_v36 = vld [vmem:[#allocation28] ss:$12 sps:$4 sm:$0xff]  }
 0xc1e   :  { %v2493_v57 = vadd.f32 %v2492_v4, %v2439_v37  ;;  %v2494_v5 = vpop.f32.mrb[31].mxu1  ;;  %v2507_v39 = vmax.f32 %v2489_v2, 0.0  ;;  %v7369_v37 = vld [vmem:[#allocation28 + $0x1c] ss:$12 sps:$4 sm:$0xff]   ;;  %v7405_v54 = vld [vmem:[#allocation28 + $0x10c] ss:$12 sps:$4 sm:$0xff]  }
 0xc1f   :  { %v2495_v6 = vadd.f32 %v2494_v5, %v2441_v41  ;;  %v2508_v9 = vmax.f32 %v2491_v3, 0.0  ;;  %v7367_v41 = vld [vmem:[#allocation28 + $0x18] ss:$12 sps:$4 sm:$0xff]   ;;  %v7398_v2 = vld [vmem:[#allocation28 + $0xf0] ss:$12 sps:$4 sm:$0xff]  }
 0xc20   :  { %v2509_v7 = vmax.f32 %v2493_v57, 0.0  ;;  %v7403_v3 = vld [vmem:[#allocation28 + $0x108] ss:$12 sps:$4 sm:$0xff]   ;;  %v7410_v4 = vld [vmem:[#allocation28 + $0x124] ss:$12 sps:$4 sm:$0xff]  }
 0xc21   :  { %v2510_v10 = vmax.f32 %v2495_v6, 0.0  ;;  %v7408_v57 = vld [vmem:[#allocation28 + $0x120] ss:$12 sps:$4 sm:$0xff]   ;;  %v7415_v5 = vld [vmem:[#allocation28 + $0x13c] ss:$12 sps:$4 sm:$0xff]  }
 0xc22   :  { %v2515_v11 = vpack.c.bf16 %v2509_v7, %v2507_v39  ;;  %v7413_v6 = vld [vmem:[#allocation28 + $0x138] ss:$12 sps:$4 sm:$0xff]   ;;  %v7420_v39 = vld [vmem:[#allocation28 + $0x154] ss:$12 sps:$4 sm:$0xff]  }
 0xc23   :  { %v2516_v13 = vpack.c.bf16 %v2510_v10, %v2508_v9  ;;  %v2498_v15 = vpop.f32.mrb[32].mxu1  ;;  %v7421_v7 = vld [vmem:[#allocation28 + $0x158] ss:$12 sps:$4 sm:$0xff]   ;;  %v7418_v9 = vld [vmem:[#allocation28 + $0x150] ss:$12 sps:$4 sm:$0xff]  }
 0xc24   :  { %v2499_v16 = vadd.f32 %v2498_v15, %v2445_v44  ;;  %v2500_v17 = vpop.f32.mrb[33].mxu1  ;;  %v7372_v44 = vld [vmem:[#allocation28 + $0x34] ss:$12 sps:$4 sm:$0xff]   ;;  %v7422_v10 = vld [vmem:[#allocation28 + $0x98] ss:$12 sps:$4 sm:$0xff]   ;;  %6713 = vmatprep.subr.bf16.mxu0 %v7421_v7 }
 0xc25   :  { %v2501_v18 = vadd.f32 %v2500_v17, %v2447_v45  ;;  %v2502_v19 = vpop.f32.mrb[34].mxu1  ;;  %2523 = vmatprep.subr.bf16.mxu1 %v2516_v13  ;;  %v7370_v45 = vld [vmem:[#allocation28 + $0x30] ss:$12 sps:$4 sm:$0xff]   ;;  %6714 = vmatpush3.bf16.msra.mxu0 %v7422_v10  ;;  %v7423_v15 = vld [vmem:[#allocation28 + $0x168] ss:$12 sps:$4 sm:$0xff]  }
 0xc26   :  { %v2503_v20 = vadd.f32 %v2502_v19, %v2449_v46  ;;  %v2504_v21 = vpop.f32.mrb[35].mxu1  ;;  %2524 = vmatpush1.bf16.msra.mxu1 %v2515_v11  ;;  %v2511_v23 = vmax.f32 %v2499_v16, 0.0  ;;  %v7375_v46 = vld [vmem:[#allocation28 + $0x4c] ss:$12 sps:$4 sm:$0xff]   ;;  %v7426_v13 = vld [vmem:[#allocation28 + $0x170] ss:$12 sps:$4 sm:$0xff]  }
 0xc27   :  { %v2505_v22 = vadd.f32 %v2504_v21, %v2451_v47  ;;  %v2512_v25 = vmax.f32 %v2501_v18, 0.0  ;;  %v7373_v47 = vld [vmem:[#allocation28 + $0x48] ss:$12 sps:$4 sm:$0xff]   ;;  %v7425_v11 = vld [vmem:[#allocation28 + $0x16c] ss:$12 sps:$4 sm:$0xff]   ;;  %6715 = vmatprep.subr.bf16.mxu0 %v7426_v13 }
 0xc28   :  { %v2513_v24 = vmax.f32 %v2503_v20, 0.0  ;;  %v7427_v16 = vld [vmem:[#allocation28 + $0xb0] ss:$12 sps:$4 sm:$0xff]   ;;  %v7430_v17 = vld [vmem:[#allocation31 + $0x4] ss:$12 sps:$4 sm:$0xff]  }
 0xc29   :  { %v2514_v26 = vmax.f32 %v2505_v22, 0.0  ;;  %6716 = vmatpush3.bf16.msra.mxu0 %v7427_v16  ;;  %v7431_v18 = vld [vmem:[#allocation31 + $0xc8] ss:$12 sps:$4 sm:$0xff]   ;;  %v2519_v19 = vmul.f32 1.00001, %v9018_v27 }
 0xc2a   :  { %v2517_v28 = vpack.c.bf16 %v2513_v24, %v2511_v23  ;;  %3315 = vmatprep.subr.bf16.mxu0 %v7430_v17  ;;  %v2520_v21 = vmul.f32 1.00001, %v9021_v30  ;;  %v2521_v24 = vmul.f32 1.00001, %v9024_v33  ;;  %v7435_v27 = vld [vmem:[#allocation31 + $0x1c] ss:$12 sps:$4 sm:$0xff]  }
 0xc2b   :  { %v2518_v32 = vpack.c.bf16 %v2514_v26, %v2512_v25  ;;  %v7433_v30 = vld [vmem:[#allocation31 + $0x18] ss:$12 sps:$4 sm:$0xff]   ;;  %v7437_v33 = vld [vmem:[#allocation31 + $0x20] ss:$12 sps:$4 sm:$0xff]   ;;  %v7476_v13 = vld [vmem:[#allocation31 + $0xdc] ss:$12 sps:$4 sm:$0xff]  }
 0xc2c   :  { %v7470_v7 = vld [vmem:[#allocation31 + $0xc4] ss:$12 sps:$4 sm:$0xff]   ;;  %v7468_v10 = vld [vmem:[#allocation31 + $0xc0] ss:$12 sps:$4 sm:$0xff]  }
 0xc2d   :  { %2525 = vmatprep.subr.bf16.mxu1 %v2518_v32  ;;  %v7474_v16 = vld [vmem:[#allocation31 + $0xd8] ss:$12 sps:$4 sm:$0xff]  }
 0xc2e   :  { %2526 = vmatpush1.bf16.msra.mxu1 %v2517_v28  ;;  %v2522_v28 = vmul.f32 1.00001, %v9027_v34  ;;  %v7440_v34 = vld [vmem:[#allocation31 + $0x34] ss:$12 sps:$4 sm:$0xff]   ;;  %v7477_v17 = vld [vmem:[%s9230_s10 + $0x18] ss:$12 sps:$4 sm:$0xff]  }
 0xc2f   :  { %2905 = vmatprep.subr.bf16.mxu1 %v7366_v29 }
 0xc31   :  { %6218 = vmatmul.mubr.msk.bf16.vlgmr.msra.gmra.mrb[36].mxu1 %vm1091_vm4, %v8921_v8 }
 0xc32   :  { %2906 = vmatpush1.bf16.msra.mxu1 %v7364_v36 }
 0xc33   :  { %2907 = vmatprep.subr.bf16.mxu1 %v7369_v37 }
 0xc36   :  { %2908 = vmatpush1.bf16.msra.mxu1 %v7367_v41 }
 0xc37   :  { %2909 = vmatprep.subr.bf16.mxu1 %v7372_v44  ;;  %v7428_v44 = vld [vmem:[#allocation31] ss:$12 sps:$4 sm:$0xff]  }
 0xc3a   :  { %2910 = vmatpush1.bf16.msra.mxu1 %v7370_v45  ;;  %v7432_v45 = vld [vmem:[#allocation31 + $0x8] ss:$12 sps:$4 sm:$0xff]  }
 0xc3b   :  { %2911 = vmatprep.subr.bf16.mxu1 %v7375_v46  ;;  %v7436_v46 = vld [vmem:[#allocation31 + $0xe0] ss:$12 sps:$4 sm:$0xff]  }
 0xc3e   :  { %2912 = vmatpush1.bf16.msra.mxu1 %v7373_v47  ;;  %v7441_v47 = vld [vmem:[#allocation31 + $0xf8] ss:$12 sps:$4 sm:$0xff]  }
 0xc3f   :  { %2913 = vmatprep.subr.bf16.mxu1 %v7378_v48  ;;  %v7438_v48 = vld [vmem:[#allocation31 + $0x30] ss:$12 sps:$4 sm:$0xff]  }
 0xc42   :  { %2914 = vmatpush1.bf16.msra.mxu1 %v7376_v50  ;;  %v7442_v50 = vld [vmem:[#allocation31 + $0x38] ss:$12 sps:$4 sm:$0xff]  }
 0xc43   :  { %2915 = vmatprep.subr.bf16.mxu1 %v7381_v51  ;;  %v7445_v51 = vld [vmem:[#allocation31 + $0x4c] ss:$12 sps:$4 sm:$0xff]  }
 0xc46   :  { %2916 = vmatpush1.bf16.msra.mxu1 %v7379_v40  ;;  %v7446_v40 = vld [vmem:[#allocation31 + $0x110] ss:$12 sps:$4 sm:$0xff]  }
 0xc47   :  { %2917 = vmatprep.subr.bf16.mxu1 %v7384_v52  ;;  %v7443_v52 = vld [vmem:[#allocation31 + $0x48] ss:$12 sps:$4 sm:$0xff]  }
 0xc4a   :  { %2918 = vmatpush1.bf16.msra.mxu1 %v7382_v53  ;;  %v7447_v53 = vld [vmem:[#allocation31 + $0x50] ss:$12 sps:$4 sm:$0xff]  }
 0xc4b   :  { %2919 = vmatprep.subr.bf16.mxu1 %v7387_v55  ;;  %v7450_v55 = vld [vmem:[#allocation31 + $0x64] ss:$12 sps:$4 sm:$0xff]  }
 0xc4e   :  { %2920 = vmatpush1.bf16.msra.mxu1 %v7385_v58  ;;  %v7448_v58 = vld [vmem:[#allocation31 + $0x60] ss:$12 sps:$4 sm:$0xff]  }
 0xc4f   :  { %2921 = vmatprep.subr.bf16.mxu1 %v7390_v59  ;;  %v7452_v59 = vld [vmem:[#allocation31 + $0x68] ss:$12 sps:$4 sm:$0xff]  }
 0xc52   :  { %2922 = vmatpush1.bf16.msra.mxu1 %v7388_v60  ;;  %v7455_v60 = vld [vmem:[#allocation31 + $0x7c] ss:$12 sps:$4 sm:$0xff]  }
 0xc53   :  { %2923 = vmatprep.subr.bf16.mxu1 %v7395_v61  ;;  %v7456_v61 = vld [vmem:[#allocation31 + $0x140] ss:$12 sps:$4 sm:$0xff]  }
 0xc56   :  { %2924 = vmatpush1.bf16.msra.mxu1 %v7393_v62  ;;  %v7453_v62 = vld [vmem:[#allocation31 + $0x78] ss:$12 sps:$4 sm:$0xff]  }
 0xc57   :  { %2925 = vmatprep.subr.bf16.mxu1 %v7400_v63  ;;  %v7457_v63 = vld [vmem:[#allocation31 + $0x80] ss:$12 sps:$4 sm:$0xff]  }
 0xc5a   :  { %2926 = vmatpush1.bf16.msra.mxu1 %v7398_v2  ;;  %v7460_v2 = vld [vmem:[#allocation31 + $0x94] ss:$12 sps:$4 sm:$0xff]  }
 0xc5b   :  { %2927 = vmatprep.subr.bf16.mxu1 %v7405_v54  ;;  %v7461_v54 = vld [vmem:[#allocation31 + $0x158] ss:$12 sps:$4 sm:$0xff]  }
 0xc5e   :  { %2928 = vmatpush1.bf16.msra.mxu1 %v7403_v3  ;;  %v7458_v3 = vld [vmem:[#allocation31 + $0x90] ss:$12 sps:$4 sm:$0xff]  }
 0xc5f   :  { %2929 = vmatprep.subr.bf16.mxu1 %v7410_v4  ;;  %v7462_v4 = vld [vmem:[#allocation31 + $0x98] ss:$12 sps:$4 sm:$0xff]  }
 0xc62   :  { %2930 = vmatpush1.bf16.msra.mxu1 %v7408_v57  ;;  %v7465_v57 = vld [vmem:[#allocation31 + $0xac] ss:$12 sps:$4 sm:$0xff]  }
 0xc63   :  { %2931 = vmatprep.subr.bf16.mxu1 %v7415_v5  ;;  %v7466_v5 = vld [vmem:[#allocation31 + $0x170] ss:$12 sps:$4 sm:$0xff]  }
 0xc66   :  { %2932 = vmatpush1.bf16.msra.mxu1 %v7413_v6  ;;  %v7463_v6 = vld [vmem:[#allocation31 + $0xa8] ss:$12 sps:$4 sm:$0xff]  }
 0xc67   :  { %2933 = vmatprep.subr.bf16.mxu1 %v7420_v39  ;;  %v7467_v39 = vld [vmem:[#allocation31 + $0xb0] ss:$12 sps:$4 sm:$0xff]  }
 0xc6a   :  { %2934 = vmatpush1.bf16.msra.mxu1 %v7418_v9  ;;  %v7473_v9 = vld [vmem:[%s9230_s10 + $0x4] ss:$12 sps:$4 sm:$0xff]  }
 0xc6b   :  { %2935 = vmatprep.subr.bf16.mxu1 %v7425_v11  ;;  %v7471_v11 = vld [vmem:[%s9230_s10] ss:$12 sps:$4 sm:$0xff]  }
 0xc6e   :  { %2936 = vmatpush1.bf16.msra.mxu1 %v7423_v15  ;;  %v7479_v15 = vld [vmem:[%s9230_s10 + $0x1c] ss:$12 sps:$4 sm:$0xff]  }
 0xc6f   :  { %6723 = vmatprep.subr.bf16.mxu1 %v7431_v18  ;;  %v7482_v18 = vld [vmem:[#allocation31 + $0xf4] ss:$12 sps:$4 sm:$0xff]  }
 0xd04   :  { %v2557_v20 = vpop.f32.mrb[36].mxu1 }
 0xd05   :  { %v2558_v22 = vadd.f32 %v2557_v20, %v2519_v19  ;;  %v2559_v23 = vpop.f32.mrb[37].mxu1  ;;  %v7485_v19 = vld [vmem:[%s9230_s10 + $0x34] ss:$12 sps:$4 sm:$0xff]   ;;  %v7480_v20 = vld [vmem:[#allocation31 + $0xf0] ss:$12 sps:$4 sm:$0xff]  }
 0xd06   :  { %v2560_v25 = vadd.f32 %v2559_v23, %v2520_v21  ;;  %v2561_v26 = vpop.f32.mrb[38].mxu1  ;;  %v7483_v21 = vld [vmem:[%s9230_s10 + $0x30] ss:$12 sps:$4 sm:$0xff]   ;;  %v7491_v23 = vld [vmem:[%s9230_s10 + $0x4c] ss:$12 sps:$4 sm:$0xff]  }
 0xd07   :  { %v2562_v32 = vadd.f32 %v2561_v26, %v2521_v24  ;;  %v2563_v29 = vpop.f32.mrb[39].mxu1  ;;  %v7486_v24 = vld [vmem:[#allocation31 + $0x108] ss:$12 sps:$4 sm:$0xff]   ;;  %v7494_v26 = vld [vmem:[#allocation31 + $0x124] ss:$12 sps:$4 sm:$0xff]  }
 0xd08   :  { %v2564_v36 = vadd.f32 %v2563_v29, %v2522_v28  ;;  %v7497_v28 = vld [vmem:[%s9230_s10 + $0x64] ss:$12 sps:$4 sm:$0xff]   ;;  %v7495_v29 = vld [vmem:[%s9230_s10 + $0x60] ss:$12 sps:$4 sm:$0xff]  }
 0xd09   :  { %v2566_v37 = vpack.c.bf16 %v2562_v32, %v2558_v22  ;;  %v7488_v22 = vld [vmem:[#allocation31 + $0x10c] ss:$12 sps:$4 sm:$0xff]  }
 0xd0a   :  { %v2567_v41 = vpack.c.bf16 %v2564_v36, %v2560_v25  ;;  %v7489_v25 = vld [vmem:[%s9230_s10 + $0x48] ss:$12 sps:$4 sm:$0xff]  }
 0xd0b   :  { %v7492_v32 = vld [vmem:[#allocation31 + $0x120] ss:$12 sps:$4 sm:$0xff]   ;;  %v7500_v36 = vld [vmem:[#allocation31 + $0x13c] ss:$12 sps:$4 sm:$0xff]  }
 0xd0c   :  { %2937 = vmatprep.mubr.bf16.mxu1 %v2567_v41  ;;  %2980 = vmatprep.mubr.bf16.mxu0 %v2567_v41  ;;  %v7498_v41 = vld [vmem:[#allocation31 + $0x138] ss:$12 sps:$4 sm:$0xff]  }
 0xd0d   :  { %2938 = vmatmul.mubr.bf16.vlgmr.msra.gmra.mrb[40].mxu1 %v2566_v37  ;;  %2981 = vmatmul.mubr.bf16.vlgmr.msra.gmra.mrb[40].mxu0 %v2566_v37  ;;  %v7503_v37 = vld [vmem:[%s9230_s10 + $0x7c] ss:$12 sps:$4 sm:$0xff]  }
 0xd0e   :  { %3316 = vmatpush1.bf16.msra.mxu0 %v7428_v44  ;;  %6724 = vmatpush3.bf16.msra.mxu1 %v7432_v45  ;;  %v7501_v44 = vld [vmem:[%s9230_s10 + $0x78] ss:$12 sps:$4 sm:$0xff]   ;;  %v7506_v45 = vld [vmem:[#allocation31 + $0x154] ss:$12 sps:$4 sm:$0xff]  }
 0xd0f   :  { %3347 = vmatprep.mubr.bf16.mxu0 %v9035_v31  ;;  %3390 = vmatprep.mubr.bf16.mxu1 %v9035_v31  ;;  %v7451_v31 = vld [vmem:[#allocation31 + $0x128] ss:$12 sps:$4 sm:$0xff]  }
 0xd10   :  { %3317 = vmatprep.subr.bf16.mxu0 %v7435_v27  ;;  %6725 = vmatprep.subr.bf16.mxu1 %v7436_v46  ;;  %v7509_v27 = vld [vmem:[%s9230_s10 + $0x94] ss:$12 sps:$4 sm:$0xff]   ;;  %v7504_v46 = vld [vmem:[#allocation31 + $0x150] ss:$12 sps:$4 sm:$0xff]  }
 0xd12   :  { %3318 = vmatpush1.bf16.msra.mxu0 %v7433_v30  ;;  %6726 = vmatpush3.bf16.msra.mxu1 %v7437_v33  ;;  %v7507_v30 = vld [vmem:[%s9230_s10 + $0x90] ss:$12 sps:$4 sm:$0xff]   ;;  %v7512_v33 = vld [vmem:[#allocation31 + $0x16c] ss:$12 sps:$4 sm:$0xff]  }
 0xd13   :  { %3319 = vmatprep.subr.bf16.mxu0 %v7440_v34  ;;  %6727 = vmatprep.subr.bf16.mxu1 %v7441_v47  ;;  %v7515_v34 = vld [vmem:[%s9230_s10 + $0xac] ss:$12 sps:$4 sm:$0xff]   ;;  %v7510_v47 = vld [vmem:[#allocation31 + $0x168] ss:$12 sps:$4 sm:$0xff]  }
 0xd16   :  { %3320 = vmatpush1.bf16.msra.mxu0 %v7438_v48  ;;  %6728 = vmatpush3.bf16.msra.mxu1 %v7442_v50  ;;  %v7513_v48 = vld [vmem:[%s9230_s10 + $0xa8] ss:$12 sps:$4 sm:$0xff]  }
 0xd17   :  { %3321 = vmatprep.subr.bf16.mxu0 %v7445_v51  ;;  %6729 = vmatprep.subr.bf16.mxu1 %v7446_v40  ;;  %v7516_v50 = vld [vmem:[%s9230_s10 + $0x8] ss:$12 sps:$4 sm:$0xff]   ;;  %v7517_v51 = vld [vmem:[%s9230_s10 + $0x20] ss:$12 sps:$4 sm:$0xff]   ;;  %v7518_v40 = vld [vmem:[%s9230_s10 + $0x38] ss:$12 sps:$4 sm:$0xff]  }
 0xd1a   :  { %3322 = vmatpush1.bf16.msra.mxu0 %v7443_v52  ;;  %6730 = vmatpush3.bf16.msra.mxu1 %v7447_v53  ;;  %v7519_v52 = vld [vmem:[%s9230_s10 + $0x50] ss:$12 sps:$4 sm:$0xff]   ;;  %v7521_v53 = vld [vmem:[%s9230_s10 + $0x80] ss:$12 sps:$4 sm:$0xff]  }
 0xd1b   :  { %3323 = vmatprep.subr.bf16.mxu0 %v7450_v55  ;;  %6731 = vmatprep.subr.bf16.mxu1 %v7451_v31  ;;  %v7523_v55 = vld [vmem:[%s9230_s10 + $0xb0] ss:$12 sps:$4 sm:$0xff]  }
 0xd1e   :  { %3324 = vmatpush1.bf16.msra.mxu0 %v7448_v58  ;;  %6732 = vmatpush3.bf16.msra.mxu1 %v7452_v59 }
 0xd1f   :  { %3325 = vmatprep.subr.bf16.mxu0 %v7455_v60  ;;  %6733 = vmatprep.subr.bf16.mxu1 %v7456_v61 }
 0xd22   :  { %3326 = vmatpush1.bf16.msra.mxu0 %v7453_v62  ;;  %6734 = vmatpush3.bf16.msra.mxu1 %v7457_v63 }
 0xd23   :  { %3327 = vmatprep.subr.bf16.mxu0 %v7460_v2  ;;  %6735 = vmatprep.subr.bf16.mxu1 %v7461_v54 }
 0xd26   :  { %3328 = vmatpush1.bf16.msra.mxu0 %v7458_v3  ;;  %6736 = vmatpush3.bf16.msra.mxu1 %v7462_v4  ;;  %v2644_v4 = vsub.s32 2, %v8914_v56 }
 0xd27   :  { %3329 = vmatprep.subr.bf16.mxu0 %v7465_v57  ;;  %6737 = vmatprep.subr.bf16.mxu1 %v7466_v5  ;;  %v2632_v57 = vld [vmem:[#allocation29] sm:$0x7] }
 0xd28   :  { %v2645_v5 = vrot.slane %v2632_v57, %v2644_v4 }
 0xd2a   :  { %3330 = vmatpush1.bf16.msra.mxu0 %v7463_v6  ;;  %6738 = vmatpush3.bf16.msra.mxu1 %v7467_v39 }
 0xd2b   :  { %3331 = vmatprep.subr.bf16.mxu0 %v7470_v7  ;;  %3568 = vmatprep.subr.bf16.mxu1 %v7473_v9 }
 0xd2d   :  { %3391 = vmatmul.mubr.bf16.vlgmr.msra.gmra.mrb[44].mxu1 %v9031_v35 }
 0xd2e   :  { %3332 = vmatpush1.bf16.msra.mxu0 %v7468_v10  ;;  %3569 = vmatpush1.bf16.msra.mxu1 %v7471_v11 }
 0xd2f   :  { %3333 = vmatprep.subr.bf16.mxu0 %v7476_v13  ;;  %3570 = vmatprep.subr.bf16.mxu1 %v7479_v15 }
 0xd30   :  { %3600 = vmatprep.mubr.bf16.mxu1 %v8474_v0 }
 0xd32   :  { %3334 = vmatpush1.bf16.msra.mxu0 %v7474_v16  ;;  %3571 = vmatpush1.bf16.msra.mxu1 %v7477_v17 }
 0xd33   :  { %3335 = vmatprep.subr.bf16.mxu0 %v7482_v18  ;;  %3572 = vmatprep.subr.bf16.mxu1 %v7485_v19 }
 0xd36   :  { %3336 = vmatpush1.bf16.msra.mxu0 %v7480_v20  ;;  %3573 = vmatpush1.bf16.msra.mxu1 %v7483_v21  ;;  %v2637_v20 = vrot.slane %v2632_v57, %v9010_v12  ;;  %v2641_v21 = vrot.slane %v2632_v57, %v9013_v14 }
 0xd37   :  { %3337 = vmatprep.subr.bf16.mxu0 %v7488_v22  ;;  %3574 = vmatprep.subr.bf16.mxu1 %v7491_v23 }
 0xd3a   :  { %3338 = vmatpush1.bf16.msra.mxu0 %v7486_v24  ;;  %3575 = vmatpush1.bf16.msra.mxu1 %v7489_v25 }
 0xd3b   :  { %3339 = vmatprep.subr.bf16.mxu0 %v7494_v26  ;;  %3576 = vmatprep.subr.bf16.mxu1 %v7497_v28 }
 0xd3e   :  { %3340 = vmatpush1.bf16.msra.mxu0 %v7492_v32  ;;  %3577 = vmatpush1.bf16.msra.mxu1 %v7495_v29 }
 0xd3f   :  { %3341 = vmatprep.subr.bf16.mxu0 %v7500_v36  ;;  %3578 = vmatprep.subr.bf16.mxu1 %v7503_v37 }
 0xd42   :  { %3342 = vmatpush1.bf16.msra.mxu0 %v7498_v41  ;;  %3579 = vmatpush1.bf16.msra.mxu1 %v7501_v44 }
 0xd43   :  { %3343 = vmatprep.subr.bf16.mxu0 %v7506_v45  ;;  %3580 = vmatprep.subr.bf16.mxu1 %v7509_v27 }
 0xd46   :  { %3344 = vmatpush1.bf16.msra.mxu0 %v7504_v46  ;;  %3581 = vmatpush1.bf16.msra.mxu1 %v7507_v30 }
 0xd47   :  { %3345 = vmatprep.subr.bf16.mxu0 %v7512_v33  ;;  %3582 = vmatprep.subr.bf16.mxu1 %v7515_v34 }
 0xd4a   :  { %3346 = vmatpush1.bf16.msra.mxu0 %v7510_v47  ;;  %3583 = vmatpush1.bf16.msra.mxu1 %v7513_v48 }
 0xd4b   :  { %7022 = vmatprep.subr.bf16.mxu0 %v7516_v50 }
 0xd4d   :  { %3348 = vmatmul.mubr.bf16.vlgmr.msra.gmra.mrb[44].mxu0 %v9031_v35  ;;  %3601 = vmatmul.mubr.bf16.vlgmr.msra.gmra.mrb[48].mxu1 %v8886_v43  ;;  %v7520_v35 = vld [vmem:[%s9230_s10 + $0x68] ss:$12 sps:$4 sm:$0xff]  }
 0xd4e   :  { %7023 = vmatpush3.bf16.msra.mxu0 %v7516_v50  ;;  %7038 = vmatprep.mubr.bf16.mxu0 %v8886_v43  ;;  %v7522_v43 = vld [vmem:[%s9230_s10 + $0x98] ss:$12 sps:$4 sm:$0xff]  }
 0xd4f   :  { %7024 = vmatprep.subr.bf16.mxu0 %v7517_v51  ;;  %3610 = vmatprep.mubr.bf16.mxu1 %v8474_v0 }
 0xd52   :  { %7025 = vmatpush3.bf16.msra.mxu0 %v7517_v51 }
 0xd53   :  { %7026 = vmatprep.subr.bf16.mxu0 %v7518_v40 }
 0xd55   :  { %3611 = vmatmul.mubr.bf16.gmra.mrb[52].mxu1 %v8882_v38 }
 0xd56   :  { %7027 = vmatpush3.bf16.msra.mxu0 %v7518_v40  ;;  %3702 = vmatprep.mubr.bf16.mxu1 %v8474_v0 }
 0xd57   :  { %7028 = vmatprep.subr.bf16.mxu0 %v7519_v52 }
 0xd5a   :  { %7029 = vmatpush3.bf16.msra.mxu0 %v7519_v52 }
 0xd5b   :  { %7030 = vmatprep.subr.bf16.mxu0 %v7520_v35 }
 0xd5e   :  { %7031 = vmatpush3.bf16.msra.mxu0 %v7520_v35 }
 0xd5f   :  { %7032 = vmatprep.subr.bf16.mxu0 %v7521_v53 }
 0xd62   :  { %7033 = vmatpush3.bf16.msra.mxu0 %v7521_v53 }
 0xd63   :  { %7034 = vmatprep.subr.bf16.mxu0 %v7522_v43 }
 0xd66   :  { %7035 = vmatpush3.bf16.msra.mxu0 %v7522_v43 }
 0xd67   :  { %7036 = vmatprep.subr.bf16.mxu0 %v7523_v55 }
 0xd6a   :  { %7037 = vmatpush3.bf16.msra.mxu0 %v7523_v55 }
 0xd6d   :  { %7039 = vmatmul.mubr.bf16.vlgmr.msra.gmra.mrb[48].mxu0 %v8882_v38 }
 0xd6e   :  { %7044 = vmatprep.mubr.msk.bf16.mxu0 %vm1027_vm14, %v8884_v42 }
 0xde0   :  { %v2939_v31 = vpop.f32.mrb[40].mxu1  ;;  %v6717_v58 = vpop.f32.mrb[40].mxu0 }
 0xde1   :  { %v2941_v59 = vpop.f32.mrb[41].mxu1  ;;  %v6718_v60 = vpop.f32.mrb[41].mxu0  ;;  %v2940_v22 = vadd.f32 %v2939_v31, %v2637_v20  ;;  %v7527_v31 = vld [vmem:[#allocation32 + $0x8] ss:$16 sps:$4 sm:$0xff]  }
 0xde2   :  { %v6719_v61 = vadd.f32 %v6718_v60, %v6717_v58  ;;  %v2943_v62 = vpop.f32.mrb[42].mxu1  ;;  %v6720_v63 = vpop.f32.mrb[42].mxu0  ;;  %v2942_v23 = vadd.f32 %v2941_v59, %v2641_v21  ;;  %v7533_v58 = vld [vmem:[#allocation32 + $0x28] ss:$16 sps:$4 sm:$0xff]   ;;  %v7541_v59 = vld [vmem:[#allocation32 + $0x4c] ss:$16 sps:$4 sm:$0xff]  }
 0xde3   :  { %v2945_v2 = vpop.f32.mrb[43].mxu1  ;;  %v6721_v54 = vpop.f32.mrb[43].mxu0  ;;  %v2944_v24 = vadd.f32 %v2943_v62, %v2637_v20  ;;  %v2989_v26 = vmax.f32 %v2940_v22, 0.0  ;;  %v7539_v60 = vld [vmem:[#allocation32 + $0x48] ss:$16 sps:$4 sm:$0xff]  }
 0xde4   :  { %v6722_v3 = vadd.f32 %v6721_v54, %v6720_v63  ;;  %v2983_v38 = vadd.f32 %v6719_v61, %v2645_v5  ;;  %v2946_v25 = vadd.f32 %v2945_v2, %v2641_v21  ;;  %v2990_v28 = vmax.f32 %v2942_v23, 0.0  ;;  %v7547_v61 = vld [vmem:[#allocation32 + $0x6c] ss:$16 sps:$4 sm:$0xff]   ;;  %v7545_v62 = vld [vmem:[#allocation32 + $0x68] ss:$16 sps:$4 sm:$0xff]  }
 0xde5   :  { %v2992_v29 = vmax.f32 %v2944_v24, 0.0  ;;  %v7553_v63 = vld [vmem:[#allocation32 + $0x8c] ss:$16 sps:$4 sm:$0xff]   ;;  %v7551_v2 = vld [vmem:[#allocation32 + $0x88] ss:$16 sps:$4 sm:$0xff]  }
 0xde6   :  { %v2986_v6 = vadd.f32 %v6722_v3, %v2645_v5  ;;  %v2991_v9 = vmax.f32 %v2983_v38, 0.0  ;;  %v2993_v41 = vmax.f32 %v2946_v25, 0.0  ;;  %v7559_v54 = vld [vmem:[#allocation32 + $0xac] ss:$16 sps:$4 sm:$0xff]   ;;  %v7557_v38 = vld [vmem:[#allocation32 + $0xa8] ss:$16 sps:$4 sm:$0xff]  }
 0xde8   :  { %v2994_v15 = vmax.f32 %v2986_v6, 0.0 }
 0xe00   :  { %v6739_v39 = vpop.f32.mrb[44].mxu1 }
 0xe01   :  { %v6740_v7 = vpop.f32.mrb[45].mxu1 }
 0xe02   :  { %v6741_v10 = vadd.f32 %v6740_v7, %v6739_v39  ;;  %v6742_v11 = vpop.f32.mrb[46].mxu1 }
 0xe03   :  { %v6743_v13 = vpop.f32.mrb[47].mxu1 }
 0xe04   :  { %v9091_v16 = vadd.f32 %v6741_v10, %v2991_v9  ;;  %v6744_v17 = vadd.f32 %v6743_v13, %v6742_v11 }
 0xe06   :  { %v9093_v18 = vadd.f32 %v6744_v17, %v2994_v15 }
 0xe08   :  { %v9097_v19 = vpack.c.bf16 %v9093_v18, %v9091_v16 }
 0xe0a   :  { %7042 = vmatprep.subr.bf16.mxu0 %v9097_v19 }
 0xe0b   :  { %7043 = vmatpush3.bf16.msra.mxu0 %v9097_v19 }
 0xe0e   :  { %7045 = vmatmul.mubr.msk.bf16.vlgmr.msra.gmra.mrb[48].mxu0 %vm1027_vm14, %v8897_v49 }
 0xe0f   :  { %3828 = vmatprep.mubr.bf16.mxu0 %v8474_v0 }
 0xe20   :  { %v3349_v32 = vpop.f32.mrb[44].mxu0 }
 0xe21   :  { %v9106_v36 = vadd.f32 %v3349_v32, %v2989_v26  ;;  %v3351_v37 = vpop.f32.mrb[45].mxu0  ;;  %v7526_v32 = vld [vmem:[#allocation32 + $0x4] ss:$16 sps:$4 sm:$0xff]  }
 0xe22   :  { %v9108_v44 = vadd.f32 %v3351_v37, %v2990_v28  ;;  %v3353_v45 = vpop.f32.mrb[46].mxu0  ;;  %v7532_v37 = vld [vmem:[#allocation32 + $0x24] ss:$16 sps:$4 sm:$0xff]  }
 0xe23   :  { %v9110_v27 = vadd.f32 %v3353_v45, %v2992_v29  ;;  %v3355_v46 = vpop.f32.mrb[47].mxu0  ;;  %v7524_v29 = vld [vmem:[#allocation32] ss:$16 sps:$4 sm:$0xff]   ;;  %v7538_v45 = vld [vmem:[#allocation32 + $0x44] ss:$16 sps:$4 sm:$0xff]  }
 0xe24   :  { %v9112_v30 = vadd.f32 %v3355_v46, %v2993_v41  ;;  %v7530_v41 = vld [vmem:[#allocation32 + $0x20] ss:$16 sps:$4 sm:$0xff]  }
 0xe25   :  { %v9116_v33 = vpack.c.bf16 %v9110_v27, %v9106_v36  ;;  %v7536_v46 = vld [vmem:[#allocation32 + $0x40] ss:$16 sps:$4 sm:$0xff]  }
 0xe26   :  { %v9120_v34 = vpack.c.bf16 %v9112_v30, %v9108_v44 }
 0xe28   :  { %3670 = vmatprep.subr.bf16.mxu1 %v9120_v34 }
 0xe29   :  { %3671 = vmatpush1.bf16.msra.mxu1 %v9116_v33 }
 0xe2a   :  { %7048 = vmatprep.subr.bf16.mxu1 %v8475_v1 }
 0xe2c   :  { %6339 = vmatmul.mubr.msk.bf16.vlgmr.msra.gmra.mrb[48].mxu1 %vm1027_vm14, %v8884_v42  ;;  %v7529_v42 = vld [vmem:[#allocation32 + $0xc] ss:$16 sps:$4 sm:$0xff]  }
 0xe2d   :  { %3712 = vmatprep.mubr.bf16.mxu1 %v8474_v0 }
 0xe34   :  { %6340 = vmatmul.mubr.msk.bf16.gmra.mrb[52].mxu1 %vm1027_vm14, %v8897_v49  ;;  %v7535_v49 = vld [vmem:[#allocation32 + $0x2c] ss:$16 sps:$4 sm:$0xff]  }
 0xe35   :  { %7052 = vmatprep.mubr.msk.bf16.mxu1 %vm8476_vm0, %v8475_v1 }
 0xee1   :  { %v7046_v47 = vpop.f32.mrb[48].mxu0 }
 0xee2   :  { %v3757_v48 = vpop.f32.mrb[49].mxu0  ;;  %v3780_v51 = vmax.f32 %v7046_v47, 0.0  ;;  %v7544_v47 = vld [vmem:[#allocation32 + $0x64] ss:$16 sps:$4 sm:$0xff]  }
 0xee3   :  { %v7047_v50 = vpop.f32.mrb[50].mxu0  ;;  %v3774_v35 = vmax.f32 %v3757_v48, 0.0  ;;  %v7542_v48 = vld [vmem:[#allocation32 + $0x60] ss:$16 sps:$4 sm:$0xff]  }
 0xee4   :  { %v3783_v40 = vmax.f32 %v7047_v50, 0.0  ;;  %v3760_v52 = vpop.f32.mrb[51].mxu0  ;;  %v7550_v50 = vld [vmem:[#allocation32 + $0x84] ss:$16 sps:$4 sm:$0xff]  }
 0xee5   :  { %v3777_v53 = vmax.f32 %v3760_v52, 0.0  ;;  %v7554_v52 = vld [vmem:[#allocation32 + $0xa0] ss:$16 sps:$4 sm:$0xff]  }
 0xee6   :  { %v3789_v43 = vpack.c.bf16 %v3783_v40, %v3780_v51  ;;  %v7548_v51 = vld [vmem:[#allocation32 + $0x80] ss:$16 sps:$4 sm:$0xff]   ;;  %v7556_v40 = vld [vmem:[#allocation32 + $0xa4] ss:$16 sps:$4 sm:$0xff]  }
 0xee7   :  { %v3786_v55 = vpack.c.bf16 %v3777_v53, %v3774_v35  ;;  %v7565_v35 = vld [vmem:[#allocation32 + $0xcc] ss:$16 sps:$4 sm:$0xff]   ;;  %v7560_v53 = vld [vmem:[#allocation32 + $0xc0] ss:$16 sps:$4 sm:$0xff]  }
 0xee9   :  { %7049 = vmatpush3.bf16.msra.mxu1 %v3786_v55  ;;  %v7566_v55 = vld [vmem:[#allocation32 + $0xe0] ss:$16 sps:$4 sm:$0xff]  }
 0xeea   :  { %7050 = vmatprep.subr.bf16.mxu1 %v8475_v1 }
 0xeed   :  { %7051 = vmatpush3.bf16.msra.mxu1 %v3789_v43  ;;  %v7563_v43 = vld [vmem:[#allocation32 + $0xc8] ss:$16 sps:$4 sm:$0xff]  }
 0xeee   :  { %4567 = vmatprep.subr.bf16.mxu1 %v7529_v42  ;;  %v7568_v42 = vld [vmem:[#allocation32 + $0xe4] ss:$16 sps:$4 sm:$0xff]  }
 0xef0   :  { %7053 = vmatmul.mubr.msk.bf16.vlgmr.msra.gmra.mrb[56].mxu1 %vm1091_vm4, %v8921_v8 }
 0xef1   :  { %4568 = vmatpush1.bf16.msra.mxu1 %v7527_v31  ;;  %v7569_v31 = vld [vmem:[#allocation32 + $0xe8] ss:$16 sps:$4 sm:$0xff]  }
 0xef2   :  { %4569 = vmatprep.subr.bf16.mxu1 %v7535_v49  ;;  %v7571_v49 = vld [vmem:[#allocation32 + $0xec] ss:$16 sps:$4 sm:$0xff]  }
 0xef5   :  { %4570 = vmatpush1.bf16.msra.mxu1 %v7533_v58  ;;  %v7574_v58 = vld [vmem:[#allocation32 + $0x104] ss:$16 sps:$4 sm:$0xff]  }
 0xef6   :  { %4571 = vmatprep.subr.bf16.mxu1 %v7541_v59  ;;  %v7577_v59 = vld [vmem:[#allocation32 + $0x10c] ss:$16 sps:$4 sm:$0xff]  }
 0xef9   :  { %4572 = vmatpush1.bf16.msra.mxu1 %v7539_v60  ;;  %v7572_v60 = vld [vmem:[#allocation32 + $0x100] ss:$16 sps:$4 sm:$0xff]  }
 0xefa   :  { %4573 = vmatprep.subr.bf16.mxu1 %v7547_v61  ;;  %v7575_v61 = vld [vmem:[#allocation32 + $0x108] ss:$16 sps:$4 sm:$0xff]  }
 0xefd   :  { %4574 = vmatpush1.bf16.msra.mxu1 %v7545_v62  ;;  %v7580_v62 = vld [vmem:[#allocation32 + $0x124] ss:$16 sps:$4 sm:$0xff]  }
 0xefe   :  { %4575 = vmatprep.subr.bf16.mxu1 %v7553_v63  ;;  %v7583_v63 = vld [vmem:[#allocation32 + $0x12c] ss:$16 sps:$4 sm:$0xff]  }
 0xeff   :  { %v3704_v3 = vpop.f32.mrb[48].mxu1 }
 0xf00   :  { %v3706_v57 = vpop.f32.mrb[49].mxu1  ;;  %v3772_v6 = vmax.f32 %v3704_v3, 0.0  ;;  %v7586_v3 = vld [vmem:[#allocation32 + $0x144] ss:$16 sps:$4 sm:$0xff]  }
 0xf01   :  { %v3708_v5 = vpop.f32.mrb[50].mxu1  ;;  %4576 = vmatpush1.bf16.msra.mxu1 %v7551_v2  ;;  %v3773_v9 = vmax.f32 %v3706_v57, 0.0  ;;  %v7578_v2 = vld [vmem:[#allocation32 + $0x120] ss:$16 sps:$4 sm:$0xff]   ;;  %v7589_v57 = vld [vmem:[#allocation32 + $0x14c] ss:$16 sps:$4 sm:$0xff]  }
 0xf02   :  { %v3775_v39 = vmax.f32 %v3708_v5, 0.0  ;;  %v3710_v7 = vpop.f32.mrb[51].mxu1  ;;  %4577 = vmatprep.subr.bf16.mxu1 %v7559_v54  ;;  %v7581_v54 = vld [vmem:[#allocation32 + $0x128] ss:$16 sps:$4 sm:$0xff]   ;;  %v7584_v5 = vld [vmem:[#allocation32 + $0x140] ss:$16 sps:$4 sm:$0xff]  }
 0xf03   :  { %v3776_v10 = vmax.f32 %v3710_v7, 0.0  ;;  %v7590_v7 = vld [vmem:[#allocation32 + $0x160] ss:$16 sps:$4 sm:$0xff]  }
 0xf04   :  { %v3784_v11 = vpack.c.bf16 %v3775_v39, %v3772_v6  ;;  %v7592_v6 = vld [vmem:[#allocation32 + $0x164] ss:$16 sps:$4 sm:$0xff]   ;;  %v7595_v39 = vld [vmem:[#allocation32 + $0x16c] ss:$16 sps:$4 sm:$0xff]  }
 0xf05   :  { %v3785_v13 = vpack.c.bf16 %v3776_v10, %v3773_v9  ;;  %4578 = vmatpush1.bf16.msra.mxu1 %v7557_v38  ;;  %v7587_v38 = vld [vmem:[#allocation32 + $0x148] ss:$16 sps:$4 sm:$0xff]   ;;  %v7598_v10 = vld [vmem:[#allocation32 + $0x184] ss:$16 sps:$4 sm:$0xff]  }
 0xf06   :  { %4579 = vmatprep.subr.bf16.mxu1 %v7565_v35  ;;  %v7593_v9 = vld [vmem:[#allocation32 + $0x168] ss:$16 sps:$4 sm:$0xff]  }
 0xf07   :  { %v3714_v15 = vpop.f32.mrb[52].mxu1  ;;  %3796 = vmatprep.subr.bf16.mxu0 %v3785_v13  ;;  %v7596_v13 = vld [vmem:[#allocation32 + $0x180] ss:$16 sps:$4 sm:$0xff]  }
 0xf08   :  { %v3716_v17 = vpop.f32.mrb[53].mxu1  ;;  %3797 = vmatpush1.bf16.msra.mxu0 %v3784_v11  ;;  %v3778_v21 = vmax.f32 %v3714_v15, 0.0  ;;  %v7601_v11 = vld [vmem:[#allocation32 + $0x18c] ss:$16 sps:$4 sm:$0xff]   ;;  %v7599_v15 = vld [vmem:[#allocation32 + $0x188] ss:$16 sps:$4 sm:$0xff]  }
 0xf09   :  { %v3718_v20 = vpop.f32.mrb[54].mxu1  ;;  %v3779_v24 = vmax.f32 %v3716_v17, 0.0  ;;  %4580 = vmatpush1.bf16.msra.mxu1 %v7563_v43  ;;  %v7604_v17 = vld [vmem:[#allocation32 + $0x1a4] ss:$16 sps:$4 sm:$0xff]  }
 0xf0a   :  { %v3781_v22 = vmax.f32 %v3718_v20, 0.0  ;;  %v3720_v23 = vpop.f32.mrb[55].mxu1  ;;  %4581 = vmatprep.subr.bf16.mxu1 %v7571_v49  ;;  %v7607_v20 = vld [vmem:[#allocation32 + $0x1ac] ss:$16 sps:$4 sm:$0xff]   ;;  %v3793_v49 = vmul.f32 1.00001, %v9110_v27 }
 0xf0b   :  { %v3782_v25 = vmax.f32 %v3720_v23, 0.0  ;;  %v7610_v23 = vld [vmem:[#allocation32 + $0x1c4] ss:$16 sps:$4 sm:$0xff]   ;;  %v7629_v27 = vld [vmem:[#allocation32 + $0x228] ss:$16 sps:$4 sm:$0xff]  }
 0xf0c   :  { %v3787_v26 = vpack.c.bf16 %v3781_v22, %v3778_v21  ;;  %v7602_v21 = vld [vmem:[#allocation32 + $0x1a0] ss:$16 sps:$4 sm:$0xff]   ;;  %v7605_v22 = vld [vmem:[#allocation32 + $0x1a8] ss:$16 sps:$4 sm:$0xff]  }
 0xf0d   :  { %v3788_v28 = vpack.c.bf16 %v3782_v25, %v3779_v24  ;;  %4582 = vmatpush1.bf16.msra.mxu1 %v7569_v31  ;;  %v7613_v24 = vld [vmem:[#allocation32 + $0x1cc] ss:$16 sps:$4 sm:$0xff]   ;;  %v7608_v25 = vld [vmem:[#allocation32 + $0x1c0] ss:$16 sps:$4 sm:$0xff]  }
 0xf0e   :  { %4583 = vmatprep.subr.bf16.mxu1 %v7577_v59  ;;  %v3794_v59 = vmul.f32 1.00001, %v9112_v30  ;;  %v7634_v30 = vld [vmem:[#allocation32 + $0x244] ss:$16 sps:$4 sm:$0xff]  }
 0xf0f   :  { %3798 = vmatprep.subr.bf16.mxu0 %v3788_v28  ;;  %v7616_v28 = vld [vmem:[#allocation32 + $0x1e4] ss:$16 sps:$4 sm:$0xff]  }
 0xf10   :  { %3799 = vmatpush1.bf16.msra.mxu0 %v3787_v26  ;;  %v7611_v26 = vld [vmem:[#allocation32 + $0x1c8] ss:$16 sps:$4 sm:$0xff]  }
 0xf11   :  { %4481 = vmatprep.subr.bf16.mxu0 %v7526_v32  ;;  %4584 = vmatpush1.bf16.msra.mxu1 %v7575_v61  ;;  %v7619_v32 = vld [vmem:[#allocation32 + $0x1ec] ss:$16 sps:$4 sm:$0xff]  }
 0xf12   :  { %4585 = vmatprep.subr.bf16.mxu1 %v7583_v63 }
 0xf13   :  { %6343 = vmatmul.mubr.msk.bf16.vlgmr.msra.gmra.mrb[52].mxu0 %vm1091_vm4, %v8921_v8  ;;  %v7562_v8 = vld [vmem:[#allocation32 + $0xc4] ss:$16 sps:$4 sm:$0xff]  }
 0xf14   :  { %4482 = vmatpush1.bf16.msra.mxu0 %v7524_v29  ;;  %v7614_v29 = vld [vmem:[#allocation32 + $0x1e0] ss:$16 sps:$4 sm:$0xff]  }
 0xf15   :  { %4483 = vmatprep.subr.bf16.mxu0 %v7532_v37  ;;  %4586 = vmatpush1.bf16.msra.mxu1 %v7581_v54  ;;  %v7617_v37 = vld [vmem:[#allocation32 + $0x1e8] ss:$16 sps:$4 sm:$0xff]  }
 0xf16   :  { %4587 = vmatprep.subr.bf16.mxu1 %v7589_v57  ;;  %v7623_v54 = vld [vmem:[#allocation32 + $0x208] ss:$16 sps:$4 sm:$0xff]   ;;  %v7637_v57 = vld [vmem:[#allocation32 + $0x24c] ss:$16 sps:$4 sm:$0xff]  }
 0xf18   :  { %4484 = vmatpush1.bf16.msra.mxu0 %v7530_v41  ;;  %v7622_v41 = vld [vmem:[#allocation32 + $0x204] ss:$16 sps:$4 sm:$0xff]  }
 0xf19   :  { %4485 = vmatprep.subr.bf16.mxu0 %v7538_v45  ;;  %4588 = vmatpush1.bf16.msra.mxu1 %v7587_v38  ;;  %v7625_v45 = vld [vmem:[#allocation32 + $0x20c] ss:$16 sps:$4 sm:$0xff]   ;;  %v7635_v38 = vld [vmem:[#allocation32 + $0x248] ss:$16 sps:$4 sm:$0xff]  }
 0xf1a   :  { %4589 = vmatprep.subr.bf16.mxu1 %v7595_v39  ;;  %v7643_v39 = vld [vmem:[#allocation32 + $0x26c] ss:$16 sps:$4 sm:$0xff]  }
 0xf1c   :  { %4486 = vmatpush1.bf16.msra.mxu0 %v7536_v46  ;;  %v3792_v46 = vmul.f32 1.00001, %v9091_v16 }
 0xf1d   :  { %4487 = vmatprep.subr.bf16.mxu0 %v7544_v47  ;;  %4590 = vmatpush1.bf16.msra.mxu1 %v7593_v9  ;;  %v7641_v9 = vld [vmem:[#allocation32 + $0x268] ss:$16 sps:$4 sm:$0xff]  }
 0xf1e   :  { %4591 = vmatprep.subr.bf16.mxu1 %v7601_v11  ;;  %v7649_v11 = vld [vmem:[#allocation32 + $0x28c] ss:$16 sps:$4 sm:$0xff]  }
 0xf20   :  { %4488 = vmatpush1.bf16.msra.mxu0 %v7542_v48 }
 0xf21   :  { %4489 = vmatprep.subr.bf16.mxu0 %v7550_v50  ;;  %4592 = vmatpush1.bf16.msra.mxu1 %v7599_v15  ;;  %v7647_v15 = vld [vmem:[#allocation32 + $0x288] ss:$16 sps:$4 sm:$0xff]  }
 0xf22   :  { %4593 = vmatprep.subr.bf16.mxu1 %v7607_v20  ;;  %v7655_v20 = vld [vmem:[#allocation32 + $0x2ac] ss:$16 sps:$4 sm:$0xff]  }
 0xf24   :  { %4490 = vmatpush1.bf16.msra.mxu0 %v7548_v51  ;;  %v3795_v51 = vmul.f32 1.00001, %v9093_v18 }
 0xf25   :  { %4491 = vmatprep.subr.bf16.mxu0 %v7556_v40  ;;  %4594 = vmatpush1.bf16.msra.mxu1 %v7605_v22  ;;  %v7653_v22 = vld [vmem:[#allocation32 + $0x2a8] ss:$16 sps:$4 sm:$0xff]  }
 0xf26   :  { %4595 = vmatprep.subr.bf16.mxu1 %v7613_v24  ;;  %v7661_v24 = vld [vmem:[#allocation32 + $0x2cc] ss:$16 sps:$4 sm:$0xff]  }
 0xf28   :  { %4492 = vmatpush1.bf16.msra.mxu0 %v7554_v52 }
 0xf29   :  { %4493 = vmatprep.subr.bf16.mxu0 %v7562_v8  ;;  %4596 = vmatpush1.bf16.msra.mxu1 %v7611_v26  ;;  %v7659_v26 = vld [vmem:[#allocation32 + $0x2c8] ss:$16 sps:$4 sm:$0xff]  }
 0xf2a   :  { %4597 = vmatprep.subr.bf16.mxu1 %v7619_v32  ;;  %v7667_v32 = vld [vmem:[#allocation32 + $0x2ec] ss:$16 sps:$4 sm:$0xff]  }
 0xf2c   :  { %4494 = vmatpush1.bf16.msra.mxu0 %v7560_v53  ;;  %v3790_v53 = vmul.f32 1.00001, %v9106_v36  ;;  %v7631_v36 = vld [vmem:[#allocation32 + $0x22c] ss:$16 sps:$4 sm:$0xff]  }
 0xf2d   :  { %4495 = vmatprep.subr.bf16.mxu0 %v7568_v42  ;;  %4598 = vmatpush1.bf16.msra.mxu1 %v7617_v37  ;;  %v7665_v37 = vld [vmem:[#allocation32 + $0x2e8] ss:$16 sps:$4 sm:$0xff]  }
 0xf2e   :  { %4610 = vmatprep.subr.bf16.mxu1 %v7625_v45  ;;  %v7673_v45 = vld [vmem:[#allocation34 + $0xc] ss:$16 sps:$4 sm:$0xff]  }
 0xf30   :  { %4496 = vmatpush1.bf16.msra.mxu0 %v7566_v55  ;;  %v3791_v55 = vmul.f32 1.00001, %v9108_v44  ;;  %v7626_v44 = vld [vmem:[#allocation32 + $0x220] ss:$16 sps:$4 sm:$0xff]  }
 0xf31   :  { %4497 = vmatprep.subr.bf16.mxu0 %v7574_v58 }
 0xf34   :  { %4498 = vmatpush1.bf16.msra.mxu0 %v7572_v60 }
 0xf35   :  { %4499 = vmatprep.subr.bf16.mxu0 %v7580_v62 }
 0xf38   :  { %4500 = vmatpush1.bf16.msra.mxu0 %v7578_v2  ;;  %v7620_v2 = vld [vmem:[#allocation32 + $0x200] ss:$16 sps:$4 sm:$0xff]  }
 0xf39   :  { %4501 = vmatprep.subr.bf16.mxu0 %v7586_v3  ;;  %v7628_v3 = vld [vmem:[#allocation32 + $0x224] ss:$16 sps:$4 sm:$0xff]  }
 0xf3c   :  { %4502 = vmatpush1.bf16.msra.mxu0 %v7584_v5  ;;  %v7632_v5 = vld [vmem:[#allocation32 + $0x240] ss:$16 sps:$4 sm:$0xff]  }
 0xf3d   :  { %4503 = vmatprep.subr.bf16.mxu0 %v7592_v6  ;;  %v7640_v6 = vld [vmem:[#allocation32 + $0x264] ss:$16 sps:$4 sm:$0xff]  }
 0xf40   :  { %4504 = vmatpush1.bf16.msra.mxu0 %v7590_v7  ;;  %v7638_v7 = vld [vmem:[#allocation32 + $0x260] ss:$16 sps:$4 sm:$0xff]  }
 0xf41   :  { %4505 = vmatprep.subr.bf16.mxu0 %v7598_v10  ;;  %v7646_v10 = vld [vmem:[#allocation32 + $0x284] ss:$16 sps:$4 sm:$0xff]  }
 0xf44   :  { %4506 = vmatpush1.bf16.msra.mxu0 %v7596_v13  ;;  %v7644_v13 = vld [vmem:[#allocation32 + $0x280] ss:$16 sps:$4 sm:$0xff]  }
 0xf45   :  { %4507 = vmatprep.subr.bf16.mxu0 %v7604_v17  ;;  %v7652_v17 = vld [vmem:[#allocation32 + $0x2a4] ss:$16 sps:$4 sm:$0xff]  }
 0xf48   :  { %4508 = vmatpush1.bf16.msra.mxu0 %v7602_v21  ;;  %v7650_v21 = vld [vmem:[#allocation32 + $0x2a0] ss:$16 sps:$4 sm:$0xff]  }
 0xf49   :  { %4509 = vmatprep.subr.bf16.mxu0 %v7610_v23  ;;  %v7658_v23 = vld [vmem:[#allocation32 + $0x2c4] ss:$16 sps:$4 sm:$0xff]  }
 0xf4c   :  { %4510 = vmatpush1.bf16.msra.mxu0 %v7608_v25  ;;  %v7656_v25 = vld [vmem:[#allocation32 + $0x2c0] ss:$16 sps:$4 sm:$0xff]  }
 0xf4d   :  { %4511 = vmatprep.subr.bf16.mxu0 %v7616_v28  ;;  %v7664_v28 = vld [vmem:[#allocation32 + $0x2e4] ss:$16 sps:$4 sm:$0xff]  }
 0xf50   :  { %4512 = vmatpush1.bf16.msra.mxu0 %v7614_v29  ;;  %v7662_v29 = vld [vmem:[#allocation32 + $0x2e0] ss:$16 sps:$4 sm:$0xff]  }
 0xf51   :  { %4524 = vmatprep.subr.bf16.mxu0 %v7622_v41  ;;  %v7670_v41 = vld [vmem:[#allocation34 + $0x4] ss:$16 sps:$4 sm:$0xff]  }
 0xfc3   :  { %v3873_v47 = vpop.f32.mrb[56].mxu1 }
 0xfc4   :  { %v3874_v48 = vadd.f32 %v3873_v47, %v3792_v46  ;;  %v7054_v50 = vpop.f32.mrb[57].mxu1  ;;  %v7668_v46 = vld [vmem:[#allocation34] ss:$16 sps:$4 sm:$0xff]   ;;  %v7671_v47 = vld [vmem:[#allocation34 + $0x8] ss:$16 sps:$4 sm:$0xff]  }
 0xfc5   :  { %v3876_v40 = vpop.f32.mrb[58].mxu1  ;;  %v7679_v50 = vld [vmem:[#allocation34 + $0x2c] ss:$16 sps:$4 sm:$0xff]  }
 0xfc6   :  { %v3877_v52 = vadd.f32 %v3876_v40, %v3795_v51  ;;  %v7055_v8 = vpop.f32.mrb[59].mxu1  ;;  %v7674_v51 = vld [vmem:[#allocation34 + $0x20] ss:$16 sps:$4 sm:$0xff]   ;;  %v7677_v40 = vld [vmem:[#allocation34 + $0x28] ss:$16 sps:$4 sm:$0xff]  }
 0xfc7   :  { %v7685_v8 = vld [vmem:[#allocation34 + $0x4c] ss:$16 sps:$4 sm:$0xff]  }
 0xfc8   :  { %v9139_v35 = vpack.c.bf16 %v3877_v52, %v3874_v48  ;;  %v7676_v48 = vld [vmem:[#allocation34 + $0x24] ss:$16 sps:$4 sm:$0xff]  }
 0xfc9   :  { %v7682_v52 = vld [vmem:[#allocation34 + $0x44] ss:$16 sps:$4 sm:$0xff]  }
 0xfe6   :  { %v3830_v43 = vpop.f32.mrb[52].mxu0 }
 0xfe7   :  { %v3831_v42 = vadd.f32 %v3830_v43, %v3790_v53  ;;  %v3832_v31 = vpop.f32.mrb[53].mxu0  ;;  %v7680_v53 = vld [vmem:[#allocation34 + $0x40] ss:$16 sps:$4 sm:$0xff]   ;;  %v7683_v43 = vld [vmem:[#allocation34 + $0x48] ss:$16 sps:$4 sm:$0xff]  }
 0xfe8   :  { %v3833_v16 = vadd.f32 %v3832_v31, %v3791_v55  ;;  %v3834_v58 = vpop.f32.mrb[54].mxu0  ;;  %v7688_v55 = vld [vmem:[#allocation34 + $0x64] ss:$16 sps:$4 sm:$0xff]   ;;  %v7689_v31 = vld [vmem:[#allocation34 + $0x68] ss:$16 sps:$4 sm:$0xff]  }
 0xfe9   :  { %v3835_v60 = vadd.f32 %v3834_v58, %v3793_v49  ;;  %v3836_v18 = vpop.f32.mrb[55].mxu0  ;;  %v7694_v49 = vld [vmem:[#allocation34 + $0x84] ss:$16 sps:$4 sm:$0xff]   ;;  %v7695_v58 = vld [vmem:[#allocation34 + $0x88] ss:$16 sps:$4 sm:$0xff]  }
 0xfea   :  { %v3837_v61 = vadd.f32 %v3836_v18, %v3794_v59  ;;  %v7700_v59 = vld [vmem:[#allocation34 + $0xa4] ss:$16 sps:$4 sm:$0xff]   ;;  %v7698_v18 = vld [vmem:[#allocation34 + $0xa0] ss:$16 sps:$4 sm:$0xff]  }
 0xfeb   :  { %v3880_v62 = vpack.c.bf16 %v3835_v60, %v3831_v42  ;;  %v7686_v42 = vld [vmem:[#allocation34 + $0x60] ss:$16 sps:$4 sm:$0xff]   ;;  %v7703_v60 = vld [vmem:[#allocation34 + $0xac] ss:$16 sps:$4 sm:$0xff]  }
 0xfec   :  { %v3881_v63 = vpack.c.bf16 %v3837_v61, %v3833_v16  ;;  %v7692_v16 = vld [vmem:[#allocation34 + $0x80] ss:$16 sps:$4 sm:$0xff]   ;;  %v7701_v61 = vld [vmem:[#allocation34 + $0xa8] ss:$16 sps:$4 sm:$0xff]  }
 0xfee   :  { %4513 = vmatprep.mubr.bf16.mxu0 %v3881_v63  ;;  %4599 = vmatprep.mubr.bf16.mxu1 %v3881_v63  ;;  %v7709_v63 = vld [vmem:[#allocation34 + $0xcc] ss:$16 sps:$4 sm:$0xff]  }
 0xfef   :  { %4514 = vmatmul.mubr.bf16.vlgmr.msra.gmra.mrb[56].mxu0 %v3880_v62  ;;  %4600 = vmatmul.mubr.bf16.vlgmr.msra.gmra.mrb[60].mxu1 %v3880_v62  ;;  %v7706_v62 = vld [vmem:[#allocation34 + $0xc4] ss:$16 sps:$4 sm:$0xff]  }
 0xff0   :  { %4525 = vmatpush1.bf16.msra.mxu0 %v7620_v2  ;;  %4611 = vmatpush1.bf16.msra.mxu1 %v7623_v54  ;;  %v7704_v2 = vld [vmem:[#allocation34 + $0xc0] ss:$16 sps:$4 sm:$0xff]   ;;  %v7707_v54 = vld [vmem:[#allocation34 + $0xc8] ss:$16 sps:$4 sm:$0xff]  }
 0xff1   :  { %4526 = vmatprep.subr.bf16.mxu0 %v7628_v3  ;;  %4612 = vmatprep.subr.bf16.mxu1 %v7631_v36  ;;  %v7712_v3 = vld [vmem:[#allocation34 + $0xe4] ss:$16 sps:$4 sm:$0xff]   ;;  %v7715_v36 = vld [vmem:[#allocation34 + $0xec] ss:$16 sps:$4 sm:$0xff]  }
 0xff2   :  { %4556 = vmatprep.mubr.bf16.mxu0 %v8474_v0  ;;  %4642 = vmatprep.mubr.bf16.mxu1 %v8474_v0 }
 0xff4   :  { %4527 = vmatpush1.bf16.msra.mxu0 %v7626_v44  ;;  %4613 = vmatpush1.bf16.msra.mxu1 %v7629_v27  ;;  %v7710_v44 = vld [vmem:[#allocation34 + $0xe0] ss:$16 sps:$4 sm:$0xff]   ;;  %v7713_v27 = vld [vmem:[#allocation34 + $0xe8] ss:$16 sps:$4 sm:$0xff]  }
 0xff5   :  { %4528 = vmatprep.subr.bf16.mxu0 %v7634_v30  ;;  %4614 = vmatprep.subr.bf16.mxu1 %v7637_v57  ;;  %v7718_v30 = vld [vmem:[#allocation34 + $0x104] ss:$16 sps:$4 sm:$0xff]   ;;  %v7721_v57 = vld [vmem:[#allocation34 + $0x10c] ss:$16 sps:$4 sm:$0xff]  }
 0xff8   :  { %4529 = vmatpush1.bf16.msra.mxu0 %v7632_v5  ;;  %4615 = vmatpush1.bf16.msra.mxu1 %v7635_v38  ;;  %v7716_v5 = vld [vmem:[#allocation34 + $0x100] ss:$16 sps:$4 sm:$0xff]   ;;  %v7719_v38 = vld [vmem:[#allocation34 + $0x108] ss:$16 sps:$4 sm:$0xff]  }
 0xff9   :  { %4530 = vmatprep.subr.bf16.mxu0 %v7640_v6  ;;  %4616 = vmatprep.subr.bf16.mxu1 %v7643_v39  ;;  %v7724_v6 = vld [vmem:[#allocation34 + $0x124] ss:$16 sps:$4 sm:$0xff]   ;;  %v7727_v39 = vld [vmem:[#allocation34 + $0x12c] ss:$16 sps:$4 sm:$0xff]  }
 0xffc   :  { %4531 = vmatpush1.bf16.msra.mxu0 %v7638_v7  ;;  %4617 = vmatpush1.bf16.msra.mxu1 %v7641_v9  ;;  %v7722_v7 = vld [vmem:[#allocation34 + $0x120] ss:$16 sps:$4 sm:$0xff]   ;;  %v7725_v9 = vld [vmem:[#allocation34 + $0x128] ss:$16 sps:$4 sm:$0xff]  }
 0xffd   :  { %4532 = vmatprep.subr.bf16.mxu0 %v7646_v10  ;;  %4618 = vmatprep.subr.bf16.mxu1 %v7649_v11  ;;  %v7730_v10 = vld [vmem:[#allocation34 + $0x144] ss:$16 sps:$4 sm:$0xff]   ;;  %v7733_v11 = vld [vmem:[#allocation34 + $0x14c] ss:$16 sps:$4 sm:$0xff]  }
0x1000   :  { %4533 = vmatpush1.bf16.msra.mxu0 %v7644_v13  ;;  %4619 = vmatpush1.bf16.msra.mxu1 %v7647_v15  ;;  %v7728_v13 = vld [vmem:[#allocation34 + $0x140] ss:$16 sps:$4 sm:$0xff]   ;;  %v7731_v15 = vld [vmem:[#allocation34 + $0x148] ss:$16 sps:$4 sm:$0xff]  }
0x1001   :  { %4534 = vmatprep.subr.bf16.mxu0 %v7652_v17  ;;  %4620 = vmatprep.subr.bf16.mxu1 %v7655_v20  ;;  %v7736_v17 = vld [vmem:[#allocation34 + $0x164] ss:$16 sps:$4 sm:$0xff]   ;;  %v7739_v20 = vld [vmem:[#allocation34 + $0x16c] ss:$16 sps:$4 sm:$0xff]  }
0x1004   :  { %4535 = vmatpush1.bf16.msra.mxu0 %v7650_v21  ;;  %4621 = vmatpush1.bf16.msra.mxu1 %v7653_v22  ;;  %v7734_v21 = vld [vmem:[#allocation34 + $0x160] ss:$16 sps:$4 sm:$0xff]   ;;  %v7737_v22 = vld [vmem:[#allocation34 + $0x168] ss:$16 sps:$4 sm:$0xff]  }
0x1005   :  { %4536 = vmatprep.subr.bf16.mxu0 %v7658_v23  ;;  %4622 = vmatprep.subr.bf16.mxu1 %v7661_v24  ;;  %v7742_v23 = vld [vmem:[#allocation34 + $0x184] ss:$16 sps:$4 sm:$0xff]   ;;  %v7745_v24 = vld [vmem:[#allocation34 + $0x18c] ss:$16 sps:$4 sm:$0xff]  }
0x1008   :  { %4537 = vmatpush1.bf16.msra.mxu0 %v7656_v25  ;;  %4623 = vmatpush1.bf16.msra.mxu1 %v7659_v26  ;;  %v7740_v25 = vld [vmem:[#allocation34 + $0x180] ss:$16 sps:$4 sm:$0xff]   ;;  %v7743_v26 = vld [vmem:[#allocation34 + $0x188] ss:$16 sps:$4 sm:$0xff]  }
0x1009   :  { %4538 = vmatprep.subr.bf16.mxu0 %v7664_v28  ;;  %4624 = vmatprep.subr.bf16.mxu1 %v7667_v32  ;;  %v7748_v28 = vld [vmem:[#allocation34 + $0x1a4] ss:$16 sps:$4 sm:$0xff]   ;;  %v7751_v32 = vld [vmem:[#allocation34 + $0x1ac] ss:$16 sps:$4 sm:$0xff]  }
0x100c   :  { %4539 = vmatpush1.bf16.msra.mxu0 %v7662_v29  ;;  %4625 = vmatpush1.bf16.msra.mxu1 %v7665_v37  ;;  %v7746_v29 = vld [vmem:[#allocation34 + $0x1a0] ss:$16 sps:$4 sm:$0xff]   ;;  %v7749_v37 = vld [vmem:[#allocation34 + $0x1a8] ss:$16 sps:$4 sm:$0xff]  }
0x100d   :  { %5237 = vmatprep.subr.bf16.mxu0 %v7670_v41  ;;  %5323 = vmatprep.subr.bf16.mxu1 %v7673_v45  ;;  %v7754_v41 = vld [vmem:[#allocation34 + $0x1c4] ss:$16 sps:$4 sm:$0xff]   ;;  %v7757_v45 = vld [vmem:[#allocation34 + $0x1cc] ss:$16 sps:$4 sm:$0xff]  }
0x100f   :  { %4557 = vmatmul.mubr.bf16.vlgmr.msra.gmra.mrb[56].mxu0 %v9139_v35  ;;  %4643 = vmatmul.mubr.bf16.vlgmr.msra.gmra.mrb[60].mxu1 %v9139_v35  ;;  %v7691_v35 = vld [vmem:[#allocation34 + $0x6c] ss:$16 sps:$4 sm:$0xff]  }
0x1010   :  { %5238 = vmatpush1.bf16.msra.mxu0 %v7668_v46  ;;  %5269 = vmatprep.mubr.bf16.mxu0 %v9120_v34  ;;  %v7752_v46 = vld [vmem:[#allocation34 + $0x1c0] ss:$16 sps:$4 sm:$0xff]  }
0x1011   :  { %5324 = vmatpush1.bf16.msra.mxu1 %v7671_v47  ;;  %5355 = vmatprep.mubr.bf16.mxu1 %v9120_v34  ;;  %v7697_v34 = vld [vmem:[#allocation34 + $0x8c] ss:$16 sps:$4 sm:$0xff]   ;;  %v7755_v47 = vld [vmem:[#allocation34 + $0x1c8] ss:$16 sps:$4 sm:$0xff]  }
0x1012   :  { %5239 = vmatprep.subr.bf16.mxu0 %v7676_v48  ;;  %5325 = vmatprep.subr.bf16.mxu1 %v7679_v50  ;;  %v7760_v48 = vld [vmem:[#allocation34 + $0x1e4] ss:$16 sps:$4 sm:$0xff]   ;;  %v7763_v50 = vld [vmem:[#allocation34 + $0x1ec] ss:$16 sps:$4 sm:$0xff]  }
0x1014   :  { %5240 = vmatpush1.bf16.msra.mxu0 %v7674_v51  ;;  %v7758_v51 = vld [vmem:[#allocation34 + $0x1e0] ss:$16 sps:$4 sm:$0xff]  }
0x1015   :  { %5326 = vmatpush1.bf16.msra.mxu1 %v7677_v40  ;;  %5241 = vmatprep.subr.bf16.mxu0 %v7682_v52  ;;  %v7761_v40 = vld [vmem:[#allocation34 + $0x1e8] ss:$16 sps:$4 sm:$0xff]   ;;  %v7766_v52 = vld [vmem:[#allocation34 + $0x204] ss:$16 sps:$4 sm:$0xff]  }
0x1016   :  { %5327 = vmatprep.subr.bf16.mxu1 %v7685_v8  ;;  %v7769_v8 = vld [vmem:[#allocation34 + $0x20c] ss:$16 sps:$4 sm:$0xff]  }
0x1018   :  { %5242 = vmatpush1.bf16.msra.mxu0 %v7680_v53  ;;  %v7764_v53 = vld [vmem:[#allocation34 + $0x200] ss:$16 sps:$4 sm:$0xff]  }
0x1019   :  { %5328 = vmatpush1.bf16.msra.mxu1 %v7683_v43  ;;  %5243 = vmatprep.subr.bf16.mxu0 %v7688_v55  ;;  %v7767_v43 = vld [vmem:[#allocation34 + $0x208] ss:$16 sps:$4 sm:$0xff]   ;;  %v7772_v55 = vld [vmem:[#allocation34 + $0x224] ss:$16 sps:$4 sm:$0xff]  }
0x101a   :  { %5329 = vmatprep.subr.bf16.mxu1 %v7691_v35  ;;  %v7775_v35 = vld [vmem:[#allocation34 + $0x22c] ss:$16 sps:$4 sm:$0xff]  }
0x101c   :  { %5244 = vmatpush1.bf16.msra.mxu0 %v7686_v42  ;;  %v7770_v42 = vld [vmem:[#allocation34 + $0x220] ss:$16 sps:$4 sm:$0xff]  }
0x101d   :  { %5330 = vmatpush1.bf16.msra.mxu1 %v7689_v31  ;;  %5245 = vmatprep.subr.bf16.mxu0 %v7694_v49  ;;  %v7773_v31 = vld [vmem:[#allocation34 + $0x228] ss:$16 sps:$4 sm:$0xff]   ;;  %v7778_v49 = vld [vmem:[#allocation34 + $0x244] ss:$16 sps:$4 sm:$0xff]  }
0x101e   :  { %5331 = vmatprep.subr.bf16.mxu1 %v7697_v34  ;;  %v7781_v34 = vld [vmem:[#allocation34 + $0x24c] ss:$16 sps:$4 sm:$0xff]  }
0x1020   :  { %5246 = vmatpush1.bf16.msra.mxu0 %v7692_v16  ;;  %v7776_v16 = vld [vmem:[#allocation34 + $0x240] ss:$16 sps:$4 sm:$0xff]  }
0x1021   :  { %5332 = vmatpush1.bf16.msra.mxu1 %v7695_v58  ;;  %5247 = vmatprep.subr.bf16.mxu0 %v7700_v59  ;;  %v7779_v58 = vld [vmem:[#allocation34 + $0x248] ss:$16 sps:$4 sm:$0xff]   ;;  %v7784_v59 = vld [vmem:[#allocation34 + $0x264] ss:$16 sps:$4 sm:$0xff]  }
0x1022   :  { %5333 = vmatprep.subr.bf16.mxu1 %v7703_v60  ;;  %v7782_v60 = vld [vmem:[#allocation34 + $0x260] ss:$16 sps:$4 sm:$0xff]  }
0x1024   :  { %5248 = vmatpush1.bf16.msra.mxu0 %v7698_v18  ;;  %v7785_v18 = vld [vmem:[#allocation34 + $0x268] ss:$16 sps:$4 sm:$0xff]  }
0x1025   :  { %5334 = vmatpush1.bf16.msra.mxu1 %v7701_v61  ;;  %5249 = vmatprep.subr.bf16.mxu0 %v7706_v62  ;;  %v7790_v61 = vld [vmem:[#allocation34 + $0x284] ss:$16 sps:$4 sm:$0xff]   ;;  %v7793_v62 = vld [vmem:[#allocation34 + $0x28c] ss:$16 sps:$4 sm:$0xff]  }
0x1026   :  { %5335 = vmatprep.subr.bf16.mxu1 %v7709_v63  ;;  %v7788_v63 = vld [vmem:[#allocation34 + $0x280] ss:$16 sps:$4 sm:$0xff]  }
0x1028   :  { %5250 = vmatpush1.bf16.msra.mxu0 %v7704_v2  ;;  %v7791_v2 = vld [vmem:[#allocation34 + $0x288] ss:$16 sps:$4 sm:$0xff]  }
0x1029   :  { %5336 = vmatpush1.bf16.msra.mxu1 %v7707_v54  ;;  %5251 = vmatprep.subr.bf16.mxu0 %v7712_v3  ;;  %v7796_v54 = vld [vmem:[#allocation34 + $0x2a4] ss:$16 sps:$4 sm:$0xff]   ;;  %v7799_v3 = vld [vmem:[#allocation34 + $0x2ac] ss:$16 sps:$4 sm:$0xff]  }
0x102a   :  { %5337 = vmatprep.subr.bf16.mxu1 %v7715_v36  ;;  %v7794_v36 = vld [vmem:[#allocation34 + $0x2a0] ss:$16 sps:$4 sm:$0xff]  }
0x102c   :  { %5252 = vmatpush1.bf16.msra.mxu0 %v7710_v44  ;;  %v7797_v44 = vld [vmem:[#allocation34 + $0x2a8] ss:$16 sps:$4 sm:$0xff]  }
0x102d   :  { %5338 = vmatpush1.bf16.msra.mxu1 %v7713_v27  ;;  %5253 = vmatprep.subr.bf16.mxu0 %v7718_v30  ;;  %v7802_v27 = vld [vmem:[#allocation34 + $0x2c4] ss:$16 sps:$4 sm:$0xff]   ;;  %v7805_v30 = vld [vmem:[#allocation34 + $0x2cc] ss:$16 sps:$4 sm:$0xff]  }
0x102e   :  { %5339 = vmatprep.subr.bf16.mxu1 %v7721_v57  ;;  %v7800_v57 = vld [vmem:[#allocation34 + $0x2c0] ss:$16 sps:$4 sm:$0xff]  }
0x1030   :  { %5254 = vmatpush1.bf16.msra.mxu0 %v7716_v5  ;;  %v7803_v5 = vld [vmem:[#allocation34 + $0x2c8] ss:$16 sps:$4 sm:$0xff]  }
0x1031   :  { %5340 = vmatpush1.bf16.msra.mxu1 %v7719_v38  ;;  %5255 = vmatprep.subr.bf16.mxu0 %v7724_v6  ;;  %v7808_v38 = vld [vmem:[#allocation34 + $0x2e4] ss:$16 sps:$4 sm:$0xff]   ;;  %v7811_v6 = vld [vmem:[#allocation34 + $0x2ec] ss:$16 sps:$4 sm:$0xff]  }
0x1032   :  { %5341 = vmatprep.subr.bf16.mxu1 %v7727_v39  ;;  %v7806_v39 = vld [vmem:[#allocation34 + $0x2e0] ss:$16 sps:$4 sm:$0xff]  }
0x1034   :  { %5256 = vmatpush1.bf16.msra.mxu0 %v7722_v7  ;;  %v7809_v7 = vld [vmem:[#allocation34 + $0x2e8] ss:$16 sps:$4 sm:$0xff]  }
0x1035   :  { %5342 = vmatpush1.bf16.msra.mxu1 %v7725_v9  ;;  %5257 = vmatprep.subr.bf16.mxu0 %v7730_v10  ;;  %v6537_v9 = vld [vmem:[#allocation5] ss:$0 sm:$0xff] }
0x1036   :  { %5343 = vmatprep.subr.bf16.mxu1 %v7733_v11  ;;  %vm5422_vm5 = vcmp.eq.s32.totalorder %v6537_v9, %v8914_v56  ;;  %v7822_v9 = vld [vmem:[#allocation35 + $0xd0] sm:$0xff]  }
0x1037   :  { %v6538_v10 = vsel %vm5422_vm5, 1.0, %v8475_v1 }
0x1038   :  { %5258 = vmatpush1.bf16.msra.mxu0 %v7728_v13  ;;  %v5426_v11 = vsel %vm5425_vm6, %v6538_v10, 0.0 }
0x1039   :  { %5344 = vmatpush1.bf16.msra.mxu1 %v7731_v15  ;;  %5259 = vmatprep.subr.bf16.mxu0 %v7736_v17 }
0x103a   :  { %5345 = vmatprep.subr.bf16.mxu1 %v7739_v20  ;;  %5427 = vadd.xlane.f32.xlu1 %v5426_v11  ;;  %v7823_v11 = vld [vmem:[#allocation35 + $0x90] sm:$0xff]  }
0x103c   :  { %5260 = vmatpush1.bf16.msra.mxu0 %v7734_v21 }
0x103d   :  { %5346 = vmatpush1.bf16.msra.mxu1 %v7737_v22  ;;  %5261 = vmatprep.subr.bf16.mxu0 %v7742_v23 }
0x103e   :  { %5347 = vmatprep.subr.bf16.mxu1 %v7745_v24  ;;  %v3979_v24 = vld [vmem:[%s9231_s20] sm:$0xf] }
0x1040   :  { %5262 = vmatpush1.bf16.msra.mxu0 %v7740_v25  ;;  %v3995_v25 = vsub.s32 3, %v8914_v56 }
0x1041   :  { %5348 = vmatpush1.bf16.msra.mxu1 %v7743_v26  ;;  %5263 = vmatprep.subr.bf16.mxu0 %v7748_v28  ;;  %v3992_v26 = vrot.slane %v3979_v24, %v2644_v4  ;;  %v3988_v28 = vrot.slane %v3979_v24, %v9013_v14 }
0x1042   :  { %5349 = vmatprep.subr.bf16.mxu1 %v7751_v32  ;;  %v3996_v32 = vrot.slane %v3979_v24, %v3995_v25  ;;  %v7834_v25 = vld [vmem:[#allocation35 + $0xe8] sm:$0xff]  }
0x1044   :  { %5264 = vmatpush1.bf16.msra.mxu0 %v7746_v29 }
0x1045   :  { %5350 = vmatpush1.bf16.msra.mxu1 %v7749_v37  ;;  %5265 = vmatprep.subr.bf16.mxu0 %v7754_v41 }
0x1046   :  { %5351 = vmatprep.subr.bf16.mxu1 %v7757_v45 }
0x1048   :  { %5266 = vmatpush1.bf16.msra.mxu0 %v7752_v46 }
0x1049   :  { %5352 = vmatpush1.bf16.msra.mxu1 %v7755_v47  ;;  %5267 = vmatprep.subr.bf16.mxu0 %v7760_v48 }
0x104a   :  { %5353 = vmatprep.subr.bf16.mxu1 %v7763_v50 }
0x104c   :  { %5268 = vmatpush1.bf16.msra.mxu0 %v7758_v51 }
0x104d   :  { %5354 = vmatpush1.bf16.msra.mxu1 %v7761_v40  ;;  %5280 = vmatprep.subr.bf16.mxu0 %v7766_v52 }
0x104e   :  { %5366 = vmatprep.subr.bf16.mxu1 %v7769_v8 }
0x104f   :  { %5270 = vmatmul.mubr.bf16.vlgmr.msra.gmra.mrb[60].mxu0 %v9116_v33 }
0x1050   :  { %5356 = vmatmul.mubr.bf16.vlgmr.msra.gmra.mrb[64].mxu1 %v9116_v33  ;;  %5281 = vmatpush1.bf16.msra.mxu0 %v7764_v53  ;;  %v7787_v33 = vld [vmem:[#allocation34 + $0x26c] ss:$16 sps:$4 sm:$0xff]  }
0x1051   :  { %5367 = vmatpush1.bf16.msra.mxu1 %v7767_v43  ;;  %5282 = vmatprep.subr.bf16.mxu0 %v7772_v55 }
0x1052   :  { %5368 = vmatprep.subr.bf16.mxu1 %v7775_v35  ;;  %5312 = vmatprep.mubr.bf16.mxu0 %v8474_v0 }
0x1053   :  { %5398 = vmatprep.mubr.bf16.mxu1 %v8474_v0 }
0x1054   :  { %5283 = vmatpush1.bf16.msra.mxu0 %v7770_v42 }
0x1055   :  { %5369 = vmatpush1.bf16.msra.mxu1 %v7773_v31  ;;  %5284 = vmatprep.subr.bf16.mxu0 %v7778_v49 }
0x1056   :  { %5370 = vmatprep.subr.bf16.mxu1 %v7781_v34 }
0x1058   :  { %5285 = vmatpush1.bf16.msra.mxu0 %v7776_v16 }
0x1059   :  { %5371 = vmatpush1.bf16.msra.mxu1 %v7779_v58  ;;  %5286 = vmatprep.subr.bf16.mxu0 %v7784_v59 }
0x105a   :  { %5372 = vmatprep.subr.bf16.mxu1 %v7787_v33 }
0x105c   :  { %5287 = vmatpush1.bf16.msra.mxu0 %v7782_v60 }
0x105d   :  { %5373 = vmatpush1.bf16.msra.mxu1 %v7785_v18  ;;  %5288 = vmatprep.subr.bf16.mxu0 %v7790_v61 }
0x105e   :  { %5374 = vmatprep.subr.bf16.mxu1 %v7793_v62 }
0x1060   :  { %5289 = vmatpush1.bf16.msra.mxu0 %v7788_v63 }
0x1061   :  { %5375 = vmatpush1.bf16.msra.mxu1 %v7791_v2  ;;  %5290 = vmatprep.subr.bf16.mxu0 %v7796_v54 }
0x1062   :  { %5376 = vmatprep.subr.bf16.mxu1 %v7799_v3  ;;  %v7812_v3 = vld [vmem:[#allocation35 + $0x40] sm:$0xff]  }
0x1064   :  { %5291 = vmatpush1.bf16.msra.mxu0 %v7794_v36 }
0x1065   :  { %5377 = vmatpush1.bf16.msra.mxu1 %v7797_v44  ;;  %5292 = vmatprep.subr.bf16.mxu0 %v7802_v27  ;;  %v7814_v44 = vld [vmem:[#allocation35 + $0xc0] sm:$0xff]   ;;  %v5429_v27 = vpack.c.bf16 %v6538_v10, %v6538_v10  ;;  %v7821_v10 = vld [vmem:[#allocation35 + $0x10] sm:$0xff]  }
0x1066   :  { %5378 = vmatprep.subr.bf16.mxu1 %v7805_v30  ;;  %v7813_v30 = vld [vmem:[#allocation35] sm:$0xff]  }
0x1068   :  { %5293 = vmatpush1.bf16.msra.mxu0 %v7800_v57  ;;  %v7815_v57 = vld [vmem:[#allocation35 + $0x80] sm:$0xff]  }
0x1069   :  { %5379 = vmatpush1.bf16.msra.mxu1 %v7803_v5  ;;  %5294 = vmatprep.subr.bf16.mxu0 %v7808_v38  ;;  %v7816_v5 = vld [vmem:[#allocation35 + $0x48] sm:$0xff]  }
0x106a   :  { %5380 = vmatprep.subr.bf16.mxu1 %v7811_v6  ;;  %v7818_v38 = vld [vmem:[#allocation35 + $0xc8] sm:$0xff]  }
0x106b   :  { %v7817_v6 = vld [vmem:[#allocation35 + $0x8] sm:$0xff]  }
0x106c   :  { %5295 = vmatpush1.bf16.msra.mxu0 %v7806_v39  ;;  %v7819_v39 = vld [vmem:[#allocation35 + $0x88] sm:$0xff]  }
0x106d   :  { %5381 = vmatpush1.bf16.msra.mxu1 %v7809_v7  ;;  %v7820_v7 = vld [vmem:[#allocation35 + $0x50] sm:$0xff]  }
0x106f   :  { %5313 = vmatmul.mubr.bf16.vlgmr.msra.gmra.mrb[60].mxu0 %v9097_v19 }
0x1070   :  { %5399 = vmatmul.mubr.bf16.vlgmr.msra.gmra.mrb[64].mxu1 %v9097_v19  ;;  %5469 = vmatprep.mubr.bf16.mxu0 %v8474_v0 }
0x1071   :  { %5510 = vmatprep.mubr.bf16.mxu1 %v8474_v0  ;;  %v3984_v0 = vrot.slane %v3979_v24, %v9010_v12  ;;  %v7832_v24 = vld [vmem:[#allocation35 + $0x68] sm:$0xff]  }
0x10e2   :  { %v4558_v13 = vpop.f32.mrb[56].mxu0  ;;  %v4644_v15 = vpop.f32.mrb[60].mxu1 }
0x10e3   :  { %v4560_v17 = vpop.f32.mrb[57].mxu0  ;;  %v4646_v20 = vpop.f32.mrb[61].mxu1  ;;  %v7084_v29 = vadd.f32 %v4558_v13, %v3984_v0  ;;  %v7088_v37 = vadd.f32 %v4644_v15, %v3992_v26  ;;  %v7824_v13 = vld [vmem:[#allocation35 + $0x58] sm:$0xff]  }
0x10e4   :  { %v4562_v21 = vpop.f32.mrb[58].mxu0  ;;  %v4648_v22 = vpop.f32.mrb[62].mxu1  ;;  %v7085_v41 = vadd.f32 %v4560_v17, %v3988_v28  ;;  %v7089_v45 = vadd.f32 %v4646_v20, %v3996_v32  ;;  %v7826_v15 = vld [vmem:[#allocation35 + $0xd8] sm:$0xff]  }
0x10e5   :  { %v4564_v19 = vpop.f32.mrb[59].mxu0  ;;  %v4650_v23 = vpop.f32.mrb[63].mxu1  ;;  %v7086_v46 = vadd.f32 %v4562_v21, %v3984_v0  ;;  %v7090_v47 = vadd.f32 %v4648_v22, %v3992_v26  ;;  %v4653_v50 = vmax.f32 %v7084_v29, 0.0  ;;  %v4655_v40 = vmax.f32 %v7088_v37, 0.0  ;;  %v7825_v17 = vld [vmem:[#allocation35 + $0x18] sm:$0xff]   ;;  %v7828_v21 = vld [vmem:[#allocation35 + $0x60] sm:$0xff]  }
0x10e6   :  { %v7087_v48 = vadd.f32 %v4564_v19, %v3988_v28  ;;  %v7091_v51 = vadd.f32 %v4650_v23, %v3996_v32  ;;  %v4654_v52 = vmax.f32 %v7085_v41, 0.0  ;;  %v4656_v53 = vmax.f32 %v7089_v45, 0.0  ;;  %v7827_v20 = vld [vmem:[#allocation35 + $0x98] sm:$0xff]   ;;  %v7830_v22 = vld [vmem:[#allocation35 + $0xe0] sm:$0xff]   ;;  %v7833_v0 = vld [vmem:[#allocation35 + $0x28] sm:$0xff]  }
0x10e7   :  { %v4657_v12 = vmax.f32 %v7086_v46, 0.0  ;;  %v4659_v55 = vmax.f32 %v7090_v47, 0.0  ;;  %v7829_v19 = vld [vmem:[#allocation35 + $0x20] sm:$0xff]   ;;  %v7835_v26 = vld [vmem:[#allocation35 + $0xa8] sm:$0xff]   ;;  %v7836_v28 = vld [vmem:[#allocation35 + $0x70] sm:$0xff]  }
0x10e8   :  { %v4658_v14 = vmax.f32 %v7087_v48, 0.0  ;;  %v4660_v34 = vmax.f32 %v7091_v51, 0.0  ;;  %v7831_v23 = vld [vmem:[#allocation35 + $0xa0] sm:$0xff]   ;;  %v7838_v32 = vld [vmem:[#allocation35 + $0xf0] sm:$0xff]   ;;  %v7840_v41 = vld [vmem:[#allocation35 + $0x78] sm:$0xff]   ;;  %v5428_v48 = vpop.xlane.xlu1 %5427 }
0x10e9   :  { %v7837_v29 = vld [vmem:[#allocation35 + $0x30] sm:$0xff]   ;;  %v7842_v45 = vld [vmem:[#allocation35 + $0xf8] sm:$0xff]  }
0x10ea   :  { %v7839_v37 = vld [vmem:[#allocation35 + $0xb0] sm:$0xff]   ;;  %v7841_v46 = vld [vmem:[#allocation35 + $0x38] sm:$0xff]  }
0x10eb   :  { %v7843_v47 = vld [vmem:[#allocation35 + $0xb8] sm:$0xff]  }
0x1142   :  { %v5314_v8 = vpop.f32.mrb[60].mxu0 }
0x1143   :  { %v5409_v43 = vadd.f32 %v5314_v8, %v4653_v50  ;;  %v5400_v56 = vpop.f32.mrb[64].mxu1  ;;  %v5316_v4 = vpop.f32.mrb[61].mxu0  ;;  %v5519_v50 = vmax.f32 %v5428_v48, 1.0 }
0x1144   :  { %v5411_v35 = vadd.f32 %v5400_v56, %v4655_v40  ;;  %v5410_v42 = vadd.f32 %v5316_v4, %v4654_v52  ;;  %v5402_v31 = vpop.f32.mrb[65].mxu1  ;;  %v5318_v49 = vpop.f32.mrb[62].mxu0 }
0x1145   :  { %v5412_v16 = vadd.f32 %v5402_v31, %v4656_v53  ;;  %v5413_v58 = vadd.f32 %v5318_v49, %v4657_v12  ;;  %v5404_v59 = vpop.f32.mrb[66].mxu1  ;;  %v5320_v33 = vpop.f32.mrb[63].mxu0  ;;  %7852 = vrcp.f32 %v5519_v50 }
0x1146   :  { %v5415_v60 = vadd.f32 %v5404_v59, %v4659_v55  ;;  %v5414_v18 = vadd.f32 %v5320_v33, %v4658_v14  ;;  %v5406_v61 = vpop.f32.mrb[67].mxu1  ;;  %v7845_v59 = vld [vmem:[#allocation37 + $0x8] sm:$0xff]   ;;  %v7846_v33 = vld [vmem:[#allocation37 + $0x10] sm:$0xff]  }
0x1147   :  { %v5430_v62 = vpack.c.bf16 %v5413_v58, %v5409_v43  ;;  %v5416_v63 = vadd.f32 %v5406_v61, %v4660_v34  ;;  %v7844_v58 = vld [vmem:[#allocation37] sm:$0xff]   ;;  %v7849_v61 = vld [vmem:[#allocation37 + $0x28] sm:$0xff]  }
0x1148   :  { %v5432_v2 = vpack.c.bf16 %v5415_v60, %v5411_v35  ;;  %v5431_v54 = vpack.c.bf16 %v5414_v18, %v5410_v42  ;;  %v7847_v60 = vld [vmem:[#allocation37 + $0x18] sm:$0xff]   ;;  %v7848_v18 = vld [vmem:[#allocation37 + $0x20] sm:$0xff]  }
0x1149   :  { %v5433_v36 = vpack.c.bf16 %v5416_v63, %v5412_v16  ;;  %v7851_v63 = vld [vmem:[#allocation37 + $0x38] sm:$0xff]  }
0x114a   :  { %5437 = vmatprep.subr.bf16.mxu0 %v5431_v54  ;;  %v6541_v54 = vld [vmem:[%s8639_s12] ss:$0 sm:$0xff]  ;;  %s8480_s12 = smov [#allocation38]  }
0x114b   :  { %5478 = vmatprep.subr.bf16.mxu1 %v5433_v36  ;;  %5438 = vmatpush1.bf16.msra.mxu0 %v5430_v62  ;;  %v7850_v62 = vld [vmem:[#allocation37 + $0x30] sm:$0xff]   ;;  %s6000_s14 = sshll.u32 %s8480_s12, 4  ;;  %s6001_s14 = int_to_ptr.vmem [resolvable:$true] %s6000_s14 }
0x114c   :  { %5479 = vmatpush1.bf16.msra.mxu1 %v5432_v2  ;;  %6761 = vmatprep.subr.bf16.mxu0 %v7812_v3  ;;  %s8362_s0 = scalar_lea.vmem %s6001_s14, 32  ;;  %p8367_p3 = scmp.lt.s32.totalorder %s6001_s14, %s6001_s14 }
0x114d   :  { %6783 = vmatprep.subr.bf16.mxu1 %v7814_v44  ;;  %p8363_p2 = scmp.ne.s32.totalorder %s6001_s14, %s8362_s0  ;;  %p8368_p4 = scmp.lt.s32.totalorder %s8362_s0, %s8362_s0 }
0x114e   :  { %6539 = vmatmul.mubr.msk.bf16.vlgmr.msra.gmra.mrb[64].mxu0 %vm1027_vm14, %v5429_v27 }
0x114f   :  { %6540 = vmatmul.mubr.msk.bf16.vlgmr.msra.gmra.mrb[68].mxu1 %vm1027_vm14, %v5429_v27  ;;  %6762 = vmatpush3.bf16.msra.mxu0 %v7813_v30  ;;  %v7853_v51 = vpop.eup %7852  ;;  %p8369_p5 = por %p8368_p4, %p8367_p3 }
0x1150   :  { %6784 = vmatpush3.bf16.msra.mxu1 %v7815_v57  ;;  %6763 = vmatprep.subr.bf16.mxu0 %v7816_v5 }
0x1151   :  { %6785 = vmatprep.subr.bf16.mxu1 %v7818_v38  ;;  %p8370_p6 = pnand %p8369_p5, %p8363_p2 }
0x1153   :  { %6764 = vmatpush3.bf16.msra.mxu0 %v7817_v6 }
0x1154   :  { %6786 = vmatpush3.bf16.msra.mxu1 %v7819_v39  ;;  %6765 = vmatprep.subr.bf16.mxu0 %v7820_v7 }
0x1155   :  { %6787 = vmatprep.subr.bf16.mxu1 %v7822_v9 }
0x1157   :  { %6766 = vmatpush3.bf16.msra.mxu0 %v7821_v10 }
0x1158   :  { %6788 = vmatpush3.bf16.msra.mxu1 %v7823_v11  ;;  %6767 = vmatprep.subr.bf16.mxu0 %v7824_v13 }
0x1159   :  { %6789 = vmatprep.subr.bf16.mxu1 %v7826_v15 }
0x115b   :  { %6768 = vmatpush3.bf16.msra.mxu0 %v7825_v17 }
0x115c   :  { %6790 = vmatpush3.bf16.msra.mxu1 %v7827_v20  ;;  %6769 = vmatprep.subr.bf16.mxu0 %v7828_v21 }
0x115d   :  { %6791 = vmatprep.subr.bf16.mxu1 %v7830_v22 }
0x115f   :  { %6770 = vmatpush3.bf16.msra.mxu0 %v7829_v19  ;;  %v6574_v19 = vld [vmem:[%s8649_s17] ss:$0 sm:$0xff] }
0x1160   :  { %6792 = vmatpush3.bf16.msra.mxu1 %v7831_v23  ;;  %6771 = vmatprep.subr.bf16.mxu0 %v7832_v24 }
0x1161   :  { %6793 = vmatprep.subr.bf16.mxu1 %v7834_v25 }
0x1163   :  { %6772 = vmatpush3.bf16.msra.mxu0 %v7833_v0 }
0x1164   :  { %6794 = vmatpush3.bf16.msra.mxu1 %v7835_v26  ;;  %6773 = vmatprep.subr.bf16.mxu0 %v7836_v28 }
0x1165   :  { %6795 = vmatprep.subr.bf16.mxu1 %v7838_v32 }
0x1167   :  { %6774 = vmatpush3.bf16.msra.mxu0 %v7837_v29 }
0x1168   :  { %6796 = vmatpush3.bf16.msra.mxu1 %v7839_v37  ;;  %6775 = vmatprep.subr.bf16.mxu0 %v7840_v41 }
0x1169   :  { %6797 = vmatprep.subr.bf16.mxu1 %v7842_v45 }
0x116b   :  { %6776 = vmatpush3.bf16.msra.mxu0 %v7841_v46 }
0x116c   :  { %6798 = vmatpush3.bf16.msra.mxu1 %v7843_v47  ;;  %7056 = vmatprep.subr.bf16.mxu0 %v8475_v1 }
0x1221   :  { %v5471_v40 = vpop.f32.mrb[64].mxu0 }
0x1222   :  { %v5521_v52 = vmul.f32 %v7853_v51, %v5471_v40  ;;  %v5473_v8 = vpop.f32.mrb[65].mxu0  ;;  %v5512_v53 = vpop.f32.mrb[68].mxu1 }
0x1223   :  { %v5522_v12 = vmul.f32 %v7853_v51, %v5473_v8  ;;  %v5523_v43 = vmul.f32 %v7853_v51, %v5512_v53  ;;  %v5514_v56 = vpop.f32.mrb[69].mxu1  ;;  %v5475_v4 = vpop.f32.mrb[66].mxu0 }
0x1224   :  { %v5524_v55 = vmul.f32 %v7853_v51, %v5514_v56  ;;  %v5476_v14 = vpop.f32.mrb[67].mxu0  ;;  %v5516_v35 = vpop.f32.mrb[70].mxu1  ;;  %v5525_v34 = vpack.c.bf16 %v5521_v52, %v5521_v52 }
0x1225   :  { %v5526_v42 = vpack.c.bf16 %v5522_v12, %v5522_v12  ;;  %v5527_v31 = vpack.c.bf16 %v5523_v43, %v5523_v43  ;;  %v5517_v49 = vpop.f32.mrb[71].mxu1 }
0x1226   :  { %v5528_v16 = vpack.c.bf16 %v5524_v55, %v5524_v55 }
0x1227   :  { %5824 = vmatprep.mubr.bf16.mxu0 %v5526_v42 }
0x1228   :  { %5825 = vmatmul.mubr.bf16.vlgmr.msra.gmra.mrb[68].mxu0 %v5525_v34  ;;  %5864 = vmatprep.mubr.bf16.mxu1 %v5528_v16 }
0x1229   :  { %5865 = vmatmul.mubr.bf16.vlgmr.msra.gmra.mrb[72].mxu1 %v5527_v31  ;;  %7072 = vmatprep.mubr.msk.bf16.mxu0 %vm8476_vm0, %v8475_v1 }
0x122a   :  { %7057 = vmatpush3.bf16.msra.mxu0 %v7844_v58 }
0x122b   :  { %7058 = vmatprep.subr.bf16.mxu0 %v8475_v1 }
0x122e   :  { %7059 = vmatpush3.bf16.msra.mxu0 %v7845_v59 }
0x122f   :  { %7060 = vmatprep.subr.bf16.mxu0 %v8475_v1 }
0x1232   :  { %7061 = vmatpush3.bf16.msra.mxu0 %v7846_v33 }
0x1233   :  { %7062 = vmatprep.subr.bf16.mxu0 %v8475_v1 }
0x1236   :  { %7063 = vmatpush3.bf16.msra.mxu0 %v7847_v60 }
0x1237   :  { %7064 = vmatprep.subr.bf16.mxu0 %v8475_v1 }
0x123a   :  { %7065 = vmatpush3.bf16.msra.mxu0 %v7848_v18 }
0x123b   :  { %7066 = vmatprep.subr.bf16.mxu0 %v8475_v1 }
0x123e   :  { %7067 = vmatpush3.bf16.msra.mxu0 %v7849_v61 }
0x123f   :  { %7068 = vmatprep.subr.bf16.mxu0 %v8475_v1 }
0x1242   :  { %7069 = vmatpush3.bf16.msra.mxu0 %v7850_v62 }
0x1243   :  { %7070 = vmatprep.subr.bf16.mxu0 %v8475_v1 }
0x1246   :  { %7071 = vmatpush3.bf16.msra.mxu0 %v7851_v63 }
0x12fb   :  { %v6777_v2 = vpop.f32.mrb[68].mxu0 }
0x12fc   :  { %v6778_v3 = vpop.f32.mrb[69].mxu0  ;;  %v6799_v36 = vpop.f32.mrb[72].mxu1 }
0x12fd   :  { %v6779_v44 = vadd.f32 %v6778_v3, %v6777_v2  ;;  %v6800_v27 = vpop.f32.mrb[73].mxu1  ;;  %v6780_v30 = vpop.f32.mrb[70].mxu0 }
0x12fe   :  { %v6801_v57 = vadd.f32 %v6800_v27, %v6799_v36  ;;  %v6781_v5 = vpop.f32.mrb[71].mxu0  ;;  %v6802_v38 = vpop.f32.mrb[74].mxu1 }
0x12ff   :  { %v5827_v6 = vadd.f32 %v6779_v44, %v6541_v54  ;;  %v6803_v39 = vpop.f32.mrb[75].mxu1 }
0x1301   :  { %v5867_v7 = vadd.f32 %v6801_v57, %v5827_v6 }
0x1303   :  { %v5873_v9 = vmul.f32 0.044715, %v5867_v7  ;;  %v5872_v17 = vmul.f32 0.5, %v5867_v7 }
0x1305   :  { %v5874_v10 = vmul.f32 %v5873_v9, %v5867_v7 }
0x1307   :  { %v5875_v11 = vmul.f32 %v5874_v10, %v5867_v7 }
0x1309   :  { %v5876_v13 = vadd.f32 %v5875_v11, %v5867_v7 }
0x130b   :  { %v5877_v1 = vmul.f32 0.7978846, %v5876_v13 }
0x130d   :  { %7854 = vtanh.f32 %v5877_v1 }
0x1317   :  { %v7855_v15 = vpop.eup %7854 }
0x1318   :  { %v5879_v20 = vadd.f32 1.0, %v7855_v15 }
0x131a   :  { %v5880_v21 = vmul.f32 %v5879_v20, %v5872_v17 }
0x131c   :  { %v5881_v22 = vpack.c.bf16 %v5880_v21, %v5880_v21 }
0x131e   :  { %7073 = vmatmul.mubr.bf16.vlgmr.msra.gmra.mrb[72].mxu0 %v5881_v22 }
0x13f1   :  { %v5987_v23 = vpop.f32.mrb[72].mxu0 }
0x13f2   :  { %v5988_v24 = vadd.f32 %v6574_v19, %v5987_v23  ;;  %v7074_v25 = vpop.f32.mrb[73].mxu0 }
0x13f3   :  { %v5990_v0 = vpop.f32.mrb[74].mxu0 }
0x13f4   :  { %5993 = vst [vmem:[#allocation38] sm:$0x3] %v5988_v24  ;;  %v7075_v26 = vpop.f32.mrb[75].mxu0 }
0x13f5   :  { %8373 = shalt.err (!%p8370_p6)
}
0x13f6   :  { %s8374_s17 = scalar_lea.hbm %s8654_s30, 32 }
0x13f7   :  { %p8375_p7 = scmp.ne.s32.totalorder %s8654_s30, %s8374_s17  ;;  %p8378_p8 = scmp.lt.u32.totalorder %s8374_s17, %s8654_s30 }
0x13f9   :  { %p8380_p9 = pnand %p8378_p8, %p8375_p7 }
0x13fb   :  { %8383 = shalt.err (!%p8380_p9)
}
0x13fc   :  { %6003 = dma.vmem_to_hbm [thread:$0]  %s6001_s14, 32, %s8654_s30, [#allocation4]  }
0x13fd   :  { %8408 = dma.done.wait [#allocation4], 32  }
0x13fe   :  { %8409 = vsyncadd [#allocation4], 4294967264 }
0x13ff   :  { %6007 = vsyncpa [#allocation3], 1 }
0x1400   :  { %6008 = vsyncpa [#allocation6], 1 }
0x1401   :  { %6009 = vsyncpa [#allocation9], 1 }
0x1402   :  { %6010 = vsyncpa [#allocation12], 1 }
0x1403   :  { %6011 = vsyncpa [#allocation15], 1 }
0x1404   :  { %6012 = vsyncpa [#allocation18], 1 }
0x1405   :  { %6013 = vsyncpa [#allocation21], 1 }
0x1406   :  { %6014 = vsyncpa [#allocation24], 1 }
0x1407   :  { %6015 = vsyncpa [#allocation27], 1 }
0x1408   :  { %6016 = vsyncpa [#allocation30], 1 }
0x1409   :  { %6017 = vsyncpa [#allocation33], 1 }
0x140a   :  { %6018 = vsyncpa [#allocation36], 1 }
0x140b   :  { %6019 = vsyncpa [#allocation4], 1 }

</bundles_post_ra>
